<compile_context>
chip_gen: v5e
topology: v5e:2x2
jax: 0.10.0
libtpu: 0.0.40
codegen_flags: <defaults>
</compile_context>

<pallas_src>
import functools

import jax
import jax.numpy as jnp
from jax.experimental import pallas as pl
from jax.experimental.pallas import tpu as pltpu


def _apply_activation(y, activation):
    if activation == 'relu':
        return jnp.maximum(y, 0.0)
    if activation == 'leaky':
        return jnp.where(y > 0, y, 0.1 * y)
    return y


# ----------------------------------------------------------------------------
# Fused kernel: the whole DarkNetBlock (all layers) for one batch element.
# refs = [x, w_0, b_0, ..., w_{L-1}, b_{L-1}, out, (pad_scratch, im_scratch)]
# ----------------------------------------------------------------------------
def _darknet_block_kernel(*refs, cfgs, activation, h0, w0, use_scratch):
    n_layers = len(cfgs)
    x_ref = refs[0]
    w_refs = [refs[1 + 2 * i] for i in range(n_layers)]
    b_refs = [refs[2 + 2 * i] for i in range(n_layers)]
    o_ref = refs[1 + 2 * n_layers]
    pad_ref = refs[2 + 2 * n_layers] if use_scratch else None
    im_ref = refs[3 + 2 * n_layers] if use_scratch else None

    h, w = h0, w0
    act = x_ref[0]                                    # (h, w, cin0), float32

    for li, (k, s, cin, cout) in enumerate(cfgs):     # static Python unroll
        pad = k // 2
        ho = (h + 2 * pad - k) // s + 1
        wo = (w + 2 * pad - k) // s + 1

        if k == 1 and s == 1:
            # 1x1 conv: activation matrix is already the im2col matrix.
            lhs = act.reshape(h * w, cin).astype(jnp.bfloat16)
        else:
            # In-VMEM zero padding (no jnp.pad / HBM pass in the wrapper).
            pad_ref[...] = jnp.zeros(pad_ref.shape, pad_ref.dtype)
            pad_ref[pad:pad + h, pad:pad + w, 0:cin] = act.astype(pad_ref.dtype)

            # Assemble im2col (ho*wo, k*k*cin) in VMEM scratch -> 1 matmul.
            t = 0
            for dy in range(k):
                for dx in range(k):
                    if s == 1:
                        patch = pad_ref[dy:dy + ho, dx:dx + wo, 0:cin]
                    else:
                        # TODO(synk): for stride-2 layers, deinterleave once
                        # instead of strided slices per tap.
                        full = pad_ref[dy:dy + (ho - 1) * s + 1,
                                       dx:dx + (wo - 1) * s + 1, 0:cin]
                        patch = jax.lax.slice(full, (0, 0, 0), full.shape,
                                              (s, s, 1))
                    im_ref[0:ho * wo, t * cin:(t + 1) * cin] = (
                        patch.reshape(ho * wo, cin))
                    t += 1
            lhs = im_ref[0:ho * wo, 0:k * k * cin].astype(jnp.bfloat16)

        # Single MXU matmul per layer: bf16 operands, f32 accumulation.
        y = jnp.dot(lhs, w_refs[li][...], preferred_element_type=jnp.float32)
        y = y + b_refs[li][...]                       # folded-BN bias (f32)
        y = _apply_activation(y, activation)
        act = y.reshape(ho, wo, cout)                 # stays in VMEM/vregs
        h, w = ho, wo

    o_ref[0] = act.astype(o_ref.dtype)                # one whole-slab store


# ----------------------------------------------------------------------------
# Wrapper: builds specs/scratch from the static layer configuration.
# ----------------------------------------------------------------------------
def darknet_block_forward(x_nchw, layers, activation='relu'):
    """Forward pass. Input/output are NCHW, like the PyTorch module."""
    x = jnp.transpose(x_nchw, (0, 2, 3, 1))           # NCHW -> NHWC, once
    N, H, W, C0 = x.shape
    cfgs = tuple((l['k'], l['s'], l['cin'], l['cout']) for l in layers)

    # Static shape bookkeeping + scratch sizing.
    h, w = H, W
    hp_max = wp_max = c_max = m_max = k_max = 1
    need_scratch = False
    for (k, s, cin, cout) in cfgs:
        pad = k // 2
        ho = (h + 2 * pad - k) // s + 1
        wo = (w + 2 * pad - k) // s + 1
        if not (k == 1 and s == 1):
            need_scratch = True
            hp_max = max(hp_max, h + 2 * pad)
            wp_max = max(wp_max, w + 2 * pad)
            c_max = max(c_max, cin)
            m_max = max(m_max, ho * wo)
            k_max = max(k_max, k * k * cin)
        h, w = ho, wo
    Ho, Wo, Cout = h, w, cfgs[-1][3]

    args = [x]
    in_specs = [pl.BlockSpec((1, H, W, C0), lambda n: (n, 0, 0, 0))]
    for l in layers:
        kk, cc = l['w_folded'].shape
        args += [l['w_folded'], l['bias2d']]
        in_specs += [pl.BlockSpec((kk, cc), lambda n: (0, 0)),
                     pl.BlockSpec((1, cc), lambda n: (0, 0))]

    scratch_shapes = []
    if need_scratch:
        scratch_shapes = [
            pltpu.VMEM((hp_max, wp_max, c_max), jnp.float32),  # padded image
            pltpu.VMEM((m_max, k_max), jnp.float32),           # im2col matrix
        ]

    kernel = functools.partial(
        _darknet_block_kernel, cfgs=cfgs, activation=activation,
        h0=H, w0=W, use_scratch=need_scratch)

    out = pl.pallas_call(
        kernel,
        out_shape=jax.ShapeDtypeStruct((N, Ho, Wo, Cout), x.dtype),
        grid=(N,),
        in_specs=in_specs,
        out_specs=pl.BlockSpec((1, Ho, Wo, Cout), lambda n: (n, 0, 0, 0)),
        scratch_shapes=scratch_shapes,
        compiler_params=pltpu.CompilerParams(
            dimension_semantics=("parallel",)),
    )(*args)
    return jnp.transpose(out, (0, 3, 1, 2))           # NHWC -> NCHW


# ----------------------------------------------------------------------------
# Parameter construction mirroring DarkNetBlock.__init__ (BN folded).
# ----------------------------------------------------------------------------
def make_darknet_block_params(key, in_channel, channel, n_layers,
                              kernel_size=3, stride=1):
    strides = [stride] + [1] * (n_layers - 1)
    kernels = [kernel_size, 1] * (n_layers // 2) + [kernel_size]
    eps = 1e-5
    layers = []
    cin = in_channel
    for s, k in zip(strides, kernels):    # zip truncates like the torch code
        cout = channel if k == 3 else channel // 2
        key, kw_key, kg_key, kb_key = jax.random.split(key, 4)
        w = 0.1 * jax.random.normal(kw_key, (k, k, cin, cout), jnp.float32)
        gamma = 1.0 + 0.1 * jax.random.normal(kg_key, (cout,), jnp.float32)
        beta = 0.1 * jax.random.normal(kb_key, (cout,), jnp.float32)
        # Eval-mode BN (running_mean=0, running_var=1): scale folded into the
        # conv weight in f32 BEFORE the bf16 cast; bias kept separately.
        scale = gamma / jnp.sqrt(1.0 + eps)
        bias = beta
        w_folded = (w * scale).reshape(k * k * cin, cout).astype(jnp.bfloat16)
        layers.append(dict(k=k, s=s, cin=cin, cout=cout,
                           w_folded=w_folded,
                           bias2d=bias.reshape(1, cout)))
        cin = cout
    return layers, cin


# ----------------------------------------------------------------------------
# Pure-JAX reference (lax conv, same bf16 operand quantization) for checking.
# ----------------------------------------------------------------------------
def _reference_forward(x_nchw, layers, activation='relu'):
    x = jnp.transpose(x_nchw, (0, 2, 3, 1))
    for l in layers:
        k, s = l['k'], l['s']
        pad = k // 2
        w = l['w_folded'].reshape(k, k, l['cin'], l['cout'])
        y = jax.lax.conv_general_dilated(
            x.astype(jnp.bfloat16), w, window_strides=(s, s),
            padding=[(pad, pad), (pad, pad)],
            dimension_numbers=('NHWC', 'HWIO', 'NHWC'),
            preferred_element_type=jnp.float32)
        y = y + l['bias2d'].reshape(1, 1, 1, -1)
        x = _apply_activation(y, activation)
    return jnp.transpose(x, (0, 3, 1, 2))


if __name__ == "__main__":
    key = jax.random.PRNGKey(0)
    key, xkey = jax.random.split(key)

    # DarkNetBlock(in_channel=4, channel=8, n_layers=3, kernel_size=3, stride=1)
    in_channel, channel, n_layers = 4, 8, 3
    layers, out_channel = make_darknet_block_params(
        key, in_channel, channel, n_layers, kernel_size=3, stride=1)

    x = jax.random.normal(xkey, (2, in_channel, 16, 16), jnp.float32)  # NCHW

    out = darknet_block_forward(x, layers, activation='relu')
    out = jax.block_until_ready(out)

    ref = _reference_forward(x, layers, activation='relu')
    assert out.shape == (2, out_channel, 16, 16), out.shape
    assert jnp.allclose(out, ref, atol=2e-2, rtol=2e-2), \
        float(jnp.max(jnp.abs(out - ref)))

    print("KERNEL_OK")
</pallas_src>

<mosaic_0001>
module attributes {stable_mosaic.version = 11 : i64} {
  func.func @_darknet_block_kernel(%arg0: i32, %arg1: memref<1x16x16x4xf32, #tpu.memory_space<vmem>>, %arg2: memref<36x8xbf16, #tpu.memory_space<vmem>>, %arg3: memref<1x8xf32, #tpu.memory_space<vmem>>, %arg4: memref<8x4xbf16, #tpu.memory_space<vmem>>, %arg5: memref<1x4xf32, #tpu.memory_space<vmem>>, %arg6: memref<36x8xbf16, #tpu.memory_space<vmem>>, %arg7: memref<1x8xf32, #tpu.memory_space<vmem>>, %arg8: memref<1x16x16x8xf32, #tpu.memory_space<vmem>>, %arg9: memref<18x18x4xf32, #tpu.memory_space<vmem>>, %arg10: memref<256x36xf32, #tpu.memory_space<vmem>>) attributes {dimension_semantics = [#tpu.dimension_semantics<parallel>], iteration_bounds = array<i64: 2>, scalar_prefetch = 0 : i64, scratch_operands = 2 : i64, tpu.core_type = #tpu.core_type<tc>, window_params = [{transform_indices = @transform_0, window_bounds = array<i64: 1, 16, 16, 4>}, {pipeline_mode = #tpu.pipeline_mode<synchronous>, transform_indices = @transform_1, window_bounds = array<i64: 36, 8>}, {pipeline_mode = #tpu.pipeline_mode<synchronous>, transform_indices = @transform_2, window_bounds = array<i64: 1, 8>}, {pipeline_mode = #tpu.pipeline_mode<synchronous>, transform_indices = @transform_3, window_bounds = array<i64: 8, 4>}, {pipeline_mode = #tpu.pipeline_mode<synchronous>, transform_indices = @transform_4, window_bounds = array<i64: 1, 4>}, {pipeline_mode = #tpu.pipeline_mode<synchronous>, transform_indices = @transform_5, window_bounds = array<i64: 36, 8>}, {pipeline_mode = #tpu.pipeline_mode<synchronous>, transform_indices = @transform_6, window_bounds = array<i64: 1, 8>}, {transform_indices = @transform_7, window_bounds = array<i64: 1, 16, 16, 8>}]} {
    %c0 = arith.constant 0 : index
    %c0_0 = arith.constant 0 : index
    %c0_1 = arith.constant 0 : index
    %c0_2 = arith.constant 0 : index
    %0 = vector.load %arg1[%c0, %c0_0, %c0_1, %c0_2] : memref<1x16x16x4xf32, #tpu.memory_space<vmem>>, vector<1x16x16x4xf32>
    %1 = vector.shape_cast %0 : vector<1x16x16x4xf32> to vector<16x16x4xf32>
    %cst = arith.constant 0.000000e+00 : f32
    %2 = vector.broadcast %cst : f32 to vector<18x18x4xf32>
    %c0_3 = arith.constant 0 : index
    %c0_4 = arith.constant 0 : index
    %c0_5 = arith.constant 0 : index
    %3 = vector.load %arg9[%c0_3, %c0_4, %c0_5] : memref<18x18x4xf32, #tpu.memory_space<vmem>>, vector<18x18x4xf32>
    tpu.vector_store %arg9[%c0_3, %c0_4, %c0_5], %2 {strides = array<i32>} : memref<18x18x4xf32, #tpu.memory_space<vmem>>, vector<18x18x4xf32>,
    %c1 = arith.constant 1 : index
    %c1_6 = arith.constant 1 : index
    %c0_7 = arith.constant 0 : index
    %4 = vector.load %arg9[%c1, %c1_6, %c0_7] : memref<18x18x4xf32, #tpu.memory_space<vmem>>, vector<16x16x4xf32>
    tpu.vector_store %arg9[%c1, %c1_6, %c0_7], %1 {strides = array<i32>} : memref<18x18x4xf32, #tpu.memory_space<vmem>>, vector<16x16x4xf32>,
    %c0_8 = arith.constant 0 : index
    %c0_9 = arith.constant 0 : index
    %c0_10 = arith.constant 0 : index
    %5 = vector.load %arg9[%c0_8, %c0_9, %c0_10] : memref<18x18x4xf32, #tpu.memory_space<vmem>>, vector<16x16x4xf32>
    %6 = vector.shape_cast %5 : vector<16x16x4xf32> to vector<256x4xf32>
    %c0_11 = arith.constant 0 : index
    %c0_12 = arith.constant 0 : index
    %7 = vector.load %arg10[%c0_11, %c0_12] : memref<256x36xf32, #tpu.memory_space<vmem>>, vector<256x4xf32>
    tpu.vector_store %arg10[%c0_11, %c0_12], %6 {strides = array<i32>} : memref<256x36xf32, #tpu.memory_space<vmem>>, vector<256x4xf32>,
    %c0_13 = arith.constant 0 : index
    %c1_14 = arith.constant 1 : index
    %c0_15 = arith.constant 0 : index
    %8 = vector.load %arg9[%c0_13, %c1_14, %c0_15] : memref<18x18x4xf32, #tpu.memory_space<vmem>>, vector<16x16x4xf32>
    %9 = vector.shape_cast %8 : vector<16x16x4xf32> to vector<256x4xf32>
    %c0_16 = arith.constant 0 : index
    %c4 = arith.constant 4 : index
    %10 = vector.load %arg10[%c0_16, %c4] : memref<256x36xf32, #tpu.memory_space<vmem>>, vector<256x4xf32>
    tpu.vector_store %arg10[%c0_16, %c4], %9 {strides = array<i32>} : memref<256x36xf32, #tpu.memory_space<vmem>>, vector<256x4xf32>,
    %c0_17 = arith.constant 0 : index
    %c2 = arith.constant 2 : index
    %c0_18 = arith.constant 0 : index
    %11 = vector.load %arg9[%c0_17, %c2, %c0_18] : memref<18x18x4xf32, #tpu.memory_space<vmem>>, vector<16x16x4xf32>
    %12 = vector.shape_cast %11 : vector<16x16x4xf32> to vector<256x4xf32>
    %c0_19 = arith.constant 0 : index
    %c8 = arith.constant 8 : index
    %13 = vector.load %arg10[%c0_19, %c8] : memref<256x36xf32, #tpu.memory_space<vmem>>, vector<256x4xf32>
    tpu.vector_store %arg10[%c0_19, %c8], %12 {strides = array<i32>} : memref<256x36xf32, #tpu.memory_space<vmem>>, vector<256x4xf32>,
    %c1_20 = arith.constant 1 : index
    %c0_21 = arith.constant 0 : index
    %c0_22 = arith.constant 0 : index
    %14 = vector.load %arg9[%c1_20, %c0_21, %c0_22] : memref<18x18x4xf32, #tpu.memory_space<vmem>>, vector<16x16x4xf32>
    %15 = vector.shape_cast %14 : vector<16x16x4xf32> to vector<256x4xf32>
    %c0_23 = arith.constant 0 : index
    %c12 = arith.constant 12 : index
    %16 = vector.load %arg10[%c0_23, %c12] : memref<256x36xf32, #tpu.memory_space<vmem>>, vector<256x4xf32>
    tpu.vector_store %arg10[%c0_23, %c12], %15 {strides = array<i32>} : memref<256x36xf32, #tpu.memory_space<vmem>>, vector<256x4xf32>,
    %c1_24 = arith.constant 1 : index
    %c1_25 = arith.constant 1 : index
    %c0_26 = arith.constant 0 : index
    %17 = vector.load %arg9[%c1_24, %c1_25, %c0_26] : memref<18x18x4xf32, #tpu.memory_space<vmem>>, vector<16x16x4xf32>
    %18 = vector.shape_cast %17 : vector<16x16x4xf32> to vector<256x4xf32>
    %c0_27 = arith.constant 0 : index
    %c16 = arith.constant 16 : index
    %19 = vector.load %arg10[%c0_27, %c16] : memref<256x36xf32, #tpu.memory_space<vmem>>, vector<256x4xf32>
    tpu.vector_store %arg10[%c0_27, %c16], %18 {strides = array<i32>} : memref<256x36xf32, #tpu.memory_space<vmem>>, vector<256x4xf32>,
    %c1_28 = arith.constant 1 : index
    %c2_29 = arith.constant 2 : index
    %c0_30 = arith.constant 0 : index
    %20 = vector.load %arg9[%c1_28, %c2_29, %c0_30] : memref<18x18x4xf32, #tpu.memory_space<vmem>>, vector<16x16x4xf32>
    %21 = vector.shape_cast %20 : vector<16x16x4xf32> to vector<256x4xf32>
    %c0_31 = arith.constant 0 : index
    %c20 = arith.constant 20 : index
    %22 = vector.load %arg10[%c0_31, %c20] : memref<256x36xf32, #tpu.memory_space<vmem>>, vector<256x4xf32>
    tpu.vector_store %arg10[%c0_31, %c20], %21 {strides = array<i32>} : memref<256x36xf32, #tpu.memory_space<vmem>>, vector<256x4xf32>,
    %c2_32 = arith.constant 2 : index
    %c0_33 = arith.constant 0 : index
    %c0_34 = arith.constant 0 : index
    %23 = vector.load %arg9[%c2_32, %c0_33, %c0_34] : memref<18x18x4xf32, #tpu.memory_space<vmem>>, vector<16x16x4xf32>
    %24 = vector.shape_cast %23 : vector<16x16x4xf32> to vector<256x4xf32>
    %c0_35 = arith.constant 0 : index
    %c24 = arith.constant 24 : index
    %25 = vector.load %arg10[%c0_35, %c24] : memref<256x36xf32, #tpu.memory_space<vmem>>, vector<256x4xf32>
    tpu.vector_store %arg10[%c0_35, %c24], %24 {strides = array<i32>} : memref<256x36xf32, #tpu.memory_space<vmem>>, vector<256x4xf32>,
    %c2_36 = arith.constant 2 : index
    %c1_37 = arith.constant 1 : index
    %c0_38 = arith.constant 0 : index
    %26 = vector.load %arg9[%c2_36, %c1_37, %c0_38] : memref<18x18x4xf32, #tpu.memory_space<vmem>>, vector<16x16x4xf32>
    %27 = vector.shape_cast %26 : vector<16x16x4xf32> to vector<256x4xf32>
    %c0_39 = arith.constant 0 : index
    %c28 = arith.constant 28 : index
    %28 = vector.load %arg10[%c0_39, %c28] : memref<256x36xf32, #tpu.memory_space<vmem>>, vector<256x4xf32>
    tpu.vector_store %arg10[%c0_39, %c28], %27 {strides = array<i32>} : memref<256x36xf32, #tpu.memory_space<vmem>>, vector<256x4xf32>,
    %c2_40 = arith.constant 2 : index
    %c2_41 = arith.constant 2 : index
    %c0_42 = arith.constant 0 : index
    %29 = vector.load %arg9[%c2_40, %c2_41, %c0_42] : memref<18x18x4xf32, #tpu.memory_space<vmem>>, vector<16x16x4xf32>
    %30 = vector.shape_cast %29 : vector<16x16x4xf32> to vector<256x4xf32>
    %c0_43 = arith.constant 0 : index
    %c32 = arith.constant 32 : index
    %31 = vector.load %arg10[%c0_43, %c32] : memref<256x36xf32, #tpu.memory_space<vmem>>, vector<256x4xf32>
    tpu.vector_store %arg10[%c0_43, %c32], %30 {strides = array<i32>} : memref<256x36xf32, #tpu.memory_space<vmem>>, vector<256x4xf32>,
    %c0_44 = arith.constant 0 : index
    %c0_45 = arith.constant 0 : index
    %32 = vector.load %arg10[%c0_44, %c0_45] : memref<256x36xf32, #tpu.memory_space<vmem>>, vector<256x36xf32>
    %33 = arith.truncf %32 : vector<256x36xf32> to vector<256x36xbf16>
    %c0_46 = arith.constant 0 : index
    %c0_47 = arith.constant 0 : index
    %34 = vector.load %arg2[%c0_46, %c0_47] : memref<36x8xbf16, #tpu.memory_space<vmem>>, vector<36x8xbf16>
    %cst_48 = arith.constant dense<0.000000e+00> : vector<256x8xf32>
    %35 = tpu.matmul %33, %34, %cst_48 {dimension_numbers = #tpu.dot_dimension_numbers<[1], [0], [0], [1], [0, 0, 1, 1], [], []>} : vector<256x36xbf16>, vector<36x8xbf16>, vector<256x8xf32> -> vector<256x8xf32>
    %c0_49 = arith.constant 0 : index
    %c0_50 = arith.constant 0 : index
    %36 = vector.load %arg3[%c0_49, %c0_50] : memref<1x8xf32, #tpu.memory_space<vmem>>, vector<1x8xf32>
    %37 = vector.broadcast %36 : vector<1x8xf32> to vector<256x8xf32>
    %38 = arith.addf %35, %37 : vector<256x8xf32>
    %cst_51 = arith.constant 0.000000e+00 : f32
    %39 = vector.broadcast %cst_51 : f32 to vector<256x8xf32>
    %40 = arith.maximumf %38, %39 : vector<256x8xf32>
    %41 = vector.shape_cast %40 : vector<256x8xf32> to vector<16x16x8xf32>
    %42 = vector.shape_cast %41 : vector<16x16x8xf32> to vector<256x8xf32>
    %43 = arith.truncf %42 : vector<256x8xf32> to vector<256x8xbf16>
    %c0_52 = arith.constant 0 : index
    %c0_53 = arith.constant 0 : index
    %44 = vector.load %arg4[%c0_52, %c0_53] : memref<8x4xbf16, #tpu.memory_space<vmem>>, vector<8x4xbf16>
    %cst_54 = arith.constant dense<0.000000e+00> : vector<256x4xf32>
    %45 = tpu.matmul %43, %44, %cst_54 {dimension_numbers = #tpu.dot_dimension_numbers<[1], [0], [0], [1], [0, 0, 1, 1], [], []>} : vector<256x8xbf16>, vector<8x4xbf16>, vector<256x4xf32> -> vector<256x4xf32>
    %c0_55 = arith.constant 0 : index
    %c0_56 = arith.constant 0 : index
    %46 = vector.load %arg5[%c0_55, %c0_56] : memref<1x4xf32, #tpu.memory_space<vmem>>, vector<1x4xf32>
    %47 = vector.broadcast %46 : vector<1x4xf32> to vector<256x4xf32>
    %48 = arith.addf %45, %47 : vector<256x4xf32>
    %cst_57 = arith.constant 0.000000e+00 : f32
    %49 = vector.broadcast %cst_57 : f32 to vector<256x4xf32>
    %50 = arith.maximumf %48, %49 : vector<256x4xf32>
    %51 = vector.shape_cast %50 : vector<256x4xf32> to vector<16x16x4xf32>
    %cst_58 = arith.constant 0.000000e+00 : f32
    %52 = vector.broadcast %cst_58 : f32 to vector<18x18x4xf32>
    %c0_59 = arith.constant 0 : index
    %c0_60 = arith.constant 0 : index
    %c0_61 = arith.constant 0 : index
    %53 = vector.load %arg9[%c0_59, %c0_60, %c0_61] : memref<18x18x4xf32, #tpu.memory_space<vmem>>, vector<18x18x4xf32>
    tpu.vector_store %arg9[%c0_59, %c0_60, %c0_61], %52 {strides = array<i32>} : memref<18x18x4xf32, #tpu.memory_space<vmem>>, vector<18x18x4xf32>,
    %c1_62 = arith.constant 1 : index
    %c1_63 = arith.constant 1 : index
    %c0_64 = arith.constant 0 : index
    %54 = vector.load %arg9[%c1_62, %c1_63, %c0_64] : memref<18x18x4xf32, #tpu.memory_space<vmem>>, vector<16x16x4xf32>
    tpu.vector_store %arg9[%c1_62, %c1_63, %c0_64], %51 {strides = array<i32>} : memref<18x18x4xf32, #tpu.memory_space<vmem>>, vector<16x16x4xf32>,
    %c0_65 = arith.constant 0 : index
    %c0_66 = arith.constant 0 : index
    %c0_67 = arith.constant 0 : index
    %55 = vector.load %arg9[%c0_65, %c0_66, %c0_67] : memref<18x18x4xf32, #tpu.memory_space<vmem>>, vector<16x16x4xf32>
    %56 = vector.shape_cast %55 : vector<16x16x4xf32> to vector<256x4xf32>
    %c0_68 = arith.constant 0 : index
    %c0_69 = arith.constant 0 : index
    %57 = vector.load %arg10[%c0_68, %c0_69] : memref<256x36xf32, #tpu.memory_space<vmem>>, vector<256x4xf32>
    tpu.vector_store %arg10[%c0_68, %c0_69], %56 {strides = array<i32>} : memref<256x36xf32, #tpu.memory_space<vmem>>, vector<256x4xf32>,
    %c0_70 = arith.constant 0 : index
    %c1_71 = arith.constant 1 : index
    %c0_72 = arith.constant 0 : index
    %58 = vector.load %arg9[%c0_70, %c1_71, %c0_72] : memref<18x18x4xf32, #tpu.memory_space<vmem>>, vector<16x16x4xf32>
    %59 = vector.shape_cast %58 : vector<16x16x4xf32> to vector<256x4xf32>
    %c0_73 = arith.constant 0 : index
    %c4_74 = arith.constant 4 : index
    %60 = vector.load %arg10[%c0_73, %c4_74] : memref<256x36xf32, #tpu.memory_space<vmem>>, vector<256x4xf32>
    tpu.vector_store %arg10[%c0_73, %c4_74], %59 {strides = array<i32>} : memref<256x36xf32, #tpu.memory_space<vmem>>, vector<256x4xf32>,
    %c0_75 = arith.constant 0 : index
    %c2_76 = arith.constant 2 : index
    %c0_77 = arith.constant 0 : index
    %61 = vector.load %arg9[%c0_75, %c2_76, %c0_77] : memref<18x18x4xf32, #tpu.memory_space<vmem>>, vector<16x16x4xf32>
    %62 = vector.shape_cast %61 : vector<16x16x4xf32> to vector<256x4xf32>
    %c0_78 = arith.constant 0 : index
    %c8_79 = arith.constant 8 : index
    %63 = vector.load %arg10[%c0_78, %c8_79] : memref<256x36xf32, #tpu.memory_space<vmem>>, vector<256x4xf32>
    tpu.vector_store %arg10[%c0_78, %c8_79], %62 {strides = array<i32>} : memref<256x36xf32, #tpu.memory_space<vmem>>, vector<256x4xf32>,
    %c1_80 = arith.constant 1 : index
    %c0_81 = arith.constant 0 : index
    %c0_82 = arith.constant 0 : index
    %64 = vector.load %arg9[%c1_80, %c0_81, %c0_82] : memref<18x18x4xf32, #tpu.memory_space<vmem>>, vector<16x16x4xf32>
    %65 = vector.shape_cast %64 : vector<16x16x4xf32> to vector<256x4xf32>
    %c0_83 = arith.constant 0 : index
    %c12_84 = arith.constant 12 : index
    %66 = vector.load %arg10[%c0_83, %c12_84] : memref<256x36xf32, #tpu.memory_space<vmem>>, vector<256x4xf32>
    tpu.vector_store %arg10[%c0_83, %c12_84], %65 {strides = array<i32>} : memref<256x36xf32, #tpu.memory_space<vmem>>, vector<256x4xf32>,
    %c1_85 = arith.constant 1 : index
    %c1_86 = arith.constant 1 : index
    %c0_87 = arith.constant 0 : index
    %67 = vector.load %arg9[%c1_85, %c1_86, %c0_87] : memref<18x18x4xf32, #tpu.memory_space<vmem>>, vector<16x16x4xf32>
    %68 = vector.shape_cast %67 : vector<16x16x4xf32> to vector<256x4xf32>
    %c0_88 = arith.constant 0 : index
    %c16_89 = arith.constant 16 : index
    %69 = vector.load %arg10[%c0_88, %c16_89] : memref<256x36xf32, #tpu.memory_space<vmem>>, vector<256x4xf32>
    tpu.vector_store %arg10[%c0_88, %c16_89], %68 {strides = array<i32>} : memref<256x36xf32, #tpu.memory_space<vmem>>, vector<256x4xf32>,
    %c1_90 = arith.constant 1 : index
    %c2_91 = arith.constant 2 : index
    %c0_92 = arith.constant 0 : index
    %70 = vector.load %arg9[%c1_90, %c2_91, %c0_92] : memref<18x18x4xf32, #tpu.memory_space<vmem>>, vector<16x16x4xf32>
    %71 = vector.shape_cast %70 : vector<16x16x4xf32> to vector<256x4xf32>
    %c0_93 = arith.constant 0 : index
    %c20_94 = arith.constant 20 : index
    %72 = vector.load %arg10[%c0_93, %c20_94] : memref<256x36xf32, #tpu.memory_space<vmem>>, vector<256x4xf32>
    tpu.vector_store %arg10[%c0_93, %c20_94], %71 {strides = array<i32>} : memref<256x36xf32, #tpu.memory_space<vmem>>, vector<256x4xf32>,
    %c2_95 = arith.constant 2 : index
    %c0_96 = arith.constant 0 : index
    %c0_97 = arith.constant 0 : index
    %73 = vector.load %arg9[%c2_95, %c0_96, %c0_97] : memref<18x18x4xf32, #tpu.memory_space<vmem>>, vector<16x16x4xf32>
    %74 = vector.shape_cast %73 : vector<16x16x4xf32> to vector<256x4xf32>
    %c0_98 = arith.constant 0 : index
    %c24_99 = arith.constant 24 : index
    %75 = vector.load %arg10[%c0_98, %c24_99] : memref<256x36xf32, #tpu.memory_space<vmem>>, vector<256x4xf32>
    tpu.vector_store %arg10[%c0_98, %c24_99], %74 {strides = array<i32>} : memref<256x36xf32, #tpu.memory_space<vmem>>, vector<256x4xf32>,
    %c2_100 = arith.constant 2 : index
    %c1_101 = arith.constant 1 : index
    %c0_102 = arith.constant 0 : index
    %76 = vector.load %arg9[%c2_100, %c1_101, %c0_102] : memref<18x18x4xf32, #tpu.memory_space<vmem>>, vector<16x16x4xf32>
    %77 = vector.shape_cast %76 : vector<16x16x4xf32> to vector<256x4xf32>
    %c0_103 = arith.constant 0 : index
    %c28_104 = arith.constant 28 : index
    %78 = vector.load %arg10[%c0_103, %c28_104] : memref<256x36xf32, #tpu.memory_space<vmem>>, vector<256x4xf32>
    tpu.vector_store %arg10[%c0_103, %c28_104], %77 {strides = array<i32>} : memref<256x36xf32, #tpu.memory_space<vmem>>, vector<256x4xf32>,
    %c2_105 = arith.constant 2 : index
    %c2_106 = arith.constant 2 : index
    %c0_107 = arith.constant 0 : index
    %79 = vector.load %arg9[%c2_105, %c2_106, %c0_107] : memref<18x18x4xf32, #tpu.memory_space<vmem>>, vector<16x16x4xf32>
    %80 = vector.shape_cast %79 : vector<16x16x4xf32> to vector<256x4xf32>
    %c0_108 = arith.constant 0 : index
    %c32_109 = arith.constant 32 : index
    %81 = vector.load %arg10[%c0_108, %c32_109] : memref<256x36xf32, #tpu.memory_space<vmem>>, vector<256x4xf32>
    tpu.vector_store %arg10[%c0_108, %c32_109], %80 {strides = array<i32>} : memref<256x36xf32, #tpu.memory_space<vmem>>, vector<256x4xf32>,
    %c0_110 = arith.constant 0 : index
    %c0_111 = arith.constant 0 : index
    %82 = vector.load %arg10[%c0_110, %c0_111] : memref<256x36xf32, #tpu.memory_space<vmem>>, vector<256x36xf32>
    %83 = arith.truncf %82 : vector<256x36xf32> to vector<256x36xbf16>
    %c0_112 = arith.constant 0 : index
    %c0_113 = arith.constant 0 : index
    %84 = vector.load %arg6[%c0_112, %c0_113] : memref<36x8xbf16, #tpu.memory_space<vmem>>, vector<36x8xbf16>
    %cst_114 = arith.constant dense<0.000000e+00> : vector<256x8xf32>
    %85 = tpu.matmul %83, %84, %cst_114 {dimension_numbers = #tpu.dot_dimension_numbers<[1], [0], [0], [1], [0, 0, 1, 1], [], []>} : vector<256x36xbf16>, vector<36x8xbf16>, vector<256x8xf32> -> vector<256x8xf32>
    %c0_115 = arith.constant 0 : index
    %c0_116 = arith.constant 0 : index
    %86 = vector.load %arg7[%c0_115, %c0_116] : memref<1x8xf32, #tpu.memory_space<vmem>>, vector<1x8xf32>
    %87 = vector.broadcast %86 : vector<1x8xf32> to vector<256x8xf32>
    %88 = arith.addf %85, %87 : vector<256x8xf32>
    %cst_117 = arith.constant 0.000000e+00 : f32
    %89 = vector.broadcast %cst_117 : f32 to vector<256x8xf32>
    %90 = arith.maximumf %88, %89 : vector<256x8xf32>
    %91 = vector.shape_cast %90 : vector<256x8xf32> to vector<16x16x8xf32>
    %c0_118 = arith.constant 0 : index
    %c0_119 = arith.constant 0 : index
    %c0_120 = arith.constant 0 : index
    %c0_121 = arith.constant 0 : index
    %92 = vector.load %arg8[%c0_118, %c0_119, %c0_120, %c0_121] : memref<1x16x16x8xf32, #tpu.memory_space<vmem>>, vector<1x16x16x8xf32>
    %93 = vector.shape_cast %92 : vector<1x16x16x8xf32> to vector<16x16x8xf32>
    %94 = vector.shape_cast %91 : vector<16x16x8xf32> to vector<1x16x16x8xf32>
    tpu.vector_store %arg8[%c0_118, %c0_119, %c0_120, %c0_121], %94 {strides = array<i32>} : memref<1x16x16x8xf32, #tpu.memory_space<vmem>>, vector<1x16x16x8xf32>,
    return
  }
  func.func @transform_0(%arg0: i32) -> (i32, i32, i32, i32) {
    %c0_i32 = arith.constant 0 : i32
    %c0_i32_0 = arith.constant 0 : i32
    %c0_i32_1 = arith.constant 0 : i32
    %c0_i32_2 = arith.constant 0 : i32
    return %arg0, %c0_i32, %c0_i32_0, %c0_i32_1 : i32, i32, i32, i32
  }
  func.func @transform_1(%arg0: i32) -> (i32, i32) {
    %c0_i32 = arith.constant 0 : i32
    %c0_i32_0 = arith.constant 0 : i32
    %c0_i32_1 = arith.constant 0 : i32
    return %c0_i32, %c0_i32_0 : i32, i32
  }
  func.func @transform_2(%arg0: i32) -> (i32, i32) {
    %c0_i32 = arith.constant 0 : i32
    %c0_i32_0 = arith.constant 0 : i32
    %c0_i32_1 = arith.constant 0 : i32
    return %c0_i32, %c0_i32_0 : i32, i32
  }
  func.func @transform_3(%arg0: i32) -> (i32, i32) {
    %c0_i32 = arith.constant 0 : i32
    %c0_i32_0 = arith.constant 0 : i32
    %c0_i32_1 = arith.constant 0 : i32
    return %c0_i32, %c0_i32_0 : i32, i32
  }
  func.func @transform_4(%arg0: i32) -> (i32, i32) {
    %c0_i32 = arith.constant 0 : i32
    %c0_i32_0 = arith.constant 0 : i32
    %c0_i32_1 = arith.constant 0 : i32
    return %c0_i32, %c0_i32_0 : i32, i32
  }
  func.func @transform_5(%arg0: i32) -> (i32, i32) {
    %c0_i32 = arith.constant 0 : i32
    %c0_i32_0 = arith.constant 0 : i32
    %c0_i32_1 = arith.constant 0 : i32
    return %c0_i32, %c0_i32_0 : i32, i32
  }
  func.func @transform_6(%arg0: i32) -> (i32, i32) {
    %c0_i32 = arith.constant 0 : i32
    %c0_i32_0 = arith.constant 0 : i32
    %c0_i32_1 = arith.constant 0 : i32
    return %c0_i32, %c0_i32_0 : i32, i32
  }
  func.func @transform_7(%arg0: i32) -> (i32, i32, i32, i32) {
    %c0_i32 = arith.constant 0 : i32
    %c0_i32_0 = arith.constant 0 : i32
    %c0_i32_1 = arith.constant 0 : i32
    %c0_i32_2 = arith.constant 0 : i32
    return %arg0, %c0_i32, %c0_i32_0, %c0_i32_1 : i32, i32, i32, i32
  }
}

</mosaic_0001>

<bundles_post_ra>
// kernel: tpu_custom_call.1
= control target key start
LH: loop header
LB: loop body
LE: loop exit
PB: predicated region body
PF: predicated region fallthrough
CT: control target
= control target key end

     0   :  { %s4633_s24 = smov 0   ;;  %s7017_s0 = inlined_call_operand.vmem [shape: f32[2,16,16,4], index: 0, kind: input, shape index: {}]   ;;  %s7018_s1 = inlined_call_operand.vmem [shape: bf16[36,8], index: 1, kind: input, shape index: {}]   ;;  %s7019_s2 = inlined_call_operand.vmem [shape: f32[1,8], index: 2, kind: input, shape index: {}]   ;;  %s7020_s3 = inlined_call_operand.vmem [shape: bf16[8,4], index: 3, kind: input, shape index: {}]   ;;  %s7021_s4 = inlined_call_operand.vmem [shape: f32[1,4], index: 4, kind: input, shape index: {}]   ;;  %s7022_s5 = inlined_call_operand.vmem [shape: bf16[36,8], index: 5, kind: input, shape index: {}]   ;;  %s7023_s6 = inlined_call_operand.vmem [shape: f32[1,8], index: 6, kind: input, shape index: {}]   ;;  %s7024_s7 = inlined_call_operand.vmem [shape: f32[2,16,16,8], index: 7, kind: output, shape index: {}]  }
   0x1 LB: > { %s4468_s25 = sadd.s32 4294967295, %s4582_s24   ;;  %p4472_p0 = scmp.ge.s32.totalorder %s4582_s24, 1  ;;  %s4582_s24 = sphi %s4633_s24, %s17_s24  }
   0x2   : > { %p237_p1 = scmp.lt.s32.totalorder %s4582_s24, 3 }
   0x4   : > { %p238_p2 = pnand %p4472_p0, %p237_p1 }
   0x6   : > { %241 = sbr.rel (%p238_p2) target bundleno = 2141 (0x85d), region = 48 }
   0xb   : > { %vm312_vm0 = vcmask 31744   ;;  %v7025_v0 = vmov 0.0   ;;  %s4585_s26 = smov 4   ;;  %vm315_vm1 = vcmask 25600   ;;  %p269_p3 = scmp.lt.s32.totalorder %s4468_s25, 1  ;;  %vm625_vm2 = vcmask 64544  }
   0xc   : > { %313 = vst.msk [vmem:[#allocation2] sm:$0xff] %vm312_vm0, %v7025_v0  ;;  %s4586_s8 = smov 8   ;;  %s4587_s9 = smov 12   ;;  %vm818_vm3 = vcmask 97344   ;;  %vm1011_vm4 = vcmask 130144   ;;  %vm1204_vm5 = vcmask 162944  }
   0xd   : > { %314 = vst.msk [vmem:[#allocation2 + $0x8] sm:$0xff] %vm312_vm0, %v7025_v0  ;;  %s7177_s25 = smov (!%p269_p3, %s4468_s25), 1  ;;  %s4588_s10 = smov 16   ;;  %vm1397_vm6 = vcmask 195744   ;;  %vm1591_vm7 = vcmask 228544   ;;  %vm1784_vm8 = vcmask 261344  }
   0xe   : > { %317 = vst.msk [vmem:[#allocation2 + $0x18] sm:$0xff] %vm312_vm0, %v7025_v0  ;;  %s4543_s27 = sshll.u32 %s7177_s25, 8  ;;  %s4589_s11 = smov 20   ;;  %vm2131_vm9 = vcmask 1041408   ;;  %vm1977_vm10 = vcmask 294144   ;;  %vm2082_vm11 = vcmask 293888  }
   0xf   : > { %318 = vst.msk [vmem:[#allocation2 + $0x20] sm:$0xff] %vm312_vm0, %v7025_v0  ;;  %s4753_s30 = scalar_lea.vmem %s7017_s0, %s4543_s27  ;;  %s4590_s12 = smov 24   ;;  %vm2326_vm12 = vcmask 1043456   ;;  %vm2277_vm13 = vcmask 64512  }
  0x10   : > { %320 = vst.msk [vmem:[#allocation2 + $0x30] sm:$0xff] %vm312_vm0, %v7025_v0  ;;  %v284_v3 = vld [vmem:[%s4753_s30 + $0x20] sm:$0xff]  ;;  %v287_v5 = vld [vmem:[%s4753_s30 + $0x38] sm:$0xff]  ;;  %v281_v6 = vld [vmem:[%s4753_s30 + $0x8] sm:$0xff]  ;;  %s4591_s13 = smov 28   ;;  %s4592_s14 = smov 32  }
  0x11   : > { %321 = vst.msk [vmem:[#allocation2 + $0x38] sm:$0xff] %vm312_vm0, %v7025_v0  ;;  %v280_v4 = vld [vmem:[%s4753_s30] sm:$0xff]  ;;  %v290_v7 = vld [vmem:[%s4753_s30 + $0x50] sm:$0xff]  ;;  %v285_v9 = vld [vmem:[%s4753_s30 + $0x28] sm:$0xff]  ;;  %s6826_s21 = scalar_lea.vmem %s7024_s7, %s4543_s27 }
  0x12   : > { %323 = vst.msk [vmem:[#allocation2 + $0x48] sm:$0xff] %vm312_vm0, %v7025_v0  ;;  %v282_v8 = vld [vmem:[%s4753_s30 + $0x10] sm:$0xff]  ;;  %v293_v10 = vld [vmem:[%s4753_s30 + $0x68] sm:$0xff]  ;;  %v283_v11 = vld [vmem:[%s4753_s30 + $0x18] sm:$0xff] }
  0x13   : > { %324 = vst.msk [vmem:[#allocation2 + $0x50] sm:$0xff] %vm312_vm0, %v7025_v0  ;;  %v288_v12 = vld [vmem:[%s4753_s30 + $0x40] sm:$0xff]  ;;  %v286_v16 = vld [vmem:[%s4753_s30 + $0x30] sm:$0xff]  ;;  %v291_v17 = vld [vmem:[%s4753_s30 + $0x58] sm:$0xff] }
  0x14   : > { %v465_v1 = vld [vmem:[#allocation2 + $0x1] sm:$0xff]  ;;  %326 = vst.msk [vmem:[#allocation2 + $0x60] sm:$0xff] %vm312_vm0, %v7025_v0  ;;  %v299_v18 = vld [vmem:[%s4753_s30 + $0x98] sm:$0xff]  ;;  %v294_v21 = vld [vmem:[%s4753_s30 + $0x70] sm:$0xff] }
  0x15   : > { %529 = vrot.lane.b32.xlu0 %v465_v1, %s4585_s26  ;;  %327 = vst.msk [vmem:[#allocation2 + $0x68] sm:$0xff] %vm312_vm0, %v7025_v0  ;;  %v296_v14 = vld [vmem:[%s4753_s30 + $0x80] sm:$0xff]  ;;  %v289_v19 = vld [vmem:[%s4753_s30 + $0x48] sm:$0xff]  ;;  %v302_v24 = vld [vmem:[%s4753_s30 + $0xb0] sm:$0xff] }
  0x16   : > { %329 = vst.msk [vmem:[#allocation2 + $0x78] sm:$0xff] %vm312_vm0, %v7025_v0  ;;  %v292_v25 = vld [vmem:[%s4753_s30 + $0x60] sm:$0xff]  ;;  %v297_v26 = vld [vmem:[%s4753_s30 + $0x88] sm:$0xff]  ;;  %v295_v31 = vld [vmem:[%s4753_s30 + $0x78] sm:$0xff] }
  0x17   : > { %330 = vst.msk [vmem:[#allocation2 + $0x80] sm:$0xff] %vm312_vm0, %v7025_v0  ;;  %v305_v30 = vld [vmem:[%s4753_s30 + $0xc8] sm:$0xff]  ;;  %v300_v32 = vld [vmem:[%s4753_s30 + $0xa0] sm:$0xff]  ;;  %v298_v37 = vld [vmem:[%s4753_s30 + $0x90] sm:$0xff] }
  0x18   : > { %332 = vst.msk [vmem:[#allocation2 + $0x90] sm:$0xff] %vm312_vm0, %v7025_v0  ;;  %v308_v36 = vld [vmem:[%s4753_s30 + $0xe0] sm:$0xff]  ;;  %v303_v38 = vld [vmem:[%s4753_s30 + $0xb8] sm:$0xff]  ;;  %v301_v42 = vld [vmem:[%s4753_s30 + $0xa8] sm:$0xff] }
  0x19   : > { %333 = vst.msk [vmem:[#allocation2 + $0x98] sm:$0xff] %vm312_vm0, %v7025_v0  ;;  %v306_v43 = vld [vmem:[%s4753_s30 + $0xd0] sm:$0xff]  ;;  %v304_v48 = vld [vmem:[%s4753_s30 + $0xc0] sm:$0xff]  ;;  %v309_v49 = vld [vmem:[%s4753_s30 + $0xe8] sm:$0xff] }
  0x1a   : > { %335 = vst.msk [vmem:[#allocation2 + $0xa8] sm:$0xff] %vm312_vm0, %v7025_v0  ;;  %v307_v53 = vld [vmem:[%s4753_s30 + $0xd8] sm:$0xff]  ;;  %v401_v61 = vld [vmem:[#allocation2] sm:$0xff] }
  0x1b   : > { %336 = vst.msk [vmem:[#allocation2 + $0xb0] sm:$0xff] %vm312_vm0, %v7025_v0  ;;  %v658_v63 = vld [vmem:[#allocation2 + $0x2] sm:$0xff] }
  0x1c   : > { %338 = vst.msk [vmem:[#allocation2 + $0xc0] sm:$0xff] %vm312_vm0, %v7025_v0 }
  0x1d   : > { %339 = vst.msk [vmem:[#allocation2 + $0xc8] sm:$0xff] %vm312_vm0, %v7025_v0 }
  0x1e   : > { %341 = vst.msk [vmem:[#allocation2 + $0xd8] sm:$0xff] %vm312_vm0, %v7025_v0 }
  0x1f   : > { %342 = vst.msk [vmem:[#allocation2 + $0xe0] sm:$0xff] %vm312_vm0, %v7025_v0 }
  0x20   : > { %344 = vst.msk [vmem:[#allocation2 + $0xf0] sm:$0xff] %vm312_vm0, %v7025_v0 }
  0x21   : > { %345 = vst.msk [vmem:[#allocation2 + $0xf8] sm:$0xff] %vm312_vm0, %v7025_v0 }
  0x22   : > { %347 = vst.msk [vmem:[#allocation2 + $0x108] sm:$0xff] %vm312_vm0, %v7025_v0 }
  0x23   : > { %348 = vst.msk [vmem:[#allocation2 + $0x110] sm:$0xff] %vm312_vm0, %v7025_v0 }
  0x24   : > { %350 = vst.msk [vmem:[#allocation2 + $0x120] sm:$0xff] %vm312_vm0, %v7025_v0 }
  0x25   : > { %351 = vst.msk [vmem:[#allocation2 + $0x128] sm:$0xff] %vm312_vm0, %v7025_v0 }
  0x26   : > { %353 = vst.msk [vmem:[#allocation2 + $0x138] sm:$0xff] %vm312_vm0, %v7025_v0 }
  0x27   : > { %354 = vst.msk [vmem:[#allocation2 + $0x140] sm:$0xff] %vm312_vm0, %v7025_v0 }
  0x28   : > { %356 = vst.msk [vmem:[#allocation2 + $0x150] sm:$0xff] %vm312_vm0, %v7025_v0 }
  0x29   : > { %357 = vst.msk [vmem:[#allocation2 + $0x158] sm:$0xff] %vm312_vm0, %v7025_v0 }
  0x2a   : > { %359 = vst.msk [vmem:[#allocation2 + $0x168] sm:$0xff] %vm312_vm0, %v7025_v0 }
  0x2b   : > { %360 = vst.msk [vmem:[#allocation2 + $0x170] sm:$0xff] %vm312_vm0, %v7025_v0 }
  0x2c   : > { %362 = vst.msk [vmem:[#allocation2 + $0x180] sm:$0xff] %vm312_vm0, %v7025_v0 }
  0x2d   : > { %363 = vst.msk [vmem:[#allocation2 + $0x188] sm:$0xff] %vm312_vm0, %v7025_v0 }
  0x2e   : > { %365 = vst.msk [vmem:[#allocation2 + $0x198] sm:$0xff] %vm312_vm0, %v7025_v0 }
  0x2f   : > { %366 = vst.msk [vmem:[#allocation2 + $0x1a0] sm:$0xff] %vm312_vm0, %v7025_v0 }
  0x30   : > { %316 = vst.msk [vmem:[#allocation2 + $0x10] sm:$0x3] %vm315_vm1, %v7025_v0 }
  0x31   : > { %319 = vst.msk [vmem:[#allocation2 + $0x28] sm:$0x3] %vm315_vm1, %v7025_v0 }
  0x32   : > { %322 = vst.msk [vmem:[#allocation2 + $0x40] sm:$0x3] %vm315_vm1, %v7025_v0 }
  0x33   : > { %325 = vst.msk [vmem:[#allocation2 + $0x58] sm:$0x3] %vm315_vm1, %v7025_v0 }
  0x34   : > { %328 = vst.msk [vmem:[#allocation2 + $0x70] sm:$0x3] %vm315_vm1, %v7025_v0 }
  0x35   : > { %331 = vst.msk [vmem:[#allocation2 + $0x88] sm:$0x3] %vm315_vm1, %v7025_v0 }
  0x36   : > { %334 = vst.msk [vmem:[#allocation2 + $0xa0] sm:$0x3] %vm315_vm1, %v7025_v0 }
  0x37   : > { %v466_v2 = vld [vmem:[#allocation2 + $0x9] sm:$0xff]  ;;  %337 = vst.msk [vmem:[#allocation2 + $0xb8] sm:$0x3] %vm315_vm1, %v7025_v0 }
  0x38   : > { %531 = vrot.lane.b32.xlu0 %v466_v2, %s4585_s26  ;;  %340 = vst.msk [vmem:[#allocation2 + $0xd0] sm:$0x3] %vm315_vm1, %v7025_v0  ;;  %v659_v44 = vld [vmem:[#allocation2 + $0xa] sm:$0xff] }
  0x39   : > { %343 = vst.msk [vmem:[#allocation2 + $0xe8] sm:$0x3] %vm315_vm1, %v7025_v0 }
  0x3a   : > { %346 = vst.msk [vmem:[#allocation2 + $0x100] sm:$0x3] %vm315_vm1, %v7025_v0 }
  0x3b   : > { %349 = vst.msk [vmem:[#allocation2 + $0x118] sm:$0x3] %vm315_vm1, %v7025_v0 }
  0x3c   : > { %352 = vst.msk [vmem:[#allocation2 + $0x130] sm:$0x3] %vm315_vm1, %v7025_v0 }
  0x3d   : > { %355 = vst.msk [vmem:[#allocation2 + $0x148] sm:$0x3] %vm315_vm1, %v7025_v0 }
  0x3e   : > { %358 = vst.msk [vmem:[#allocation2 + $0x160] sm:$0x3] %vm315_vm1, %v7025_v0 }
  0x3f   : > { %361 = vst.msk [vmem:[#allocation2 + $0x178] sm:$0x3] %vm315_vm1, %v7025_v0 }
  0x40   : > { %364 = vst.msk [vmem:[#allocation2 + $0x190] sm:$0x3] %vm315_vm1, %v7025_v0 }
  0x41   : > { %367 = vst.msk [vmem:[#allocation2 + $0x1a8] sm:$0x3] %vm315_vm1, %v7025_v0 }
  0x42   : > { %373 = vst.msk [vmem:[#allocation2 + $0x49] sm:$0xff] %vm312_vm0, %v284_v3  ;;  %v402_v3 = vld [vmem:[#allocation2 + $0x8] sm:$0xff] }
  0x43   : > { %369 = vst.msk [vmem:[#allocation2 + $0x19] sm:$0xff] %vm312_vm0, %v280_v4 }
  0x44   : > { %376 = vst.msk [vmem:[#allocation2 + $0x69] sm:$0xff] %vm312_vm0, %v287_v5 }
  0x45   : > { %370 = vst.msk [vmem:[#allocation2 + $0x21] sm:$0xff] %vm312_vm0, %v281_v6 }
  0x46   : > { %379 = vst.msk [vmem:[#allocation2 + $0x91] sm:$0xff] %vm312_vm0, %v290_v7 }
  0x47   : > { %371 = vst.msk [vmem:[#allocation2 + $0x31] sm:$0xff] %vm312_vm0, %v282_v8 }
  0x48   : > { %374 = vst.msk [vmem:[#allocation2 + $0x51] sm:$0xff] %vm312_vm0, %v285_v9 }
  0x49   : > { %v4782_v13 = vld [vmem:[#allocation2 + $0x49] sm:$0xff]  ;;  %382 = vst.msk [vmem:[#allocation2 + $0xb1] sm:$0xff] %vm312_vm0, %v293_v10 }
  0x4a   : > { %541 = vrot.lane.b32.xlu0 %v4782_v13, %s4585_s26  ;;  %v4788_v15 = vld [vmem:[#allocation2 + $0x19] sm:$0xff]  ;;  %372 = vst.msk [vmem:[#allocation2 + $0x39] sm:$0xff] %vm312_vm0, %v283_v11  ;;  %v4967_v8 = vld [vmem:[#allocation2 + $0x48] sm:$0xff] }
  0x4b   : > { %533 = vrot.lane.b32.xlu1 %v4788_v15, %s4585_s26  ;;  %377 = vst.msk [vmem:[#allocation2 + $0x79] sm:$0xff] %vm312_vm0, %v288_v12  ;;  %v4804_v22 = vld [vmem:[#allocation2 + $0x69] sm:$0xff]  ;;  %v4971_v10 = vld [vmem:[#allocation2 + $0x18] sm:$0xff] }
  0x4c   : > { %385 = vst.msk [vmem:[#allocation2 + $0xd9] sm:$0xff] %vm312_vm0, %v296_v14  ;;  %v4809_v23 = vld [vmem:[#allocation2 + $0x21] sm:$0xff] }
  0x4d   : > { %375 = vst.msk [vmem:[#allocation2 + $0x61] sm:$0xff] %vm312_vm0, %v286_v16  ;;  %v4825_v28 = vld [vmem:[#allocation2 + $0x91] sm:$0xff]  ;;  %v4942_v2 = vld [vmem:[#allocation2 + $0x22] sm:$0xff]  ;;  %v4979_v12 = vld [vmem:[#allocation2 + $0x1a] sm:$0xff] }
  0x4e   : > { %v4800_v20 = vld [vmem:[#allocation2 + $0x31] sm:$0xff]  ;;  %380 = vst.msk [vmem:[#allocation2 + $0x99] sm:$0xff] %vm312_vm0, %v291_v17  ;;  %v4996_v17 = vld [vmem:[#allocation2 + $0x20] sm:$0xff] }
  0x4f   : > { %537 = vrot.lane.b32.xlu2 %v4800_v20, %s4585_s26  ;;  %388 = vst.msk [vmem:[#allocation2 + $0xf9] sm:$0xff] %vm312_vm0, %v299_v18  ;;  %v4829_v29 = vld [vmem:[#allocation2 + $0x51] sm:$0xff] }
  0x50   : > { %378 = vst.msk [vmem:[#allocation2 + $0x81] sm:$0xff] %vm312_vm0, %v289_v19  ;;  %v4843_v34 = vld [vmem:[#allocation2 + $0xb1] sm:$0xff] }
  0x51   : > { %383 = vst.msk [vmem:[#allocation2 + $0xc1] sm:$0xff] %vm312_vm0, %v294_v21  ;;  %v4821_v27 = vld [vmem:[#allocation2 + $0x39] sm:$0xff]  ;;  %v4946_v4 = vld [vmem:[#allocation2 + $0x30] sm:$0xff] }
  0x52   : > { %547 = vrot.lane.b32.xlu0 %v4804_v22, %s4585_s26  ;;  %391 = vst.msk [vmem:[#allocation2 + $0x121] sm:$0xff] %vm312_vm0, %v302_v24  ;;  %v4847_v35 = vld [vmem:[#allocation2 + $0x79] sm:$0xff] }
  0x53   : > { %535 = vrot.lane.b32.xlu1 %v4809_v23, %s4585_s26  ;;  %381 = vst.msk [vmem:[#allocation2 + $0xa9] sm:$0xff] %vm312_vm0, %v292_v25  ;;  %v4861_v40 = vld [vmem:[#allocation2 + $0xd9] sm:$0xff]  ;;  %v5016_v25 = vld [vmem:[#allocation2 + $0x90] sm:$0xff] }
  0x54   : > { %386 = vst.msk [vmem:[#allocation2 + $0xe1] sm:$0xff] %vm312_vm0, %v297_v26  ;;  %v4839_v33 = vld [vmem:[#allocation2 + $0x61] sm:$0xff]  ;;  %v4957_v6 = vld [vmem:[#allocation2 + $0x32] sm:$0xff]  ;;  %v5018_v26 = vld [vmem:[#allocation2 + $0x4a] sm:$0xff] }
  0x55   : > { %394 = vst.msk [vmem:[#allocation2 + $0x141] sm:$0xff] %vm312_vm0, %v305_v30  ;;  %v4865_v41 = vld [vmem:[#allocation2 + $0x99] sm:$0xff]  ;;  %v4990_v14 = vld [vmem:[#allocation2 + $0x68] sm:$0xff] }
  0x56   : > { %384 = vst.msk [vmem:[#allocation2 + $0xc9] sm:$0xff] %vm312_vm0, %v295_v31  ;;  %v4879_v46 = vld [vmem:[#allocation2 + $0xf9] sm:$0xff]  ;;  %v5024_v31 = vld [vmem:[#allocation2 + $0x50] sm:$0xff] }
  0x57   : > { %539 = vrot.lane.b32.xlu2 %v4821_v27, %s4585_s26  ;;  %389 = vst.msk [vmem:[#allocation2 + $0x109] sm:$0xff] %vm312_vm0, %v300_v32  ;;  %v4857_v39 = vld [vmem:[#allocation2 + $0x81] sm:$0xff]  ;;  %v4969_v9 = vld [vmem:[#allocation2 + $0x38] sm:$0xff] }
  0x58   : > { %397 = vst.msk [vmem:[#allocation2 + $0x169] sm:$0xff] %vm312_vm0, %v308_v36  ;;  %v4883_v47 = vld [vmem:[#allocation2 + $0xc1] sm:$0xff]  ;;  %v4977_v11 = vld [vmem:[#allocation2 + $0x52] sm:$0xff] }
  0x59   : > { %387 = vst.msk [vmem:[#allocation2 + $0xf1] sm:$0xff] %vm312_vm0, %v298_v37  ;;  %v4895_v51 = vld [vmem:[#allocation2 + $0x121] sm:$0xff] }
  0x5a   : > { %553 = vrot.lane.b32.xlu0 %v4825_v28, %s4585_s26  ;;  %392 = vst.msk [vmem:[#allocation2 + $0x129] sm:$0xff] %vm312_vm0, %v303_v38  ;;  %v4874_v45 = vld [vmem:[#allocation2 + $0xa9] sm:$0xff]  ;;  %v4994_v16 = vld [vmem:[#allocation2 + $0x60] sm:$0xff] }
  0x5b   : > { %543 = vrot.lane.b32.xlu1 %v4829_v29, %s4585_s26  ;;  %390 = vst.msk [vmem:[#allocation2 + $0x111] sm:$0xff] %vm312_vm0, %v301_v42  ;;  %v4899_v52 = vld [vmem:[#allocation2 + $0xe1] sm:$0xff]  ;;  %v5041_v38 = vld [vmem:[#allocation2 + $0xb0] sm:$0xff] }
  0x5c   : > { %2453 = vst.msk [vmem:[#allocation2 + $0x10] sm:$0x3] %vm315_vm1, %v7025_v0  ;;  %v4909_v55 = vld [vmem:[#allocation2 + $0x141] sm:$0xff]  ;;  %v5043_v42 = vld [vmem:[#allocation2 + $0x6a] sm:$0xff] }
  0x5d   : > { %395 = vst.msk [vmem:[#allocation2 + $0x151] sm:$0xff] %vm312_vm0, %v306_v43  ;;  %v4892_v50 = vld [vmem:[#allocation2 + $0xc9] sm:$0xff]  ;;  %v5002_v18 = vld [vmem:[#allocation2 + $0x7a] sm:$0xff] }
  0x5e   : > { %393 = vst.msk [vmem:[#allocation2 + $0x139] sm:$0xff] %vm312_vm0, %v304_v48  ;;  %v4913_v56 = vld [vmem:[#allocation2 + $0x109] sm:$0xff]  ;;  %v5008_v19 = vld [vmem:[#allocation2 + $0x3a] sm:$0xff] }
  0x5f   : > { %545 = vrot.lane.b32.xlu2 %v4839_v33, %s4585_s26  ;;  %398 = vst.msk [vmem:[#allocation2 + $0x171] sm:$0xff] %vm312_vm0, %v309_v49  ;;  %v4921_v58 = vld [vmem:[#allocation2 + $0x169] sm:$0xff]  ;;  %v5022_v30 = vld [vmem:[#allocation2 + $0x80] sm:$0xff] }
  0x60   : > { %396 = vst.msk [vmem:[#allocation2 + $0x159] sm:$0xff] %vm312_vm0, %v307_v53  ;;  %v4907_v54 = vld [vmem:[#allocation2 + $0xf1] sm:$0xff]  ;;  %v5030_v32 = vld [vmem:[#allocation2 + $0x9a] sm:$0xff]  ;;  %v5034_v36 = vld [vmem:[#allocation2 + $0x62] sm:$0xff] }
  0x61   : > { %7083 = vst [vmem:[#allocation4_spill] sm:$0xff] %v4921_v58  ;;  %v4925_v59 = vld [vmem:[#allocation2 + $0x129] sm:$0xff] }
  0x62   : > { %559 = vrot.lane.b32.xlu0 %v4843_v34, %s4585_s26  ;;  %v4919_v57 = vld [vmem:[#allocation2 + $0x111] sm:$0xff]  ;;  %433 = vst.msk [vmem:[#allocation3] sm:$0xff] %vm312_vm0, %v401_v61  ;;  %v5047_v43 = vld [vmem:[#allocation2 + $0xa8] sm:$0xff] }
  0x63   : > { %549 = vrot.lane.b32.xlu1 %v4847_v35, %s4585_s26  ;;  %2451 = vst.msk [vmem:[#allocation2] sm:$0xff] %vm312_vm0, %v7025_v0  ;;  %v5055_v48 = vld [vmem:[#allocation2 + $0xc2] sm:$0xff] }
  0x64   : > { %v4939_v1 = vld [vmem:[#allocation2 + $0x151] sm:$0xff]  ;;  %2456 = vst.msk [vmem:[#allocation2 + $0x28] sm:$0x3] %vm315_vm1, %v7025_v0  ;;  %v5059_v49 = vld [vmem:[#allocation2 + $0x82] sm:$0xff] }
  0x65   : > { %v4931_v62 = vld [vmem:[#allocation2 + $0x139] sm:$0xff]  ;;  %434 = vst.msk [vmem:[#allocation3 + $0x8] sm:$0xff] %vm312_vm0, %v402_v3  ;;  %v5072_v3 = vld [vmem:[#allocation2 + $0xc8] sm:$0xff] }
  0x66   : > { %2452 = vst.msk [vmem:[#allocation2 + $0x8] sm:$0xff] %vm312_vm0, %v7025_v0  ;;  %v4961_v7 = vld [vmem:[#allocation2 + $0x171] sm:$0xff] }
  0x67   : > { %551 = vrot.lane.b32.xlu2 %v4857_v39, %s4585_s26  ;;  %v4950_v5 = vld [vmem:[#allocation2 + $0x159] sm:$0xff]  ;;  %437 = vst.msk [vmem:[#allocation3 + $0x20] sm:$0xff] %vm312_vm0, %v4946_v4 }
  0x68   : > { %7084 = vst [vmem:[#allocation5_spill] sm:$0xff] %v4957_v6 }
  0x69   : > { %7085 = vst [vmem:[#allocation6_spill] sm:$0xff] %v4961_v7 }
  0x6a   : > { %565 = vrot.lane.b32.xlu0 %v4861_v40, %s4585_s26  ;;  %439 = vst.msk [vmem:[#allocation3 + $0x30] sm:$0xff] %vm312_vm0, %v4967_v8 }
  0x6b   : > { %555 = vrot.lane.b32.xlu1 %v4865_v41, %s4585_s26  ;;  %438 = vst.msk [vmem:[#allocation3 + $0x28] sm:$0xff] %vm312_vm0, %v4969_v9 }
  0x6c   : > { %7086 = vst [vmem:[#allocation7_spill] sm:$0xff] %v4977_v11 }
  0x6d   : > { %7087 = vst [vmem:[#allocation8_spill] sm:$0xff] %v4979_v12 }
  0x6e   : > { %435 = vst.msk [vmem:[#allocation3 + $0x10] sm:$0xff] %vm312_vm0, %v4971_v10 }
  0x6f   : > { %557 = vrot.lane.b32.xlu2 %v4874_v45, %s4585_s26  ;;  %2454 = vst.msk [vmem:[#allocation2 + $0x18] sm:$0xff] %vm312_vm0, %v7025_v0 }
  0x70   : > { %442 = vst.msk [vmem:[#allocation3 + $0x48] sm:$0xff] %vm312_vm0, %v4990_v14 }
  0x71   : > { %441 = vst.msk [vmem:[#allocation3 + $0x40] sm:$0xff] %vm312_vm0, %v4994_v16 }
  0x72   : > { %571 = vrot.lane.b32.xlu0 %v4879_v46, %s4585_s26  ;;  %436 = vst.msk [vmem:[#allocation3 + $0x18] sm:$0xff] %vm312_vm0, %v4996_v17 }
  0x73   : > { %561 = vrot.lane.b32.xlu1 %v4883_v47, %s4585_s26  ;;  %7088 = vst [vmem:[#allocation9_spill] sm:$0xff] %v5002_v18 }
  0x74   : > { %2455 = vst.msk [vmem:[#allocation2 + $0x20] sm:$0xff] %vm312_vm0, %v7025_v0 }
  0x75   : > { %7089 = vst [vmem:[#allocation10_spill] sm:$0xff] %v5008_v19 }
  0x76   : > { %7090 = vst [vmem:[#allocation11_spill] sm:$0xff] %v5018_v26 }
  0x77   : > { %563 = vrot.lane.b32.xlu2 %v4892_v50, %s4585_s26  ;;  %445 = vst.msk [vmem:[#allocation3 + $0x60] sm:$0xff] %vm312_vm0, %v5016_v25 }
  0x78   : > { %444 = vst.msk [vmem:[#allocation3 + $0x58] sm:$0xff] %vm312_vm0, %v5022_v30 }
  0x79   : > { %440 = vst.msk [vmem:[#allocation3 + $0x38] sm:$0xff] %vm312_vm0, %v5024_v31 }
  0x7a   : > { %577 = vrot.lane.b32.xlu0 %v4895_v51, %s4585_s26  ;;  %7091 = vst [vmem:[#allocation12_spill] sm:$0xff] %v5030_v32 }
  0x7b   : > { %567 = vrot.lane.b32.xlu1 %v4899_v52, %s4585_s26  ;;  %7092 = vst [vmem:[#allocation13_spill] sm:$0xff] %v5034_v36 }
  0x7c   : > { %7093 = vst [vmem:[#allocation14_spill] sm:$0xff] %v5043_v42 }
  0x7d   : > { %448 = vst.msk [vmem:[#allocation3 + $0x78] sm:$0xff] %vm312_vm0, %v5041_v38 }
  0x7e   : > { %447 = vst.msk [vmem:[#allocation3 + $0x70] sm:$0xff] %vm312_vm0, %v5047_v43 }
  0x7f   : > { %569 = vrot.lane.b32.xlu2 %v4907_v54, %s4585_s26  ;;  %7094 = vst [vmem:[#allocation15_spill] sm:$0xff] %v5055_v48 }
  0x80   : > { %7095 = vst [vmem:[#allocation16_spill] sm:$0xff] %v5059_v49 }
  0x81   : > { %450 = vst.msk [vmem:[#allocation3 + $0x88] sm:$0xff] %vm312_vm0, %v5072_v3 }
  0x82   : > { %583 = vrot.lane.b32.xlu0 %v4909_v55, %s4585_s26 }
  0x83   : > { %573 = vrot.lane.b32.xlu1 %v4913_v56, %s4585_s26 }
  0x87   : > { %575 = vrot.lane.b32.xlu2 %v4919_v57, %s4585_s26  ;;  %v530_v60 = vpop.permute.xlu0 %529 }
  0x88   : > { %626 = vst.msk [vmem:[#allocation3] sm:$0xff] %vm625_vm2, %v530_v60  ;;  %v5066_v60 = vld [vmem:[#allocation2 + $0xd8] sm:$0xff] }
  0x89   : > { %451 = vst.msk [vmem:[#allocation3 + $0x90] sm:$0xff] %vm312_vm0, %v5066_v60 }
  0x8a   : > { %589 = vrot.lane.b32.xlu0 %v4921_v58, %s4585_s26 }
  0x8b   : > { %579 = vrot.lane.b32.xlu1 %v4925_v59, %s4585_s26 }
  0x8f   : > { %581 = vrot.lane.b32.xlu2 %v4931_v62, %s4585_s26 }
  0x92   : > { %724 = vrot.lane.b32.xlu0 %v659_v44, %s4586_s8  ;;  %v5049_v44 = vld [vmem:[#allocation2 + $0x78] sm:$0xff] }
  0x93   : > { %585 = vrot.lane.b32.xlu1 %v4939_v1, %s4585_s26  ;;  %443 = vst.msk [vmem:[#allocation3 + $0x50] sm:$0xff] %vm312_vm0, %v5049_v44 }
  0x97   : > { %587 = vrot.lane.b32.xlu2 %v4950_v5, %s4585_s26 }
  0x9a   : > { %730 = vrot.lane.b32.xlu0 %v4957_v6, %s4586_s8 }
  0x9b   : > { %591 = vrot.lane.b32.xlu1 %v4961_v7, %s4585_s26  ;;  %v5183_v7 = vld [vmem:[#allocation2 + $0x128] sm:$0xff] }
  0x9c   : > { %458 = vst.msk [vmem:[#allocation3 + $0xc8] sm:$0xff] %vm312_vm0, %v5183_v7 }
  0x9f   : > { %722 = vrot.lane.b32.xlu2 %v658_v63, %s4586_s8  ;;  %v5068_v63 = vld [vmem:[#allocation2 + $0x92] sm:$0xff] }
  0xa0   : > { %7096 = vst [vmem:[#allocation17_spill] sm:$0xff] %v5068_v63 }
  0xa2   : > { %736 = vrot.lane.b32.xlu0 %v4977_v11, %s4586_s8 }
  0xa3   : > { %726 = vrot.lane.b32.xlu1 %v4979_v12, %s4586_s8  ;;  %v5180_v12 = vld [vmem:[#allocation2 + $0x158] sm:$0xff] }
  0xa4   : > { %462 = vst.msk [vmem:[#allocation3 + $0xe8] sm:$0xff] %vm312_vm0, %v5180_v12 }
  0xa7   : > { %728 = vrot.lane.b32.xlu2 %v4942_v2, %s4586_s8 }
  0xa9   : > { %v538_v21 = vpop.permute.xlu2 %537 }
  0xaa   : > { %742 = vrot.lane.b32.xlu0 %v5002_v18, %s4586_s8  ;;  %v532_v24 = vpop.permute.xlu0 %531  ;;  %630 = vst.msk [vmem:[#allocation3 + $0x20] sm:$0xff] %vm625_vm2, %v538_v21  ;;  %v5102_v18 = vld [vmem:[#allocation2 + $0xc0] sm:$0xff] }
  0xab   : > { %732 = vrot.lane.b32.xlu1 %v5008_v19, %s4586_s8  ;;  %627 = vst.msk [vmem:[#allocation3 + $0x8] sm:$0xff] %vm625_vm2, %v532_v24  ;;  %v5075_v24 = vld [vmem:[#allocation2 + $0x98] sm:$0xff] }
  0xac   : > { %446 = vst.msk [vmem:[#allocation3 + $0x68] sm:$0xff] %vm312_vm0, %v5075_v24  ;;  %v5153_v19 = vld [vmem:[#allocation2 + $0x138] sm:$0xff] }
  0xad   : > { %449 = vst.msk [vmem:[#allocation3 + $0x80] sm:$0xff] %vm312_vm0, %v5102_v18 }
  0xae   : > { %459 = vst.msk [vmem:[#allocation3 + $0xd0] sm:$0xff] %vm312_vm0, %v5153_v19 }
  0xaf   : > { %734 = vrot.lane.b32.xlu2 %v5018_v26, %s4586_s8 }
  0xb1   : > { %v540_v37 = vpop.permute.xlu2 %539 }
  0xb2   : > { %748 = vrot.lane.b32.xlu0 %v5030_v32, %s4586_s8  ;;  %631 = vst.msk [vmem:[#allocation3 + $0x28] sm:$0xff] %vm625_vm2, %v540_v37  ;;  %v5078_v37 = vld [vmem:[#allocation2 + $0xe2] sm:$0xff]  ;;  %v5099_v32 = vld [vmem:[#allocation2 + $0xf0] sm:$0xff] }
  0xb3   : > { %738 = vrot.lane.b32.xlu1 %v5034_v36, %s4586_s8  ;;  %7097 = vst [vmem:[#allocation18_spill] sm:$0xff] %v5078_v37  ;;  %v5126_v36 = vld [vmem:[#allocation2 + $0x110] sm:$0xff] }
  0xb4   : > { %453 = vst.msk [vmem:[#allocation3 + $0xa0] sm:$0xff] %vm312_vm0, %v5099_v32 }
  0xb5   : > { %456 = vst.msk [vmem:[#allocation3 + $0xb8] sm:$0xff] %vm312_vm0, %v5126_v36 }
  0xb7   : > { %740 = vrot.lane.b32.xlu2 %v5043_v42, %s4586_s8  ;;  %v5156_v42 = vld [vmem:[#allocation2 + $0x108] sm:$0xff] }
  0xb8   : > { %455 = vst.msk [vmem:[#allocation3 + $0xb0] sm:$0xff] %vm312_vm0, %v5156_v42 }
  0xb9   : > { %v546_v53 = vpop.permute.xlu2 %545 }
  0xba   : > { %754 = vrot.lane.b32.xlu0 %v5055_v48, %s4586_s8  ;;  %634 = vst.msk [vmem:[#allocation3 + $0x40] sm:$0xff] %vm625_vm2, %v546_v53  ;;  %v5084_v53 = vld [vmem:[#allocation2 + $0xaa] sm:$0xff]  ;;  %v5095_v48 = vld [vmem:[#allocation2 + $0xb2] sm:$0xff] }
  0xbb   : > { %744 = vrot.lane.b32.xlu1 %v5059_v49, %s4586_s8  ;;  %7098 = vst [vmem:[#allocation19_spill] sm:$0xff] %v5084_v53 }
  0xbc   : > { %v542_v61 = vpop.permute.xlu0 %541  ;;  %7099 = vst [vmem:[#allocation20_spill] sm:$0xff] %v5095_v48 }
  0xbd   : > { %632 = vst.msk [vmem:[#allocation3 + $0x30] sm:$0xff] %vm625_vm2, %v542_v61  ;;  %v534_v21 = vpop.permute.xlu1 %533  ;;  %v5093_v61 = vld [vmem:[#allocation2 + $0xf8] sm:$0xff] }
  0xbe   : > { %628 = vst.msk [vmem:[#allocation3 + $0x10] sm:$0xff] %vm625_vm2, %v534_v21 }
  0xbf   : > { %746 = vrot.lane.b32.xlu2 %v5068_v63, %s4586_s8  ;;  %454 = vst.msk [vmem:[#allocation3 + $0xa8] sm:$0xff] %vm312_vm0, %v5093_v61  ;;  %v5129_v63 = vld [vmem:[#allocation2 + $0xe0] sm:$0xff] }
  0xc0   : > { %452 = vst.msk [vmem:[#allocation3 + $0x98] sm:$0xff] %vm312_vm0, %v5129_v63 }
  0xc1   : > { %v552_v0 = vpop.permute.xlu2 %551 }
  0xc2   : > { %760 = vrot.lane.b32.xlu0 %v5078_v37, %s4586_s8  ;;  %637 = vst.msk [vmem:[#allocation3 + $0x58] sm:$0xff] %vm625_vm2, %v552_v0  ;;  %v5105_v0 = vld [vmem:[#allocation2 + $0x10a] sm:$0xff] }
  0xc3   : > { %750 = vrot.lane.b32.xlu1 %v5084_v53, %s4586_s8  ;;  %7100 = vst [vmem:[#allocation21_spill] sm:$0xff] %v5105_v0  ;;  %v5111_v37 = vld [vmem:[#allocation2 + $0xca] sm:$0xff] }
  0xc4   : > { %v548_v21 = vpop.permute.xlu0 %547  ;;  %7101 = vst [vmem:[#allocation22_spill] sm:$0xff] %v5111_v37 }
  0xc5   : > { %635 = vst.msk [vmem:[#allocation3 + $0x48] sm:$0xff] %vm625_vm2, %v548_v21  ;;  %v536_v49 = vpop.permute.xlu1 %535 }
  0xc6   : > { %629 = vst.msk [vmem:[#allocation3 + $0x18] sm:$0xff] %vm625_vm2, %v536_v49  ;;  %v5120_v49 = vld [vmem:[#allocation2 + $0x120] sm:$0xff] }
  0xc7   : > { %752 = vrot.lane.b32.xlu2 %v5095_v48, %s4586_s8  ;;  %v5122_v48 = vld [vmem:[#allocation2 + $0xda] sm:$0xff]  ;;  %457 = vst.msk [vmem:[#allocation3 + $0xc0] sm:$0xff] %vm312_vm0, %v5120_v49 }
  0xc8   : > { %7102 = vst [vmem:[#allocation23_spill] sm:$0xff] %v5122_v48 }
  0xc9   : > { %v558_v53 = vpop.permute.xlu2 %557 }
  0xca   : > { %766 = vrot.lane.b32.xlu0 %v5105_v0, %s4586_s8  ;;  %640 = vst.msk [vmem:[#allocation3 + $0x70] sm:$0xff] %vm625_vm2, %v558_v53  ;;  %v5132_v53 = vld [vmem:[#allocation2 + $0x12a] sm:$0xff]  ;;  %v5138_v0 = vld [vmem:[#allocation2 + $0xf2] sm:$0xff] }
  0xcb   : > { %756 = vrot.lane.b32.xlu1 %v5111_v37, %s4586_s8  ;;  %7103 = vst [vmem:[#allocation24_spill] sm:$0xff] %v5132_v53 }
  0xcc   : > { %v554_v21 = vpop.permute.xlu0 %553  ;;  %7104 = vst [vmem:[#allocation25_spill] sm:$0xff] %v5138_v0 }
  0xcd   : > { %638 = vst.msk [vmem:[#allocation3 + $0x60] sm:$0xff] %vm625_vm2, %v554_v21  ;;  %v544_v11 = vpop.permute.xlu1 %543 }
  0xce   : > { %633 = vst.msk [vmem:[#allocation3 + $0x38] sm:$0xff] %vm625_vm2, %v544_v11  ;;  %v5147_v11 = vld [vmem:[#allocation2 + $0x140] sm:$0xff] }
  0xcf   : > { %758 = vrot.lane.b32.xlu2 %v5122_v48, %s4586_s8  ;;  %v5149_v48 = vld [vmem:[#allocation2 + $0xfa] sm:$0xff]  ;;  %460 = vst.msk [vmem:[#allocation3 + $0xd8] sm:$0xff] %vm312_vm0, %v5147_v11 }
  0xd0   : > { %7105 = vst [vmem:[#allocation26_spill] sm:$0xff] %v5149_v48 }
  0xd1   : > { %v564_v37 = vpop.permute.xlu2 %563 }
  0xd2   : > { %772 = vrot.lane.b32.xlu0 %v5132_v53, %s4586_s8  ;;  %643 = vst.msk [vmem:[#allocation3 + $0x88] sm:$0xff] %vm625_vm2, %v564_v37  ;;  %v5159_v37 = vld [vmem:[#allocation2 + $0x152] sm:$0xff] }
  0xd3   : > { %762 = vrot.lane.b32.xlu1 %v5138_v0, %s4586_s8  ;;  %7106 = vst [vmem:[#allocation27_spill] sm:$0xff] %v5159_v37  ;;  %v5165_v53 = vld [vmem:[#allocation2 + $0x112] sm:$0xff] }
  0xd4   : > { %v560_v21 = vpop.permute.xlu0 %559  ;;  %7107 = vst [vmem:[#allocation28_spill] sm:$0xff] %v5165_v53 }
  0xd5   : > { %641 = vst.msk [vmem:[#allocation3 + $0x78] sm:$0xff] %vm625_vm2, %v560_v21  ;;  %v550_v6 = vpop.permute.xlu1 %549 }
  0xd6   : > { %636 = vst.msk [vmem:[#allocation3 + $0x50] sm:$0xff] %vm625_vm2, %v550_v6  ;;  %v5174_v6 = vld [vmem:[#allocation2 + $0x168] sm:$0xff] }
  0xd7   : > { %764 = vrot.lane.b32.xlu2 %v5149_v48, %s4586_s8  ;;  %v5176_v48 = vld [vmem:[#allocation2 + $0x122] sm:$0xff]  ;;  %463 = vst.msk [vmem:[#allocation3 + $0xf0] sm:$0xff] %vm312_vm0, %v5174_v6 }
  0xd8   : > { %7108 = vst [vmem:[#allocation29_spill] sm:$0xff] %v5176_v48 }
  0xd9   : > { %v570_v0 = vpop.permute.xlu2 %569 }
  0xda   : > { %778 = vrot.lane.b32.xlu0 %v5159_v37, %s4586_s8  ;;  %646 = vst.msk [vmem:[#allocation3 + $0xa0] sm:$0xff] %vm625_vm2, %v570_v0  ;;  %v5186_v0 = vld [vmem:[#allocation2 + $0x172] sm:$0xff]  ;;  %v5192_v37 = vld [vmem:[#allocation2 + $0x13a] sm:$0xff] }
  0xdb   : > { %768 = vrot.lane.b32.xlu1 %v5165_v53, %s4586_s8  ;;  %7109 = vst [vmem:[#allocation30_spill] sm:$0xff] %v5186_v0 }
  0xdc   : > { %v566_v21 = vpop.permute.xlu0 %565  ;;  %7110 = vst [vmem:[#allocation31_spill] sm:$0xff] %v5192_v37 }
  0xdd   : > { %644 = vst.msk [vmem:[#allocation3 + $0x90] sm:$0xff] %vm625_vm2, %v566_v21  ;;  %v556_v26 = vpop.permute.xlu1 %555  ;;  %v5201_v21 = vld [vmem:[#allocation2 + $0x142] sm:$0xff] }
  0xde   : > { %639 = vst.msk [vmem:[#allocation3 + $0x68] sm:$0xff] %vm625_vm2, %v556_v26 }
  0xdf   : > { %770 = vrot.lane.b32.xlu2 %v5176_v48, %s4586_s8  ;;  %7111 = vst [vmem:[#allocation32_spill] sm:$0xff] %v5201_v21  ;;  %v5203_v48 = vld [vmem:[#allocation2 + $0x150] sm:$0xff] }
  0xe0   : > { %461 = vst.msk [vmem:[#allocation3 + $0xe0] sm:$0xff] %vm312_vm0, %v5203_v48 }
  0xe1   : > { %v576_v53 = vpop.permute.xlu2 %575 }
  0xe2   : > { %784 = vrot.lane.b32.xlu0 %v5186_v0, %s4586_s8  ;;  %649 = vst.msk [vmem:[#allocation3 + $0xb8] sm:$0xff] %vm625_vm2, %v576_v53  ;;  %v5211_v53 = vld [vmem:[#allocation2 + $0x15a] sm:$0xff] }
  0xe3   : > { %774 = vrot.lane.b32.xlu1 %v5192_v37, %s4586_s8  ;;  %v5220_v37 = vld [vmem:[#allocation2 + $0x170] sm:$0xff] }
  0xe4   : > { %v572_v26 = vpop.permute.xlu0 %571  ;;  %464 = vst.msk [vmem:[#allocation3 + $0xf8] sm:$0xff] %vm312_vm0, %v5220_v37 }
  0xe5   : > { %647 = vst.msk [vmem:[#allocation3 + $0xa8] sm:$0xff] %vm625_vm2, %v572_v26  ;;  %v562_v58 = vpop.permute.xlu1 %561 }
  0xe6   : > { %642 = vst.msk [vmem:[#allocation3 + $0x80] sm:$0xff] %vm625_vm2, %v562_v58  ;;  %v5218_v58 = vld [vmem:[#allocation2 + $0x16a] sm:$0xff] }
  0xe7   : > { %776 = vrot.lane.b32.xlu2 %v5201_v21, %s4586_s8 }
  0xe9   : > { %v582_v0 = vpop.permute.xlu2 %581 }
  0xea   : > { %919 = vrot.lane.b32.xlu0 %v4946_v4, %s4587_s9  ;;  %652 = vst.msk [vmem:[#allocation3 + $0xd0] sm:$0xff] %vm625_vm2, %v582_v0 }
  0xeb   : > { %780 = vrot.lane.b32.xlu1 %v5211_v53, %s4586_s8 }
  0xec   : > { %v578_v26 = vpop.permute.xlu0 %577 }
  0xed   : > { %650 = vst.msk [vmem:[#allocation3 + $0xc0] sm:$0xff] %vm625_vm2, %v578_v26  ;;  %v568_v21 = vpop.permute.xlu1 %567 }
  0xee   : > { %645 = vst.msk [vmem:[#allocation3 + $0x98] sm:$0xff] %vm625_vm2, %v568_v21 }
  0xef   : > { %782 = vrot.lane.b32.xlu2 %v5218_v58, %s4586_s8 }
  0xf1   : > { %v588_v4 = vpop.permute.xlu2 %587 }
  0xf2   : > { %925 = vrot.lane.b32.xlu0 %v5024_v31, %s4587_s9  ;;  %655 = vst.msk [vmem:[#allocation3 + $0xe8] sm:$0xff] %vm625_vm2, %v588_v4 }
  0xf3   : > { %915 = vrot.lane.b32.xlu1 %v4971_v10, %s4587_s9 }
  0xf4   : > { %v584_v0 = vpop.permute.xlu0 %583 }
  0xf5   : > { %653 = vst.msk [vmem:[#allocation3 + $0xd8] sm:$0xff] %vm625_vm2, %v584_v0  ;;  %v574_v26 = vpop.permute.xlu1 %573 }
  0xf6   : > { %648 = vst.msk [vmem:[#allocation3 + $0xb0] sm:$0xff] %vm625_vm2, %v574_v26 }
  0xf7   : > { %917 = vrot.lane.b32.xlu2 %v4996_v17, %s4587_s9 }
  0xf9   : > { %v723_v21 = vpop.permute.xlu2 %722 }
  0xfa   : > { %931 = vrot.lane.b32.xlu0 %v5049_v44, %s4587_s9  ;;  %819 = vst.msk [vmem:[#allocation3] sm:$0xff] %vm818_vm3, %v723_v21 }
  0xfb   : > { %921 = vrot.lane.b32.xlu1 %v4969_v9, %s4587_s9 }
  0xfc   : > { %v590_v10 = vpop.permute.xlu0 %589 }
  0xfd   : > { %656 = vst.msk [vmem:[#allocation3 + $0xf0] sm:$0xff] %vm625_vm2, %v590_v10  ;;  %v580_v4 = vpop.permute.xlu1 %579 }
  0xfe   : > { %651 = vst.msk [vmem:[#allocation3 + $0xc8] sm:$0xff] %vm625_vm2, %v580_v4  ;;  %v310_v4 = vld [vmem:[%s4753_s30 + $0xf0] sm:$0xff] }
  0xff   : > { %923 = vrot.lane.b32.xlu2 %v4967_v8, %s4587_s9  ;;  %399 = vst.msk [vmem:[#allocation2 + $0x181] sm:$0xff] %vm312_vm0, %v310_v4 }
 0x101   : > { %v729_v17 = vpop.permute.xlu2 %728 }
 0x102   : > { %937 = vrot.lane.b32.xlu0 %v5075_v24, %s4587_s9  ;;  %822 = vst.msk [vmem:[#allocation3 + $0x18] sm:$0xff] %vm818_vm3, %v729_v17 }
 0x103   : > { %927 = vrot.lane.b32.xlu1 %v4994_v16, %s4587_s9 }
 0x104   : > { %v725_v0 = vpop.permute.xlu0 %724 }
 0x105   : > { %820 = vst.msk [vmem:[#allocation3 + $0x8] sm:$0xff] %vm818_vm3, %v725_v0  ;;  %v586_v9 = vpop.permute.xlu1 %585 }
 0x106   : > { %654 = vst.msk [vmem:[#allocation3 + $0xe0] sm:$0xff] %vm625_vm2, %v586_v9  ;;  %v5322_v4 = vld [vmem:[#allocation2 + $0x180] sm:$0xff] }
 0x107   : > { %929 = vrot.lane.b32.xlu2 %v4990_v14, %s4587_s9 }
 0x109   : > { %v735_v26 = vpop.permute.xlu2 %734 }
 0x10a   : > { %943 = vrot.lane.b32.xlu0 %v5102_v18, %s4587_s9  ;;  %825 = vst.msk [vmem:[#allocation3 + $0x30] sm:$0xff] %vm818_vm3, %v735_v26 }
 0x10b   : > { %933 = vrot.lane.b32.xlu1 %v5022_v30, %s4587_s9 }
 0x10c   : > { %v731_v8 = vpop.permute.xlu0 %730 }
 0x10d   : > { %823 = vst.msk [vmem:[#allocation3 + $0x20] sm:$0xff] %vm818_vm3, %v731_v8  ;;  %v592_v16 = vpop.permute.xlu1 %591  ;;  %v311_v8 = vld [vmem:[%s4753_s30 + $0xf8] sm:$0xff] }
 0x10e   : > { %657 = vst.msk [vmem:[#allocation3 + $0xf8] sm:$0xff] %vm625_vm2, %v592_v16 }
 0x10f   : > { %935 = vrot.lane.b32.xlu2 %v5016_v25, %s4587_s9  ;;  %400 = vst.msk [vmem:[#allocation2 + $0x189] sm:$0xff] %vm312_vm0, %v311_v8 }
 0x111   : > { %v741_v14 = vpop.permute.xlu2 %740 }
 0x112   : > { %949 = vrot.lane.b32.xlu0 %v5129_v63, %s4587_s9  ;;  %828 = vst.msk [vmem:[#allocation3 + $0x48] sm:$0xff] %vm818_vm3, %v741_v14 }
 0x113   : > { %939 = vrot.lane.b32.xlu1 %v5047_v43, %s4587_s9 }
 0x114   : > { %v737_v30 = vpop.permute.xlu0 %736 }
 0x115   : > { %826 = vst.msk [vmem:[#allocation3 + $0x38] sm:$0xff] %vm818_vm3, %v737_v30  ;;  %v727_v21 = vpop.permute.xlu1 %726 }
 0x116   : > { %821 = vst.msk [vmem:[#allocation3 + $0x10] sm:$0xff] %vm818_vm3, %v727_v21 }
 0x117   : > { %941 = vrot.lane.b32.xlu2 %v5041_v38, %s4587_s9 }
 0x119   : > { %v747_v10 = vpop.permute.xlu2 %746 }
 0x11a   : > { %955 = vrot.lane.b32.xlu0 %v5156_v42, %s4587_s9  ;;  %831 = vst.msk [vmem:[#allocation3 + $0x60] sm:$0xff] %vm818_vm3, %v747_v10 }
 0x11b   : > { %945 = vrot.lane.b32.xlu1 %v5072_v3, %s4587_s9 }
 0x11c   : > { %v743_v43 = vpop.permute.xlu0 %742 }
 0x11d   : > { %829 = vst.msk [vmem:[#allocation3 + $0x50] sm:$0xff] %vm818_vm3, %v743_v43  ;;  %v733_v17 = vpop.permute.xlu1 %732 }
 0x11e   : > { %824 = vst.msk [vmem:[#allocation3 + $0x28] sm:$0xff] %vm818_vm3, %v733_v17  ;;  %v5329_v17 = vld [vmem:[#allocation2 + $0x188] sm:$0xff] }
 0x11f   : > { %947 = vrot.lane.b32.xlu2 %v5066_v60, %s4587_s9 }
 0x121   : > { %v753_v0 = vpop.permute.xlu2 %752 }
 0x122   : > { %961 = vrot.lane.b32.xlu0 %v5183_v7, %s4587_s9  ;;  %834 = vst.msk [vmem:[#allocation3 + $0x78] sm:$0xff] %vm818_vm3, %v753_v0 }
 0x123   : > { %951 = vrot.lane.b32.xlu1 %v5099_v32, %s4587_s9 }
 0x124   : > { %v749_v3 = vpop.permute.xlu0 %748 }
 0x125   : > { %832 = vst.msk [vmem:[#allocation3 + $0x68] sm:$0xff] %vm818_vm3, %v749_v3  ;;  %v739_v9 = vpop.permute.xlu1 %738 }
 0x126   : > { %827 = vst.msk [vmem:[#allocation3 + $0x40] sm:$0xff] %vm818_vm3, %v739_v9 }
 0x127   : > { %953 = vrot.lane.b32.xlu2 %v5093_v61, %s4587_s9 }
 0x129   : > { %v759_v26 = vpop.permute.xlu2 %758 }
 0x12a   : > { %967 = vrot.lane.b32.xlu0 %v5203_v48, %s4587_s9  ;;  %837 = vst.msk [vmem:[#allocation3 + $0x90] sm:$0xff] %vm818_vm3, %v759_v26 }
 0x12b   : > { %957 = vrot.lane.b32.xlu1 %v5126_v36, %s4587_s9 }
 0x12c   : > { %v755_v32 = vpop.permute.xlu0 %754 }
 0x12d   : > { %835 = vst.msk [vmem:[#allocation3 + $0x80] sm:$0xff] %vm818_vm3, %v755_v32  ;;  %v745_v16 = vpop.permute.xlu1 %744 }
 0x12e   : > { %830 = vst.msk [vmem:[#allocation3 + $0x58] sm:$0xff] %vm818_vm3, %v745_v16 }
 0x12f   : > { %959 = vrot.lane.b32.xlu2 %v5120_v49, %s4587_s9 }
 0x131   : > { %v765_v14 = vpop.permute.xlu2 %764 }
 0x132   : > { %973 = vrot.lane.b32.xlu0 %v5220_v37, %s4587_s9  ;;  %840 = vst.msk [vmem:[#allocation3 + $0xa8] sm:$0xff] %vm818_vm3, %v765_v14  ;;  %v7113_v14 = vld [vmem:[#allocation6_spill] sm:$0xff] }
 0x133   : > { %963 = vrot.lane.b32.xlu1 %v5153_v19, %s4587_s9 }
 0x134   : > { %v761_v36 = vpop.permute.xlu0 %760 }
 0x135   : > { %838 = vst.msk [vmem:[#allocation3 + $0x98] sm:$0xff] %vm818_vm3, %v761_v36  ;;  %v751_v30 = vpop.permute.xlu1 %750 }
 0x136   : > { %833 = vst.msk [vmem:[#allocation3 + $0x70] sm:$0xff] %vm818_vm3, %v751_v30  ;;  %v7114_v30 = vld [vmem:[#allocation11_spill] sm:$0xff] }
 0x137   : > { %965 = vrot.lane.b32.xlu2 %v5147_v11, %s4587_s9 }
 0x139   : > { %v771_v21 = vpop.permute.xlu2 %770 }
 0x13a   : > { %1108 = vrot.lane.b32.xlu0 %v4788_v15, %s4588_s10  ;;  %843 = vst.msk [vmem:[#allocation3 + $0xc0] sm:$0xff] %vm818_vm3, %v771_v21 }
 0x13b   : > { %969 = vrot.lane.b32.xlu1 %v5180_v12, %s4587_s9 }
 0x13c   : > { %v767_v19 = vpop.permute.xlu0 %766 }
 0x13d   : > { %841 = vst.msk [vmem:[#allocation3 + $0xb0] sm:$0xff] %vm818_vm3, %v767_v19  ;;  %v757_v10 = vpop.permute.xlu1 %756  ;;  %v7115_v19 = vld [vmem:[#allocation8_spill] sm:$0xff] }
 0x13e   : > { %836 = vst.msk [vmem:[#allocation3 + $0x88] sm:$0xff] %vm818_vm3, %v757_v10 }
 0x13f   : > { %971 = vrot.lane.b32.xlu2 %v5174_v6, %s4587_s9 }
 0x141   : > { %v777_v43 = vpop.permute.xlu2 %776 }
 0x142   : > { %1114 = vrot.lane.b32.xlu0 %v4821_v27, %s4588_s10  ;;  %846 = vst.msk [vmem:[#allocation3 + $0xd8] sm:$0xff] %vm818_vm3, %v777_v43  ;;  %v7116_v43 = vld [vmem:[#allocation14_spill] sm:$0xff] }
 0x143   : > { %975 = vrot.lane.b32.xlu1 %v5322_v4, %s4587_s9 }
 0x144   : > { %v773_v15 = vpop.permute.xlu0 %772 }
 0x145   : > { %844 = vst.msk [vmem:[#allocation3 + $0xc8] sm:$0xff] %vm818_vm3, %v773_v15  ;;  %v763_v0 = vpop.permute.xlu1 %762  ;;  %v7117_v15 = vld [vmem:[#allocation5_spill] sm:$0xff] }
 0x146   : > { %839 = vst.msk [vmem:[#allocation3 + $0xa0] sm:$0xff] %vm818_vm3, %v763_v0 }
 0x147   : > { %977 = vrot.lane.b32.xlu2 %v5329_v17, %s4587_s9 }
 0x149   : > { %v783_v3 = vpop.permute.xlu2 %782 }
 0x14a   : > { %1120 = vrot.lane.b32.xlu0 %v4839_v33, %s4588_s10  ;;  %849 = vst.msk [vmem:[#allocation3 + $0xf0] sm:$0xff] %vm818_vm3, %v783_v3 }
 0x14b   : > { %1110 = vrot.lane.b32.xlu1 %v4809_v23, %s4588_s10 }
 0x14c   : > { %v779_v27 = vpop.permute.xlu0 %778 }
 0x14d   : > { %847 = vst.msk [vmem:[#allocation3 + $0xe0] sm:$0xff] %vm818_vm3, %v779_v27  ;;  %v769_v9 = vpop.permute.xlu1 %768  ;;  %v7118_v27 = vld [vmem:[#allocation10_spill] sm:$0xff] }
 0x14e   : > { %842 = vst.msk [vmem:[#allocation3 + $0xb8] sm:$0xff] %vm818_vm3, %v769_v9 }
 0x14f   : > { %1112 = vrot.lane.b32.xlu2 %v4800_v20, %s4588_s10 }
 0x151   : > { %v918_v26 = vpop.permute.xlu2 %917 }
 0x152   : > { %1126 = vrot.lane.b32.xlu0 %v4857_v39, %s4588_s10  ;;  %1013 = vst.msk [vmem:[#allocation3 + $0x8] sm:$0xff] %vm1011_vm4, %v918_v26  ;;  %v7119_v26 = vld [vmem:[#allocation17_spill] sm:$0xff] }
 0x153   : > { %1116 = vrot.lane.b32.xlu1 %v4782_v13, %s4588_s10 }
 0x154   : > { %v785_v23 = vpop.permute.xlu0 %784 }
 0x155   : > { %850 = vst.msk [vmem:[#allocation3 + $0xf8] sm:$0xff] %vm818_vm3, %v785_v23  ;;  %v775_v33 = vpop.permute.xlu1 %774  ;;  %v7120_v23 = vld [vmem:[#allocation7_spill] sm:$0xff] }
 0x156   : > { %845 = vst.msk [vmem:[#allocation3 + $0xd0] sm:$0xff] %vm818_vm3, %v775_v33 }
 0x157   : > { %1118 = vrot.lane.b32.xlu2 %v4829_v29, %s4588_s10 }
 0x159   : > { %v924_v20 = vpop.permute.xlu2 %923 }
 0x15a   : > { %1132 = vrot.lane.b32.xlu0 %v4874_v45, %s4588_s10  ;;  %1016 = vst.msk [vmem:[#allocation3 + $0x20] sm:$0xff] %vm1011_vm4, %v924_v20 }
 0x15b   : > { %1122 = vrot.lane.b32.xlu1 %v4804_v22, %s4588_s10 }
 0x15c   : > { %v920_v39 = vpop.permute.xlu0 %919 }
 0x15d   : > { %1014 = vst.msk [vmem:[#allocation3 + $0x10] sm:$0xff] %vm1011_vm4, %v920_v39  ;;  %v781_v13 = vpop.permute.xlu1 %780  ;;  %v7121_v39 = vld [vmem:[#allocation13_spill] sm:$0xff] }
 0x15e   : > { %848 = vst.msk [vmem:[#allocation3 + $0xe8] sm:$0xff] %vm818_vm3, %v781_v13 }
 0x15f   : > { %1124 = vrot.lane.b32.xlu2 %v4847_v35, %s4588_s10 }
 0x161   : > { %v930_v8 = vpop.permute.xlu2 %929 }
 0x162   : > { %1138 = vrot.lane.b32.xlu0 %v4892_v50, %s4588_s10  ;;  %1019 = vst.msk [vmem:[#allocation3 + $0x38] sm:$0xff] %vm1011_vm4, %v930_v8  ;;  %v7122_v8 = vld [vmem:[#allocation20_spill] sm:$0xff] }
 0x163   : > { %1128 = vrot.lane.b32.xlu1 %v4825_v28, %s4588_s10 }
 0x164   : > { %v926_v29 = vpop.permute.xlu0 %925 }
 0x165   : > { %1017 = vst.msk [vmem:[#allocation3 + $0x28] sm:$0xff] %vm1011_vm4, %v926_v29  ;;  %v916_v22 = vpop.permute.xlu1 %915  ;;  %v7123_v29 = vld [vmem:[#allocation9_spill] sm:$0xff] }
 0x166   : > { %1012 = vst.msk [vmem:[#allocation3] sm:$0xff] %vm1011_vm4, %v916_v22 }
 0x167   : > { %1130 = vrot.lane.b32.xlu2 %v4865_v41, %s4588_s10 }
 0x169   : > { %v936_v45 = vpop.permute.xlu2 %935 }
 0x16a   : > { %1144 = vrot.lane.b32.xlu0 %v4907_v54, %s4588_s10  ;;  %1022 = vst.msk [vmem:[#allocation3 + $0x50] sm:$0xff] %vm1011_vm4, %v936_v45 }
 0x16b   : > { %1134 = vrot.lane.b32.xlu1 %v4843_v34, %s4588_s10 }
 0x16c   : > { %v932_v35 = vpop.permute.xlu0 %931 }
 0x16d   : > { %1020 = vst.msk [vmem:[#allocation3 + $0x40] sm:$0xff] %vm1011_vm4, %v932_v35  ;;  %v922_v28 = vpop.permute.xlu1 %921  ;;  %v7124_v35 = vld [vmem:[#allocation16_spill] sm:$0xff] }
 0x16e   : > { %1015 = vst.msk [vmem:[#allocation3 + $0x18] sm:$0xff] %vm1011_vm4, %v922_v28 }
 0x16f   : > { %1136 = vrot.lane.b32.xlu2 %v4883_v47, %s4588_s10 }
 0x171   : > { %v942_v50 = vpop.permute.xlu2 %941 }
 0x172   : > { %1150 = vrot.lane.b32.xlu0 %v4919_v57, %s4588_s10  ;;  %1025 = vst.msk [vmem:[#allocation3 + $0x68] sm:$0xff] %vm1011_vm4, %v942_v50  ;;  %v7125_v50 = vld [vmem:[#allocation23_spill] sm:$0xff] }
 0x173   : > { %1140 = vrot.lane.b32.xlu1 %v4861_v40, %s4588_s10 }
 0x174   : > { %v938_v41 = vpop.permute.xlu0 %937 }
 0x175   : > { %1023 = vst.msk [vmem:[#allocation3 + $0x58] sm:$0xff] %vm1011_vm4, %v938_v41  ;;  %v928_v34 = vpop.permute.xlu1 %927  ;;  %v7126_v41 = vld [vmem:[#allocation12_spill] sm:$0xff] }
 0x176   : > { %1018 = vst.msk [vmem:[#allocation3 + $0x30] sm:$0xff] %vm1011_vm4, %v928_v34 }
 0x177   : > { %1142 = vrot.lane.b32.xlu2 %v4899_v52, %s4588_s10 }
 0x179   : > { %v948_v54 = vpop.permute.xlu2 %947 }
 0x17a   : > { %1156 = vrot.lane.b32.xlu0 %v4931_v62, %s4588_s10  ;;  %1028 = vst.msk [vmem:[#allocation3 + $0x80] sm:$0xff] %vm1011_vm4, %v948_v54  ;;  %v5405_v62 = vld [vmem:[#allocation2 + $0x181] sm:$0xff] }
 0x17b   : > { %1146 = vrot.lane.b32.xlu1 %v4879_v46, %s4588_s10 }
 0x17c   : > { %v944_v47 = vpop.permute.xlu0 %943 }
 0x17d   : > { %1026 = vst.msk [vmem:[#allocation3 + $0x70] sm:$0xff] %vm1011_vm4, %v944_v47  ;;  %v934_v40 = vpop.permute.xlu1 %933  ;;  %v7127_v47 = vld [vmem:[#allocation19_spill] sm:$0xff] }
 0x17e   : > { %1021 = vst.msk [vmem:[#allocation3 + $0x48] sm:$0xff] %vm1011_vm4, %v934_v40 }
 0x17f   : > { %1148 = vrot.lane.b32.xlu2 %v4913_v56, %s4588_s10 }
 0x181   : > { %v954_v57 = vpop.permute.xlu2 %953 }
 0x182   : > { %1162 = vrot.lane.b32.xlu0 %v4950_v5, %s4588_s10  ;;  %1031 = vst.msk [vmem:[#allocation3 + $0x98] sm:$0xff] %vm1011_vm4, %v954_v57  ;;  %v7128_v57 = vld [vmem:[#allocation26_spill] sm:$0xff] }
 0x183   : > { %1152 = vrot.lane.b32.xlu1 %v4895_v51, %s4588_s10 }
 0x184   : > { %v950_v52 = vpop.permute.xlu0 %949 }
 0x185   : > { %1029 = vst.msk [vmem:[#allocation3 + $0x88] sm:$0xff] %vm1011_vm4, %v950_v52  ;;  %v940_v46 = vpop.permute.xlu1 %939  ;;  %v7129_v52 = vld [vmem:[#allocation15_spill] sm:$0xff] }
 0x186   : > { %1024 = vst.msk [vmem:[#allocation3 + $0x60] sm:$0xff] %vm1011_vm4, %v940_v46 }
 0x187   : > { %1154 = vrot.lane.b32.xlu2 %v4925_v59, %s4588_s10  ;;  %v7112_v59 = vld [vmem:[#allocation4_spill] sm:$0xff] }
 0x189   : > { %v960_v56 = vpop.permute.xlu2 %959 }
 0x18a   : > { %1168 = vrot.lane.b32.xlu0 %v5405_v62, %s4588_s10  ;;  %1034 = vst.msk [vmem:[#allocation3 + $0xb0] sm:$0xff] %vm1011_vm4, %v960_v56 }
 0x18b   : > { %1158 = vrot.lane.b32.xlu1 %v4909_v55, %s4588_s10 }
 0x18c   : > { %v956_v51 = vpop.permute.xlu0 %955 }
 0x18d   : > { %1032 = vst.msk [vmem:[#allocation3 + $0xa0] sm:$0xff] %vm1011_vm4, %v956_v51  ;;  %v946_v5 = vpop.permute.xlu1 %945  ;;  %v7130_v51 = vld [vmem:[#allocation22_spill] sm:$0xff] }
 0x18e   : > { %1027 = vst.msk [vmem:[#allocation3 + $0x78] sm:$0xff] %vm1011_vm4, %v946_v5 }
 0x18f   : > { %1160 = vrot.lane.b32.xlu2 %v4939_v1, %s4588_s10  ;;  %v5427_v1 = vld [vmem:[#allocation2 + $0x189] sm:$0xff] }
 0x191   : > { %v966_v32 = vpop.permute.xlu2 %965 }
 0x192   : > { %1303 = vrot.lane.b32.xlu0 %v4942_v2, %s4589_s11  ;;  %1037 = vst.msk [vmem:[#allocation3 + $0xc8] sm:$0xff] %vm1011_vm4, %v966_v32  ;;  %v7131_v32 = vld [vmem:[#allocation29_spill] sm:$0xff] }
 0x193   : > { %1164 = vrot.lane.b32.xlu1 %v7112_v59, %s4588_s10  ;;  %v7132_v59 = vld [vmem:[#allocation18_spill] sm:$0xff] }
 0x194   : > { %v962_v55 = vpop.permute.xlu0 %961 }
 0x195   : > { %1035 = vst.msk [vmem:[#allocation3 + $0xb8] sm:$0xff] %vm1011_vm4, %v962_v55  ;;  %v952_v16 = vpop.permute.xlu1 %951 }
 0x196   : > { %1030 = vst.msk [vmem:[#allocation3 + $0x90] sm:$0xff] %vm1011_vm4, %v952_v16 }
 0x197   : > { %1166 = vrot.lane.b32.xlu2 %v7113_v14, %s4588_s10  ;;  %v7133_v14 = vld [vmem:[#allocation25_spill] sm:$0xff] }
 0x199   : > { %v972_v36 = vpop.permute.xlu2 %971 }
 0x19a   : > { %1309 = vrot.lane.b32.xlu0 %v7114_v30, %s4589_s11  ;;  %1040 = vst.msk [vmem:[#allocation3 + $0xe0] sm:$0xff] %vm1011_vm4, %v972_v36  ;;  %v7134_v30 = vld [vmem:[#allocation32_spill] sm:$0xff] }
 0x19b   : > { %1170 = vrot.lane.b32.xlu1 %v5427_v1, %s4588_s10 }
 0x19c   : > { %v968_v2 = vpop.permute.xlu0 %967 }
 0x19d   : > { %1038 = vst.msk [vmem:[#allocation3 + $0xd0] sm:$0xff] %vm1011_vm4, %v968_v2  ;;  %v958_v21 = vpop.permute.xlu1 %957  ;;  %v7135_v2 = vld [vmem:[#allocation21_spill] sm:$0xff] }
 0x19e   : > { %1033 = vst.msk [vmem:[#allocation3 + $0xa8] sm:$0xff] %vm1011_vm4, %v958_v21 }
 0x19f   : > { %1301 = vrot.lane.b32.xlu2 %v7115_v19, %s4589_s11 }
 0x1a1   : > { %v978_v10 = vpop.permute.xlu2 %977 }
 0x1a2   : > { %1315 = vrot.lane.b32.xlu0 %v7116_v43, %s4589_s11  ;;  %1043 = vst.msk [vmem:[#allocation3 + $0xf8] sm:$0xff] %vm1011_vm4, %v978_v10  ;;  %v7136_v10 = vld [vmem:[#allocation28_spill] sm:$0xff] }
 0x1a3   : > { %1305 = vrot.lane.b32.xlu1 %v7117_v15, %s4589_s11  ;;  %v5504_v15 = vld [vmem:[#allocation2 + $0x182] sm:$0xff] }
 0x1a4   : > { %v974_v0 = vpop.permute.xlu0 %973 }
 0x1a5   : > { %1041 = vst.msk [vmem:[#allocation3 + $0xe8] sm:$0xff] %vm1011_vm4, %v974_v0  ;;  %v964_v3 = vpop.permute.xlu1 %963  ;;  %v7137_v0 = vld [vmem:[#allocation24_spill] sm:$0xff] }
 0x1a6   : > { %1036 = vst.msk [vmem:[#allocation3 + $0xc0] sm:$0xff] %vm1011_vm4, %v964_v3  ;;  %v7138_v3 = vmov 0.0  }
 0x1a7   : > { %1307 = vrot.lane.b32.xlu2 %v7118_v27, %s4589_s11  ;;  %2499 = vst.msk [vmem:[#allocation2 + $0x180] sm:$0xff] %vm312_vm0, %v7138_v3 }
 0x1a9   : > { %v1113_v9 = vpop.permute.xlu2 %1112 }
 0x1aa   : > { %1321 = vrot.lane.b32.xlu0 %v7119_v26, %s4589_s11  ;;  %1207 = vst.msk [vmem:[#allocation3 + $0x10] sm:$0xff] %vm1204_vm5, %v1113_v9  ;;  %v1268_v26 = vld [vmem:[#allocation2 + $0x18a] sm:$0xff] }
 0x1ab   : > { %1311 = vrot.lane.b32.xlu1 %v7120_v23, %s4589_s11  ;;  %v7139_v23 = vld [vmem:[#allocation31_spill] sm:$0xff] }
 0x1ac   : > { %v1109_v33 = vpop.permute.xlu0 %1108 }
 0x1ad   : > { %1205 = vst.msk [vmem:[#allocation3] sm:$0xff] %vm1204_vm5, %v1109_v33  ;;  %v970_v20 = vpop.permute.xlu1 %969  ;;  %v7140_v33 = vld [vmem:[#allocation27_spill] sm:$0xff] }
 0x1ae   : > { %1039 = vst.msk [vmem:[#allocation3 + $0xd8] sm:$0xff] %vm1011_vm4, %v970_v20 }
 0x1af   : > { %1313 = vrot.lane.b32.xlu2 %v7121_v39, %s4589_s11 }
 0x1b1   : > { %v1119_v13 = vpop.permute.xlu2 %1118 }
 0x1b2   : > { %1327 = vrot.lane.b32.xlu0 %v7122_v8, %s4589_s11  ;;  %1210 = vst.msk [vmem:[#allocation3 + $0x28] sm:$0xff] %vm1204_vm5, %v1119_v13  ;;  %v1433_v13 = vld [vmem:[#allocation2 + $0x48] sm:$0xff] }
 0x1b3   : > { %1317 = vrot.lane.b32.xlu1 %v7123_v29, %s4589_s11  ;;  %v7141_v29 = vld [vmem:[#allocation30_spill] sm:$0xff] }
 0x1b4   : > { %v1115_v22 = vpop.permute.xlu0 %1114 }
 0x1b5   : > { %1208 = vst.msk [vmem:[#allocation3 + $0x18] sm:$0xff] %vm1204_vm5, %v1115_v22  ;;  %v976_v45 = vpop.permute.xlu1 %975 }
 0x1b6   : > { %1042 = vst.msk [vmem:[#allocation3 + $0xf0] sm:$0xff] %vm1011_vm4, %v976_v45 }
 0x1b7   : > { %1319 = vrot.lane.b32.xlu2 %v7124_v35, %s4589_s11  ;;  %v1436_v35 = vld [vmem:[#allocation2 + $0x68] sm:$0xff] }
 0x1b9   : > { %v1125_v28 = vpop.permute.xlu2 %1124 }
 0x1ba   : > { %1333 = vrot.lane.b32.xlu0 %v7125_v50, %s4589_s11  ;;  %1213 = vst.msk [vmem:[#allocation3 + $0x40] sm:$0xff] %vm1204_vm5, %v1125_v28 }
 0x1bb   : > { %1323 = vrot.lane.b32.xlu1 %v7126_v41, %s4589_s11  ;;  %v1432_v41 = vld [vmem:[#allocation2 + $0x38] sm:$0xff] }
 0x1bc   : > { %v1121_v34 = vpop.permute.xlu0 %1120 }
 0x1bd   : > { %1211 = vst.msk [vmem:[#allocation3 + $0x30] sm:$0xff] %vm1204_vm5, %v1121_v34  ;;  %v1111_v54 = vpop.permute.xlu1 %1110 }
 0x1be   : > { %1206 = vst.msk [vmem:[#allocation3 + $0x8] sm:$0xff] %vm1204_vm5, %v1111_v54 }
 0x1bf   : > { %1325 = vrot.lane.b32.xlu2 %v7127_v47, %s4589_s11 }
 0x1c1   : > { %v1131_v40 = vpop.permute.xlu2 %1130 }
 0x1c2   : > { %1339 = vrot.lane.b32.xlu0 %v7128_v57, %s4589_s11  ;;  %1216 = vst.msk [vmem:[#allocation3 + $0x58] sm:$0xff] %vm1204_vm5, %v1131_v40  ;;  %v1435_v40 = vld [vmem:[#allocation2 + $0x60] sm:$0xff] }
 0x1c3   : > { %1329 = vrot.lane.b32.xlu1 %v7129_v52, %s4589_s11 }
 0x1c4   : > { %v1127_v46 = vpop.permute.xlu0 %1126 }
 0x1c5   : > { %1214 = vst.msk [vmem:[#allocation3 + $0x48] sm:$0xff] %vm1204_vm5, %v1127_v46  ;;  %v1117_v56 = vpop.permute.xlu1 %1116 }
 0x1c6   : > { %1209 = vst.msk [vmem:[#allocation3 + $0x20] sm:$0xff] %vm1204_vm5, %v1117_v56 }
 0x1c7   : > { %1331 = vrot.lane.b32.xlu2 %v7130_v51, %s4589_s11 }
 0x1c9   : > { %v1137_v5 = vpop.permute.xlu2 %1136 }
 0x1ca   : > { %1345 = vrot.lane.b32.xlu0 %v7131_v32, %s4589_s11  ;;  %1219 = vst.msk [vmem:[#allocation3 + $0x70] sm:$0xff] %vm1204_vm5, %v1137_v5 }
 0x1cb   : > { %1335 = vrot.lane.b32.xlu1 %v7132_v59, %s4589_s11 }
 0x1cc   : > { %v1133_v55 = vpop.permute.xlu0 %1132 }
 0x1cd   : > { %1217 = vst.msk [vmem:[#allocation3 + $0x60] sm:$0xff] %vm1204_vm5, %v1133_v55  ;;  %v1123_v16 = vpop.permute.xlu1 %1122 }
 0x1ce   : > { %1212 = vst.msk [vmem:[#allocation3 + $0x38] sm:$0xff] %vm1204_vm5, %v1123_v16 }
 0x1cf   : > { %1337 = vrot.lane.b32.xlu2 %v7133_v14, %s4589_s11 }
 0x1d1   : > { %v1143_v36 = vpop.permute.xlu2 %1142 }
 0x1d2   : > { %1351 = vrot.lane.b32.xlu0 %v7134_v30, %s4589_s11  ;;  %1222 = vst.msk [vmem:[#allocation3 + $0x88] sm:$0xff] %vm1204_vm5, %v1143_v36 }
 0x1d3   : > { %1341 = vrot.lane.b32.xlu1 %v7135_v2, %s4589_s11 }
 0x1d4   : > { %v1139_v21 = vpop.permute.xlu0 %1138 }
 0x1d5   : > { %1220 = vst.msk [vmem:[#allocation3 + $0x78] sm:$0xff] %vm1204_vm5, %v1139_v21  ;;  %v1129_v19 = vpop.permute.xlu1 %1128  ;;  %v1624_v21 = vld [vmem:[#allocation2 + $0x31] sm:$0xff] }
 0x1d6   : > { %1215 = vst.msk [vmem:[#allocation3 + $0x50] sm:$0xff] %vm1204_vm5, %v1129_v19 }
 0x1d7   : > { %1343 = vrot.lane.b32.xlu2 %v7136_v10, %s4589_s11  ;;  %v1627_v10 = vld [vmem:[#allocation2 + $0x51] sm:$0xff] }
 0x1d9   : > { %v1149_v43 = vpop.permute.xlu2 %1148 }
 0x1da   : > { %1357 = vrot.lane.b32.xlu0 %v5218_v58, %s4589_s11  ;;  %1225 = vst.msk [vmem:[#allocation3 + $0xa0] sm:$0xff] %vm1204_vm5, %v1149_v43 }
 0x1db   : > { %1347 = vrot.lane.b32.xlu1 %v7137_v0, %s4589_s11 }
 0x1dc   : > { %v1145_v27 = vpop.permute.xlu0 %1144 }
 0x1dd   : > { %1223 = vst.msk [vmem:[#allocation3 + $0x90] sm:$0xff] %vm1204_vm5, %v1145_v27  ;;  %v1135_v9 = vpop.permute.xlu1 %1134 }
 0x1de   : > { %1218 = vst.msk [vmem:[#allocation3 + $0x68] sm:$0xff] %vm1204_vm5, %v1135_v9  ;;  %v1630_v9 = vld [vmem:[#allocation2 + $0x79] sm:$0xff] }
 0x1df   : > { %1349 = vrot.lane.b32.xlu2 %v7139_v23, %s4589_s11 }
 0x1e1   : > { %v1155_v58 = vpop.permute.xlu2 %1154 }
 0x1e2   : > { %1363 = vrot.lane.b32.xlu0 %v1268_v26, %s4589_s11  ;;  %1228 = vst.msk [vmem:[#allocation3 + $0xb8] sm:$0xff] %vm1204_vm5, %v1155_v58  ;;  %v1625_v26 = vld [vmem:[#allocation2 + $0x39] sm:$0xff]  ;;  %v1626_v58 = vld [vmem:[#allocation2 + $0x49] sm:$0xff] }
 0x1e3   : > { %1353 = vrot.lane.b32.xlu1 %v7140_v33, %s4589_s11 }
 0x1e4   : > { %v1151_v20 = vpop.permute.xlu0 %1150 }
 0x1e5   : > { %1226 = vst.msk [vmem:[#allocation3 + $0xa8] sm:$0xff] %vm1204_vm5, %v1151_v20  ;;  %v1141_v39 = vpop.permute.xlu1 %1140  ;;  %v1633_v20 = vld [vmem:[#allocation2 + $0x99] sm:$0xff] }
 0x1e6   : > { %1221 = vst.msk [vmem:[#allocation3 + $0x80] sm:$0xff] %vm1204_vm5, %v1141_v39  ;;  %v1628_v39 = vld [vmem:[#allocation2 + $0x61] sm:$0xff] }
 0x1e7   : > { %1355 = vrot.lane.b32.xlu2 %v5211_v53, %s4589_s11  ;;  %v1431_v53 = vld [vmem:[#allocation2 + $0x30] sm:$0xff] }
 0x1e9   : > { %v1161_v8 = vpop.permute.xlu2 %1160 }
 0x1ea   : > { %1499 = vrot.lane.b32.xlu0 %v1433_v13, %s4590_s12  ;;  %1231 = vst.msk [vmem:[#allocation3 + $0xd0] sm:$0xff] %vm1204_vm5, %v1161_v8 }
 0x1eb   : > { %1359 = vrot.lane.b32.xlu1 %v7141_v29, %s4589_s11  ;;  %v1629_v29 = vld [vmem:[#allocation2 + $0x69] sm:$0xff] }
 0x1ec   : > { %v1157_v22 = vpop.permute.xlu0 %1156 }
 0x1ed   : > { %1229 = vst.msk [vmem:[#allocation3 + $0xc0] sm:$0xff] %vm1204_vm5, %v1157_v22  ;;  %v1147_v45 = vpop.permute.xlu1 %1146 }
 0x1ee   : > { %1224 = vst.msk [vmem:[#allocation3 + $0x98] sm:$0xff] %vm1204_vm5, %v1147_v45  ;;  %v1636_v45 = vld [vmem:[#allocation2 + $0xc1] sm:$0xff] }
 0x1ef   : > { %1361 = vrot.lane.b32.xlu2 %v5504_v15, %s4589_s11 }
 0x1f1   : > { %v1167_v28 = vpop.permute.xlu2 %1166 }
 0x1f2   : > { %1505 = vrot.lane.b32.xlu0 %v1436_v35, %s4590_s12  ;;  %1234 = vst.msk [vmem:[#allocation3 + $0xe8] sm:$0xff] %vm1204_vm5, %v1167_v28  ;;  %v1631_v35 = vld [vmem:[#allocation2 + $0x81] sm:$0xff] }
 0x1f3   : > { %1495 = vrot.lane.b32.xlu1 %v1431_v53, %s4590_s12 }
 0x1f4   : > { %v1163_v50 = vpop.permute.xlu0 %1162 }
 0x1f5   : > { %1232 = vst.msk [vmem:[#allocation3 + $0xd8] sm:$0xff] %vm1204_vm5, %v1163_v50  ;;  %v1153_v34 = vpop.permute.xlu1 %1152  ;;  %v1632_v50 = vld [vmem:[#allocation2 + $0x91] sm:$0xff] }
 0x1f6   : > { %1227 = vst.msk [vmem:[#allocation3 + $0xb0] sm:$0xff] %vm1204_vm5, %v1153_v34  ;;  %v1639_v34 = vld [vmem:[#allocation2 + $0xe1] sm:$0xff] }
 0x1f7   : > { %1497 = vrot.lane.b32.xlu2 %v1432_v41, %s4590_s12 }
 0x1f9   : > { %v1302_v54 = vpop.permute.xlu2 %1301 }
 0x1fa   : > { %1511 = vrot.lane.b32.xlu0 %v5016_v25, %s4590_s12  ;;  %1398 = vst.msk [vmem:[#allocation3] sm:$0xff] %vm1397_vm6, %v1302_v54  ;;  %v1634_v54 = vld [vmem:[#allocation2 + $0xa9] sm:$0xff] }
 0x1fb   : > { %1501 = vrot.lane.b32.xlu1 %v5024_v31, %s4590_s12  ;;  %v1438_v31 = vld [vmem:[#allocation2 + $0x80] sm:$0xff] }
 0x1fc   : > { %v1169_v47 = vpop.permute.xlu0 %1168 }
 0x1fd   : > { %1235 = vst.msk [vmem:[#allocation3 + $0xf0] sm:$0xff] %vm1204_vm5, %v1169_v47  ;;  %v1159_v57 = vpop.permute.xlu1 %1158 }
 0x1fe   : > { %1230 = vst.msk [vmem:[#allocation3 + $0xc8] sm:$0xff] %vm1204_vm5, %v1159_v57  ;;  %v1635_v57 = vld [vmem:[#allocation2 + $0xb1] sm:$0xff] }
 0x1ff   : > { %1503 = vrot.lane.b32.xlu2 %v1435_v40, %s4590_s12 }
 0x201   : > { %v1308_v52 = vpop.permute.xlu2 %1307 }
 0x202   : > { %1517 = vrot.lane.b32.xlu0 %v5041_v38, %s4590_s12  ;;  %1401 = vst.msk [vmem:[#allocation3 + $0x18] sm:$0xff] %vm1397_vm6, %v1308_v52 }
 0x203   : > { %1507 = vrot.lane.b32.xlu1 %v5049_v44, %s4590_s12  ;;  %v1441_v44 = vld [vmem:[#allocation2 + $0xa8] sm:$0xff] }
 0x204   : > { %v1304_v25 = vpop.permute.xlu0 %1303 }
 0x205   : > { %1399 = vst.msk [vmem:[#allocation3 + $0x8] sm:$0xff] %vm1397_vm6, %v1304_v25  ;;  %v1165_v46 = vpop.permute.xlu1 %1164  ;;  %v1642_v25 = vld [vmem:[#allocation2 + $0x109] sm:$0xff] }
 0x206   : > { %1233 = vst.msk [vmem:[#allocation3 + $0xe0] sm:$0xff] %vm1204_vm5, %v1165_v46 }
 0x207   : > { %1509 = vrot.lane.b32.xlu2 %v1438_v31, %s4590_s12  ;;  %v1637_v31 = vld [vmem:[#allocation2 + $0xc9] sm:$0xff] }
 0x209   : > { %v1314_v56 = vpop.permute.xlu2 %1313 }
 0x20a   : > { %1523 = vrot.lane.b32.xlu0 %v5066_v60, %s4590_s12  ;;  %1404 = vst.msk [vmem:[#allocation3 + $0x30] sm:$0xff] %vm1397_vm6, %v1314_v56 }
 0x20b   : > { %1513 = vrot.lane.b32.xlu1 %v5075_v24, %s4590_s12  ;;  %v1444_v24 = vld [vmem:[#allocation2 + $0xc8] sm:$0xff] }
 0x20c   : > { %v1310_v38 = vpop.permute.xlu0 %1309 }
 0x20d   : > { %1402 = vst.msk [vmem:[#allocation3 + $0x20] sm:$0xff] %vm1397_vm6, %v1310_v38  ;;  %v1171_v51 = vpop.permute.xlu1 %1170  ;;  %v1638_v38 = vld [vmem:[#allocation2 + $0xd9] sm:$0xff] }
 0x20e   : > { %1236 = vst.msk [vmem:[#allocation3 + $0xf8] sm:$0xff] %vm1204_vm5, %v1171_v51  ;;  %v1818_v51 = vld [vmem:[#allocation2 + $0x3a] sm:$0xff] }
 0x20f   : > { %1515 = vrot.lane.b32.xlu2 %v1441_v44, %s4590_s12  ;;  %2459 = vst.msk [vmem:[#allocation2 + $0x40] sm:$0x3] %vm315_vm1, %v7138_v3 }
 0x211   : > { %v1320_v5 = vpop.permute.xlu2 %1319 }
 0x212   : > { %1529 = vrot.lane.b32.xlu0 %v5093_v61, %s4590_s12  ;;  %1407 = vst.msk [vmem:[#allocation3 + $0x48] sm:$0xff] %vm1397_vm6, %v1320_v5  ;;  %v1645_v5 = vld [vmem:[#allocation2 + $0x129] sm:$0xff] }
 0x213   : > { %1519 = vrot.lane.b32.xlu1 %v5102_v18, %s4590_s12  ;;  %v1447_v18 = vld [vmem:[#allocation2 + $0xf0] sm:$0xff] }
 0x214   : > { %v1316_v60 = vpop.permute.xlu0 %1315 }
 0x215   : > { %1405 = vst.msk [vmem:[#allocation3 + $0x38] sm:$0xff] %vm1397_vm6, %v1316_v60  ;;  %v1306_v32 = vpop.permute.xlu1 %1305  ;;  %v1640_v60 = vld [vmem:[#allocation2 + $0xf1] sm:$0xff] }
 0x216   : > { %1400 = vst.msk [vmem:[#allocation3 + $0x10] sm:$0xff] %vm1397_vm6, %v1306_v32 }
 0x217   : > { %1521 = vrot.lane.b32.xlu2 %v1444_v24, %s4590_s12 }
 0x219   : > { %v1326_v59 = vpop.permute.xlu2 %1325 }
 0x21a   : > { %1535 = vrot.lane.b32.xlu0 %v5120_v49, %s4590_s12  ;;  %1410 = vst.msk [vmem:[#allocation3 + $0x60] sm:$0xff] %vm1397_vm6, %v1326_v59  ;;  %v1641_v59 = vld [vmem:[#allocation2 + $0xf9] sm:$0xff] }
 0x21b   : > { %1525 = vrot.lane.b32.xlu1 %v5129_v63, %s4590_s12  ;;  %v1450_v63 = vld [vmem:[#allocation2 + $0x110] sm:$0xff] }
 0x21c   : > { %v1322_v61 = vpop.permute.xlu0 %1321 }
 0x21d   : > { %1408 = vst.msk [vmem:[#allocation3 + $0x50] sm:$0xff] %vm1397_vm6, %v1322_v61  ;;  %v1312_v55 = vpop.permute.xlu1 %1311 }
 0x21e   : > { %1403 = vst.msk [vmem:[#allocation3 + $0x28] sm:$0xff] %vm1397_vm6, %v1312_v55  ;;  %v1643_v55 = vld [vmem:[#allocation2 + $0x111] sm:$0xff] }
 0x21f   : > { %1527 = vrot.lane.b32.xlu2 %v1447_v18, %s4590_s12  ;;  %v1648_v18 = vld [vmem:[#allocation2 + $0x151] sm:$0xff] }
 0x221   : > { %v1332_v16 = vpop.permute.xlu2 %1331 }
 0x222   : > { %1541 = vrot.lane.b32.xlu0 %v5147_v11, %s4590_s12  ;;  %1413 = vst.msk [vmem:[#allocation3 + $0x78] sm:$0xff] %vm1397_vm6, %v1332_v16 }
 0x223   : > { %1531 = vrot.lane.b32.xlu1 %v5156_v42, %s4590_s12  ;;  %v1453_v42 = vld [vmem:[#allocation2 + $0x138] sm:$0xff] }
 0x224   : > { %v1328_v49 = vpop.permute.xlu0 %1327 }
 0x225   : > { %1411 = vst.msk [vmem:[#allocation3 + $0x68] sm:$0xff] %vm1397_vm6, %v1328_v49  ;;  %v1318_v14 = vpop.permute.xlu1 %1317 }
 0x226   : > { %1406 = vst.msk [vmem:[#allocation3 + $0x40] sm:$0xff] %vm1397_vm6, %v1318_v14 }
 0x227   : > { %1533 = vrot.lane.b32.xlu2 %v1450_v63, %s4590_s12  ;;  %v1644_v63 = vld [vmem:[#allocation2 + $0x121] sm:$0xff] }
 0x229   : > { %v1338_v36 = vpop.permute.xlu2 %1337 }
 0x22a   : > { %1547 = vrot.lane.b32.xlu0 %v5174_v6, %s4590_s12  ;;  %1416 = vst.msk [vmem:[#allocation3 + $0x90] sm:$0xff] %vm1397_vm6, %v1338_v36  ;;  %v1819_v36 = vld [vmem:[#allocation2 + $0x4a] sm:$0xff] }
 0x22b   : > { %1537 = vrot.lane.b32.xlu1 %v5183_v7, %s4590_s12  ;;  %2460 = vst.msk [vmem:[#allocation2 + $0x48] sm:$0xff] %vm312_vm0, %v7138_v3 }
 0x22c   : > { %v1334_v11 = vpop.permute.xlu0 %1333 }
 0x22d   : > { %1414 = vst.msk [vmem:[#allocation3 + $0x80] sm:$0xff] %vm1397_vm6, %v1334_v11  ;;  %v1324_v30 = vpop.permute.xlu1 %1323  ;;  %v1651_v11 = vld [vmem:[#allocation2 + $0x171] sm:$0xff] }
 0x22e   : > { %1409 = vst.msk [vmem:[#allocation3 + $0x58] sm:$0xff] %vm1397_vm6, %v1324_v30 }
 0x22f   : > { %1539 = vrot.lane.b32.xlu2 %v1453_v42, %s4590_s12  ;;  %v1646_v42 = vld [vmem:[#allocation2 + $0x139] sm:$0xff] }
 0x231   : > { %v1344_v2 = vpop.permute.xlu2 %1343 }
 0x232   : > { %1553 = vrot.lane.b32.xlu0 %v5329_v17, %s4590_s12  ;;  %1419 = vst.msk [vmem:[#allocation3 + $0xa8] sm:$0xff] %vm1397_vm6, %v1344_v2 }
 0x233   : > { %1543 = vrot.lane.b32.xlu1 %v5203_v48, %s4590_s12 }
 0x234   : > { %v1340_v6 = vpop.permute.xlu0 %1339 }
 0x235   : > { %1417 = vst.msk [vmem:[#allocation3 + $0x98] sm:$0xff] %vm1397_vm6, %v1340_v6  ;;  %v1330_v7 = vpop.permute.xlu1 %1329  ;;  %v1647_v6 = vld [vmem:[#allocation2 + $0x141] sm:$0xff] }
 0x236   : > { %1412 = vst.msk [vmem:[#allocation3 + $0x70] sm:$0xff] %vm1397_vm6, %v1330_v7 }
 0x237   : > { %1545 = vrot.lane.b32.xlu2 %v5180_v12, %s4590_s12  ;;  %v1461_v12 = vld [vmem:[#allocation2 + $0x198] sm:$0xff] }
 0x239   : > { %v1350_v19 = vpop.permute.xlu2 %1349 }
 0x23a   : > { %1688 = vrot.lane.b32.xlu0 %v1624_v21, %s4591_s13  ;;  %1422 = vst.msk [vmem:[#allocation3 + $0xc0] sm:$0xff] %vm1397_vm6, %v1350_v19  ;;  %v1817_v21 = vld [vmem:[#allocation2 + $0x32] sm:$0xff] }
 0x23b   : > { %1549 = vrot.lane.b32.xlu1 %v5220_v37, %s4590_s12  ;;  %v1462_v37 = vld [vmem:[#allocation2 + $0x1a0] sm:$0xff]  ;;  %2457 = vst.msk [vmem:[#allocation2 + $0x30] sm:$0xff] %vm312_vm0, %v7138_v3 }
 0x23c   : > { %v1346_v48 = vpop.permute.xlu0 %1345  ;;  %v1654_v19 = vld [vmem:[#allocation2 + $0x199] sm:$0xff]  ;;  %2458 = vst.msk [vmem:[#allocation2 + $0x38] sm:$0xff] %vm312_vm0, %v7138_v3 }
 0x23d   : > { %1420 = vst.msk [vmem:[#allocation3 + $0xb0] sm:$0xff] %vm1397_vm6, %v1346_v48  ;;  %v1336_v17 = vpop.permute.xlu1 %1335  ;;  %v1649_v48 = vld [vmem:[#allocation2 + $0x159] sm:$0xff] }
 0x23e   : > { %1415 = vst.msk [vmem:[#allocation3 + $0x88] sm:$0xff] %vm1397_vm6, %v1336_v17 }
 0x23f   : > { %1551 = vrot.lane.b32.xlu2 %v5322_v4, %s4590_s12 }
 0x241   : > { %v1356_v43 = vpop.permute.xlu2 %1355 }
 0x242   : > { %1694 = vrot.lane.b32.xlu0 %v1627_v10, %s4591_s13  ;;  %1425 = vst.msk [vmem:[#allocation3 + $0xd8] sm:$0xff] %vm1397_vm6, %v1356_v43 }
 0x243   : > { %1555 = vrot.lane.b32.xlu1 %v1461_v12, %s4590_s12  ;;  %v1650_v12 = vld [vmem:[#allocation2 + $0x169] sm:$0xff] }
 0x244   : > { %v1352_v0 = vpop.permute.xlu0 %1351 }
 0x245   : > { %1423 = vst.msk [vmem:[#allocation3 + $0xc8] sm:$0xff] %vm1397_vm6, %v1352_v0  ;;  %v1342_v27 = vpop.permute.xlu1 %1341  ;;  %v1821_v0 = vld [vmem:[#allocation2 + $0x62] sm:$0xff] }
 0x246   : > { %1418 = vst.msk [vmem:[#allocation3 + $0xa0] sm:$0xff] %vm1397_vm6, %v1342_v27 }
 0x247   : > { %1557 = vrot.lane.b32.xlu2 %v1462_v37, %s4590_s12  ;;  %2463 = vst.msk [vmem:[#allocation2 + $0x60] sm:$0xff] %vm312_vm0, %v7138_v3  ;;  %v1822_v37 = vld [vmem:[#allocation2 + $0x6a] sm:$0xff] }
 0x248   : > { %2465 = vst.msk [vmem:[#allocation2 + $0x70] sm:$0x3] %vm315_vm1, %v7138_v3 }
 0x249   : > { %v1362_v4 = vpop.permute.xlu2 %1361  ;;  %2464 = vst.msk [vmem:[#allocation2 + $0x68] sm:$0xff] %vm312_vm0, %v7138_v3 }
 0x24a   : > { %1700 = vrot.lane.b32.xlu0 %v1630_v9, %s4591_s13  ;;  %1428 = vst.msk [vmem:[#allocation3 + $0xf0] sm:$0xff] %vm1397_vm6, %v1362_v4  ;;  %v1820_v4 = vld [vmem:[#allocation2 + $0x52] sm:$0xff] }
 0x24b   : > { %1690 = vrot.lane.b32.xlu1 %v1625_v26, %s4591_s13  ;;  %2462 = vst.msk [vmem:[#allocation2 + $0x58] sm:$0x3] %vm315_vm1, %v7138_v3 }
 0x24c   : > { %v1358_v23 = vpop.permute.xlu0 %1357  ;;  %2461 = vst.msk [vmem:[#allocation2 + $0x50] sm:$0xff] %vm312_vm0, %v7138_v3 }
 0x24d   : > { %1426 = vst.msk [vmem:[#allocation3 + $0xe0] sm:$0xff] %vm1397_vm6, %v1358_v23  ;;  %v1348_v33 = vpop.permute.xlu1 %1347  ;;  %v1655_v23 = vld [vmem:[#allocation2 + $0x1a1] sm:$0xff] }
 0x24e   : > { %1421 = vst.msk [vmem:[#allocation3 + $0xb8] sm:$0xff] %vm1397_vm6, %v1348_v33 }
 0x24f   : > { %1692 = vrot.lane.b32.xlu2 %v1626_v58, %s4591_s13 }
 0x251   : > { %v1498_v13 = vpop.permute.xlu2 %1497 }
 0x252   : > { %1706 = vrot.lane.b32.xlu0 %v1633_v20, %s4591_s13  ;;  %1593 = vst.msk [vmem:[#allocation3 + $0x8] sm:$0xff] %vm1591_vm7, %v1498_v13 }
 0x253   : > { %1696 = vrot.lane.b32.xlu1 %v1628_v39, %s4591_s13 }
 0x254   : > { %v1364_v8 = vpop.permute.xlu0 %1363 }
 0x255   : > { %1429 = vst.msk [vmem:[#allocation3 + $0xf8] sm:$0xff] %vm1397_vm6, %v1364_v8  ;;  %v1354_v22 = vpop.permute.xlu1 %1353 }
 0x256   : > { %1424 = vst.msk [vmem:[#allocation3 + $0xd0] sm:$0xff] %vm1397_vm6, %v1354_v22 }
 0x257   : > { %1698 = vrot.lane.b32.xlu2 %v1629_v29, %s4591_s13 }
 0x259   : > { %v1504_v53 = vpop.permute.xlu2 %1503 }
 0x25a   : > { %1712 = vrot.lane.b32.xlu0 %v1636_v45, %s4591_s13  ;;  %1596 = vst.msk [vmem:[#allocation3 + $0x20] sm:$0xff] %vm1591_vm7, %v1504_v53  ;;  %v1825_v45 = vld [vmem:[#allocation2 + $0x92] sm:$0xff] }
 0x25b   : > { %1702 = vrot.lane.b32.xlu1 %v1631_v35, %s4591_s13  ;;  %2469 = vst.msk [vmem:[#allocation2 + $0x90] sm:$0xff] %vm312_vm0, %v7138_v3 }
 0x25c   : > { %v1500_v28 = vpop.permute.xlu0 %1499 }
 0x25d   : > { %1594 = vst.msk [vmem:[#allocation3 + $0x10] sm:$0xff] %vm1591_vm7, %v1500_v28  ;;  %v1360_v41 = vpop.permute.xlu1 %1359 }
 0x25e   : > { %1427 = vst.msk [vmem:[#allocation3 + $0xe8] sm:$0xff] %vm1397_vm6, %v1360_v41 }
 0x25f   : > { %1704 = vrot.lane.b32.xlu2 %v1632_v50, %s4591_s13  ;;  %v1823_v50 = vld [vmem:[#allocation2 + $0x7a] sm:$0xff] }
 0x260   : > { %2466 = vst.msk [vmem:[#allocation2 + $0x78] sm:$0xff] %vm312_vm0, %v7138_v3 }
 0x261   : > { %v1510_v47 = vpop.permute.xlu2 %1509 }
 0x262   : > { %1718 = vrot.lane.b32.xlu0 %v1639_v34, %s4591_s13  ;;  %1599 = vst.msk [vmem:[#allocation3 + $0x38] sm:$0xff] %vm1591_vm7, %v1510_v47  ;;  %v1827_v47 = vld [vmem:[#allocation2 + $0xaa] sm:$0xff] }
 0x263   : > { %1708 = vrot.lane.b32.xlu1 %v1634_v54, %s4591_s13  ;;  %2472 = vst.msk [vmem:[#allocation2 + $0xa8] sm:$0xff] %vm312_vm0, %v7138_v3 }
 0x264   : > { %v1506_v40 = vpop.permute.xlu0 %1505 }
 0x265   : > { %1597 = vst.msk [vmem:[#allocation3 + $0x28] sm:$0xff] %vm1591_vm7, %v1506_v40  ;;  %v1496_v52 = vpop.permute.xlu1 %1495  ;;  %v1828_v40 = vld [vmem:[#allocation2 + $0xb2] sm:$0xff] }
 0x266   : > { %1592 = vst.msk [vmem:[#allocation3] sm:$0xff] %vm1591_vm7, %v1496_v52 }
 0x267   : > { %1710 = vrot.lane.b32.xlu2 %v1635_v57, %s4591_s13  ;;  %2474 = vst.msk [vmem:[#allocation2 + $0xb8] sm:$0x3] %vm315_vm1, %v7138_v3 }
 0x268   : > { %2473 = vst.msk [vmem:[#allocation2 + $0xb0] sm:$0xff] %vm312_vm0, %v7138_v3 }
 0x269   : > { %v1516_v46 = vpop.permute.xlu2 %1515 }
 0x26a   : > { %1724 = vrot.lane.b32.xlu0 %v1642_v25, %s4591_s13  ;;  %1602 = vst.msk [vmem:[#allocation3 + $0x50] sm:$0xff] %vm1591_vm7, %v1516_v46 }
 0x26b   : > { %1714 = vrot.lane.b32.xlu1 %v1637_v31, %s4591_s13  ;;  %v1826_v31 = vld [vmem:[#allocation2 + $0x9a] sm:$0xff] }
 0x26c   : > { %v1512_v56 = vpop.permute.xlu0 %1511  ;;  %2471 = vst.msk [vmem:[#allocation2 + $0xa0] sm:$0x3] %vm315_vm1, %v7138_v3 }
 0x26d   : > { %1600 = vst.msk [vmem:[#allocation3 + $0x40] sm:$0xff] %vm1591_vm7, %v1512_v56  ;;  %v1502_v44 = vpop.permute.xlu1 %1501 }
 0x26e   : > { %1595 = vst.msk [vmem:[#allocation3 + $0x18] sm:$0xff] %vm1591_vm7, %v1502_v44  ;;  %v1830_v44 = vld [vmem:[#allocation2 + $0xca] sm:$0xff] }
 0x26f   : > { %1716 = vrot.lane.b32.xlu2 %v1638_v38, %s4591_s13  ;;  %2470 = vst.msk [vmem:[#allocation2 + $0x98] sm:$0xff] %vm312_vm0, %v7138_v3 }
 0x270   : > { %2477 = vst.msk [vmem:[#allocation2 + $0xd0] sm:$0x3] %vm315_vm1, %v7138_v3 }
 0x271   : > { %v1522_v24 = vpop.permute.xlu2 %1521 }
 0x272   : > { %1730 = vrot.lane.b32.xlu0 %v1645_v5, %s4591_s13  ;;  %1605 = vst.msk [vmem:[#allocation3 + $0x68] sm:$0xff] %vm1591_vm7, %v1522_v24 }
 0x273   : > { %1720 = vrot.lane.b32.xlu1 %v1640_v60, %s4591_s13 }
 0x274   : > { %v1518_v32 = vpop.permute.xlu0 %1517 }
 0x275   : > { %1603 = vst.msk [vmem:[#allocation3 + $0x58] sm:$0xff] %vm1591_vm7, %v1518_v32  ;;  %v1508_v61 = vpop.permute.xlu1 %1507 }
 0x276   : > { %1598 = vst.msk [vmem:[#allocation3 + $0x30] sm:$0xff] %vm1591_vm7, %v1508_v61  ;;  %v1831_v61 = vld [vmem:[#allocation2 + $0xda] sm:$0xff] }
 0x277   : > { %1722 = vrot.lane.b32.xlu2 %v1641_v59, %s4591_s13  ;;  %2478 = vst.msk [vmem:[#allocation2 + $0xd8] sm:$0xff] %vm312_vm0, %v7138_v3 }
 0x279   : > { %v1528_v16 = vpop.permute.xlu2 %1527 }
 0x27a   : > { %1736 = vrot.lane.b32.xlu0 %v1648_v18, %s4591_s13  ;;  %1608 = vst.msk [vmem:[#allocation3 + $0x80] sm:$0xff] %vm1591_vm7, %v1528_v16  ;;  %v2062_v18 = vld [vmem:[%s7018_s1 + $0x10] sm:$0x3] }
 0x27b   : > { %1726 = vrot.lane.b32.xlu1 %v1643_v55, %s4591_s13  ;;  %v2076_v55 = vunpack.c.l.b16 %v2062_v18 }
 0x27c   : > { %v1524_v49 = vpop.permute.xlu0 %1523 }
 0x27d   : > { %1606 = vst.msk [vmem:[#allocation3 + $0x70] sm:$0xff] %vm1591_vm7, %v1524_v49  ;;  %v1514_v14 = vpop.permute.xlu1 %1513  ;;  %v2079_v49 = vpack.c.b16 %v2076_v55, %v2076_v55 }
 0x27e   : > { %1601 = vst.msk [vmem:[#allocation3 + $0x48] sm:$0xff] %vm1591_vm7, %v1514_v14 }
 0x27f   : > { %1728 = vrot.lane.b32.xlu2 %v1644_v63, %s4591_s13  ;;  %v2133_v63 = vsel %vm2131_vm9, %v2079_v49, 0 }
 0x280   : > { %2140 = vmatpush.bf16.msra.mxu0 %v2133_v63  ;;  %4549 = vmatpush.bf16.msra.mxu3 %v2133_v63 }
 0x281   : > { %v1534_v30 = vpop.permute.xlu2 %1533 }
 0x282   : > { %1742 = vrot.lane.b32.xlu0 %v1651_v11, %s4591_s13  ;;  %1611 = vst.msk [vmem:[#allocation3 + $0x98] sm:$0xff] %vm1591_vm7, %v1534_v30  ;;  %v4546_v11 = vld [vmem:[%s7018_s1 + $0x8] sm:$0xff]  ;;  %v4545_v30 = vld [vmem:[%s7018_s1] sm:$0xff] }
 0x283   : > { %1732 = vrot.lane.b32.xlu1 %v1646_v42, %s4591_s13  ;;  %v1829_v42 = vld [vmem:[#allocation2 + $0xc2] sm:$0xff] }
 0x284   : > { %v1530_v2 = vpop.permute.xlu0 %1529  ;;  %2475 = vst.msk [vmem:[#allocation2 + $0xc0] sm:$0xff] %vm312_vm0, %v7138_v3  ;;  %2141 = vmatpush.bf16.msra.mxu0 %v4546_v11  ;;  %4550 = vmatpush.bf16.msra.mxu3 %v4546_v11 }
 0x285   : > { %1609 = vst.msk [vmem:[#allocation3 + $0x88] sm:$0xff] %vm1591_vm7, %v1530_v2  ;;  %v1520_v7 = vpop.permute.xlu1 %1519 }
 0x286   : > { %1604 = vst.msk [vmem:[#allocation3 + $0x60] sm:$0xff] %vm1591_vm7, %v1520_v7 }
 0x287   : > { %1734 = vrot.lane.b32.xlu2 %v1647_v6, %s4591_s13  ;;  %2476 = vst.msk [vmem:[#allocation2 + $0xc8] sm:$0xff] %vm312_vm0, %v7138_v3 }
 0x288   : > { %2142 = vmatpush.bf16.msra.mxu0 %v4545_v30  ;;  %4551 = vmatpush.bf16.msra.mxu3 %v4545_v30 }
 0x289   : > { %v1540_v17 = vpop.permute.xlu2 %1539 }
 0x28a   : > { %1748 = vrot.lane.b32.xlu0 %v1654_v19, %s4591_s13  ;;  %1614 = vst.msk [vmem:[#allocation3 + $0xb0] sm:$0xff] %vm1591_vm7, %v1540_v17  ;;  %v1834_v19 = vld [vmem:[#allocation2 + $0xfa] sm:$0xff] }
 0x28b   : > { %1738 = vrot.lane.b32.xlu1 %v1649_v48, %s4591_s13  ;;  %2483 = vst.msk [vmem:[#allocation2 + $0x100] sm:$0x3] %vm315_vm1, %v7138_v3 }
 0x28c   : > { %v1536_v10 = vpop.permute.xlu0 %1535 }
 0x28d   : > { %1612 = vst.msk [vmem:[#allocation3 + $0xa0] sm:$0xff] %vm1591_vm7, %v1536_v10  ;;  %v1526_v43 = vpop.permute.xlu1 %1525 }
 0x28e   : > { %1607 = vst.msk [vmem:[#allocation3 + $0x78] sm:$0xff] %vm1591_vm7, %v1526_v43  ;;  %v1832_v43 = vld [vmem:[#allocation2 + $0xe2] sm:$0xff] }
 0x28f   : > { %1740 = vrot.lane.b32.xlu2 %v1650_v12, %s4591_s13  ;;  %v1836_v12 = vld [vmem:[#allocation2 + $0x112] sm:$0xff]  ;;  %2480 = vst.msk [vmem:[#allocation2 + $0xe8] sm:$0x3] %vm315_vm1, %v7138_v3 }
 0x290   : > { %2486 = vst.msk [vmem:[#allocation2 + $0x118] sm:$0x3] %vm315_vm1, %v7138_v3 }
 0x291   : > { %v1546_v27 = vpop.permute.xlu2 %1545  ;;  %2479 = vst.msk [vmem:[#allocation2 + $0xe0] sm:$0xff] %vm312_vm0, %v7138_v3 }
 0x292   : > { %1883 = vrot.lane.b32.xlu0 %v1818_v51, %s4592_s14  ;;  %1617 = vst.msk [vmem:[#allocation3 + $0xc8] sm:$0xff] %vm1591_vm7, %v1546_v27 }
 0x293   : > { %1744 = vrot.lane.b32.xlu1 %v5405_v62, %s4591_s13 }
 0x294   : > { %v1542_v9 = vpop.permute.xlu0 %1541 }
 0x295   : > { %1615 = vst.msk [vmem:[#allocation3 + $0xb8] sm:$0xff] %vm1591_vm7, %v1542_v9  ;;  %v1532_v26 = vpop.permute.xlu1 %1531 }
 0x296   : > { %1610 = vst.msk [vmem:[#allocation3 + $0x90] sm:$0xff] %vm1591_vm7, %v1532_v26  ;;  %v1842_v26 = vld [vmem:[#allocation2 + $0x15a] sm:$0xff] }
 0x297   : > { %1746 = vrot.lane.b32.xlu2 %v5427_v1, %s4591_s13  ;;  %v1824_v1 = vld [vmem:[#allocation2 + $0x82] sm:$0xff]  ;;  %2495 = vst.msk [vmem:[#allocation2 + $0x160] sm:$0x3] %vm315_vm1, %v7138_v3 }
 0x298   : > { %2468 = vst.msk [vmem:[#allocation2 + $0x88] sm:$0x3] %vm315_vm1, %v7138_v3 }
 0x299   : > { %v1552_v58 = vpop.permute.xlu2 %1551  ;;  %2467 = vst.msk [vmem:[#allocation2 + $0x80] sm:$0xff] %vm312_vm0, %v7138_v3 }
 0x29a   : > { %1620 = vst.msk [vmem:[#allocation3 + $0xe0] sm:$0xff] %vm1591_vm7, %v1552_v58  ;;  %1889 = vrot.lane.b32.xlu0 %v1821_v0, %s4592_s14 }
 0x29b   : > { %1750 = vrot.lane.b32.xlu1 %v1655_v23, %s4591_s13  ;;  %v1835_v23 = vld [vmem:[#allocation2 + $0x10a] sm:$0xff] }
 0x29c   : > { %v1548_v62 = vpop.permute.xlu0 %1547  ;;  %2484 = vst.msk [vmem:[#allocation2 + $0x108] sm:$0xff] %vm312_vm0, %v7138_v3 }
 0x29d   : > { %1618 = vst.msk [vmem:[#allocation3 + $0xd0] sm:$0xff] %vm1591_vm7, %v1548_v62  ;;  %v1538_v33 = vpop.permute.xlu1 %1537 }
 0x29e   : > { %1613 = vst.msk [vmem:[#allocation3 + $0xa8] sm:$0xff] %vm1591_vm7, %v1538_v33 }
 0x29f   : > { %1881 = vrot.lane.b32.xlu2 %v1817_v21, %s4592_s14  ;;  %v1833_v21 = vld [vmem:[#allocation2 + $0xf2] sm:$0xff]  ;;  %2485 = vst.msk [vmem:[#allocation2 + $0x110] sm:$0xff] %vm312_vm0, %v7138_v3 }
 0x2a0   : > { %2481 = vst.msk [vmem:[#allocation2 + $0xf0] sm:$0xff] %vm312_vm0, %v7138_v3 }
 0x2a1   : > { %v1558_v20 = vpop.permute.xlu2 %1557  ;;  %2482 = vst.msk [vmem:[#allocation2 + $0xf8] sm:$0xff] %vm312_vm0, %v7138_v3 }
 0x2a2   : > { %1623 = vst.msk [vmem:[#allocation3 + $0xf8] sm:$0xff] %vm1591_vm7, %v1558_v20  ;;  %1895 = vrot.lane.b32.xlu0 %v1824_v1, %s4592_s14  ;;  %v1840_v1 = vld [vmem:[#allocation2 + $0x142] sm:$0xff] }
 0x2a3   : > { %1885 = vrot.lane.b32.xlu1 %v1819_v36, %s4592_s14  ;;  %2492 = vst.msk [vmem:[#allocation2 + $0x148] sm:$0x3] %vm315_vm1, %v7138_v3 }
 0x2a4   : > { %v1554_v39 = vpop.permute.xlu0 %1553 }
 0x2a5   : > { %1621 = vst.msk [vmem:[#allocation3 + $0xe8] sm:$0xff] %vm1591_vm7, %v1554_v39  ;;  %v1544_v13 = vpop.permute.xlu1 %1543 }
 0x2a6   : > { %1616 = vst.msk [vmem:[#allocation3 + $0xc0] sm:$0xff] %vm1591_vm7, %v1544_v13 }
 0x2a7   : > { %1887 = vrot.lane.b32.xlu2 %v1820_v4, %s4592_s14  ;;  %v1837_v4 = vld [vmem:[#allocation2 + $0x122] sm:$0xff] }
 0x2a8   : > { %2487 = vst.msk [vmem:[#allocation2 + $0x120] sm:$0xff] %vm312_vm0, %v7138_v3 }
 0x2a9   : > { %v1693_v8 = vpop.permute.xlu2 %1692 }
 0x2aa   : > { %1787 = vst.msk [vmem:[#allocation3 + $0x10] sm:$0xff] %vm1784_vm8, %v1693_v8  ;;  %1901 = vrot.lane.b32.xlu0 %v1827_v47, %s4592_s14  ;;  %v1846_v47 = vld [vmem:[#allocation2 + $0x18a] sm:$0xff] }
 0x2ab   : > { %1891 = vrot.lane.b32.xlu1 %v1822_v37, %s4592_s14  ;;  %v1839_v37 = vld [vmem:[#allocation2 + $0x13a] sm:$0xff]  ;;  %2501 = vst.msk [vmem:[#allocation2 + $0x190] sm:$0x3] %vm315_vm1, %v7138_v3 }
 0x2ac   : > { %v1689_v29 = vpop.permute.xlu0 %1688  ;;  %2490 = vst.msk [vmem:[#allocation2 + $0x138] sm:$0xff] %vm312_vm0, %v7138_v3 }
 0x2ad   : > { %1785 = vst.msk [vmem:[#allocation3] sm:$0xff] %vm1784_vm8, %v1689_v29  ;;  %v1550_v22 = vpop.permute.xlu1 %1549 }
 0x2ae   : > { %1619 = vst.msk [vmem:[#allocation3 + $0xd8] sm:$0xff] %vm1591_vm7, %v1550_v22  ;;  %v1838_v22 = vld [vmem:[#allocation2 + $0x12a] sm:$0xff] }
 0x2af   : > { %1893 = vrot.lane.b32.xlu2 %v1823_v50, %s4592_s14  ;;  %2491 = vst.msk [vmem:[#allocation2 + $0x140] sm:$0xff] %vm312_vm0, %v7138_v3 }
 0x2b0   : > { %2489 = vst.msk [vmem:[#allocation2 + $0x130] sm:$0x3] %vm315_vm1, %v7138_v3 }
 0x2b1   : > { %v1699_v35 = vpop.permute.xlu2 %1698  ;;  %2488 = vst.msk [vmem:[#allocation2 + $0x128] sm:$0xff] %vm312_vm0, %v7138_v3 }
 0x2b2   : > { %1790 = vst.msk [vmem:[#allocation3 + $0x28] sm:$0xff] %vm1784_vm8, %v1699_v35  ;;  %1907 = vrot.lane.b32.xlu0 %v1830_v44, %s4592_s14 }
 0x2b3   : > { %1897 = vrot.lane.b32.xlu1 %v1825_v45, %s4592_s14  ;;  %v1843_v45 = vld [vmem:[#allocation2 + $0x16a] sm:$0xff]  ;;  %2500 = vst.msk [vmem:[#allocation2 + $0x188] sm:$0xff] %vm312_vm0, %v7138_v3 }
 0x2b4   : > { %v1695_v53 = vpop.permute.xlu0 %1694  ;;  %2496 = vst.msk [vmem:[#allocation2 + $0x168] sm:$0xff] %vm312_vm0, %v7138_v3 }
 0x2b5   : > { %1788 = vst.msk [vmem:[#allocation3 + $0x18] sm:$0xff] %vm1784_vm8, %v1695_v53  ;;  %v1556_v28 = vpop.permute.xlu1 %1555 }
 0x2b6   : > { %1622 = vst.msk [vmem:[#allocation3 + $0xf0] sm:$0xff] %vm1591_vm7, %v1556_v28  ;;  %v1841_v28 = vld [vmem:[#allocation2 + $0x152] sm:$0xff] }
 0x2b7   : > { %1899 = vrot.lane.b32.xlu2 %v1826_v31, %s4592_s14  ;;  %2493 = vst.msk [vmem:[#allocation2 + $0x150] sm:$0xff] %vm312_vm0, %v7138_v3 }
 0x2b8   : > { %2494 = vst.msk [vmem:[#allocation2 + $0x158] sm:$0xff] %vm312_vm0, %v7138_v3 }
 0x2b9   : > { %v1705_v41 = vpop.permute.xlu2 %1704 }
 0x2ba   : > { %1793 = vst.msk [vmem:[#allocation3 + $0x40] sm:$0xff] %vm1784_vm8, %v1705_v41  ;;  %1913 = vrot.lane.b32.xlu0 %v1833_v21, %s4592_s14 }
 0x2bb   : > { %1903 = vrot.lane.b32.xlu1 %v1828_v40, %s4592_s14  ;;  %v1844_v40 = vld [vmem:[#allocation2 + $0x172] sm:$0xff] }
 0x2bc   : > { %v1701_v34 = vpop.permute.xlu0 %1700  ;;  %2498 = vst.msk [vmem:[#allocation2 + $0x178] sm:$0x3] %vm315_vm1, %v7138_v3 }
 0x2bd   : > { %1791 = vst.msk [vmem:[#allocation3 + $0x30] sm:$0xff] %vm1784_vm8, %v1701_v34  ;;  %v1691_v54 = vpop.permute.xlu1 %1690 }
 0x2be   : > { %1786 = vst.msk [vmem:[#allocation3 + $0x8] sm:$0xff] %vm1784_vm8, %v1691_v54 }
 0x2bf   : > { %1905 = vrot.lane.b32.xlu2 %v1829_v42, %s4592_s14  ;;  %2497 = vst.msk [vmem:[#allocation2 + $0x170] sm:$0xff] %vm312_vm0, %v7138_v3 }
 0x2c1   : > { %v1711_v57 = vpop.permute.xlu2 %1710 }
 0x2c2   : > { %1796 = vst.msk [vmem:[#allocation3 + $0x58] sm:$0xff] %vm1784_vm8, %v1711_v57  ;;  %1919 = vrot.lane.b32.xlu0 %v1836_v12, %s4592_s14 }
 0x2c3   : > { %1909 = vrot.lane.b32.xlu1 %v1831_v61, %s4592_s14 }
 0x2c4   : > { %v1707_v52 = vpop.permute.xlu0 %1706 }
 0x2c5   : > { %1794 = vst.msk [vmem:[#allocation3 + $0x48] sm:$0xff] %vm1784_vm8, %v1707_v52  ;;  %v1697_v25 = vpop.permute.xlu1 %1696 }
 0x2c6   : > { %1789 = vst.msk [vmem:[#allocation3 + $0x20] sm:$0xff] %vm1784_vm8, %v1697_v25 }
 0x2c7   : > { %1911 = vrot.lane.b32.xlu2 %v1832_v43, %s4592_s14 }
 0x2c9   : > { %v1717_v46 = vpop.permute.xlu2 %1716 }
 0x2ca   : > { %1799 = vst.msk [vmem:[#allocation3 + $0x70] sm:$0xff] %vm1784_vm8, %v1717_v46  ;;  %1925 = vrot.lane.b32.xlu0 %v1839_v37, %s4592_s14 }
 0x2cb   : > { %1915 = vrot.lane.b32.xlu1 %v1834_v19, %s4592_s14  ;;  %v2272_v19 = vld [vmem:[%s7020_s3] sm:$0xf] }
 0x2cc   : > { %v1713_v56 = vpop.permute.xlu0 %1712 }
 0x2cd   : > { %1797 = vst.msk [vmem:[#allocation3 + $0x60] sm:$0xff] %vm1784_vm8, %v1713_v56  ;;  %v1703_v38 = vpop.permute.xlu1 %1702 }
 0x2ce   : > { %1792 = vst.msk [vmem:[#allocation3 + $0x38] sm:$0xff] %vm1784_vm8, %v1703_v38 }
 0x2cf   : > { %1917 = vrot.lane.b32.xlu2 %v1835_v23, %s4592_s14 }
 0x2d1   : > { %v1723_v51 = vpop.permute.xlu2 %1722 }
 0x2d2   : > { %1802 = vst.msk [vmem:[#allocation3 + $0x88] sm:$0xff] %vm1784_vm8, %v1723_v51  ;;  %1931 = vrot.lane.b32.xlu0 %v1842_v26, %s4592_s14 }
 0x2d3   : > { %1921 = vrot.lane.b32.xlu1 %v1837_v4, %s4592_s14 }
 0x2d4   : > { %v1719_v5 = vpop.permute.xlu0 %1718 }
 0x2d5   : > { %1800 = vst.msk [vmem:[#allocation3 + $0x78] sm:$0xff] %vm1784_vm8, %v1719_v5  ;;  %v1709_v60 = vpop.permute.xlu1 %1708 }
 0x2d6   : > { %1795 = vst.msk [vmem:[#allocation3 + $0x50] sm:$0xff] %vm1784_vm8, %v1709_v60 }
 0x2d7   : > { %1923 = vrot.lane.b32.xlu2 %v1838_v22, %s4592_s14 }
 0x2d9   : > { %v1729_v24 = vpop.permute.xlu2 %1728 }
 0x2da   : > { %1805 = vst.msk [vmem:[#allocation3 + $0xa0] sm:$0xff] %vm1784_vm8, %v1729_v24  ;;  %1937 = vrot.lane.b32.xlu0 %v5504_v15, %s4592_s14 }
 0x2db   : > { %1927 = vrot.lane.b32.xlu1 %v1840_v1, %s4592_s14 }
 0x2dc   : > { %v1725_v32 = vpop.permute.xlu0 %1724 }
 0x2dd   : > { %1803 = vst.msk [vmem:[#allocation3 + $0x90] sm:$0xff] %vm1784_vm8, %v1725_v32  ;;  %v1715_v59 = vpop.permute.xlu1 %1714 }
 0x2de   : > { %1798 = vst.msk [vmem:[#allocation3 + $0x68] sm:$0xff] %vm1784_vm8, %v1715_v59 }
 0x2df   : > { %1929 = vrot.lane.b32.xlu2 %v1841_v28, %s4592_s14  ;;  %v1848_v28 = vld [vmem:[#allocation2 + $0x1a2] sm:$0xff] }
 0x2e0   : > { %2504 = vst.msk [vmem:[#allocation2 + $0x1a8] sm:$0x3] %vm315_vm1, %v7138_v3 }
 0x2e1   : > { %v1735_v16 = vpop.permute.xlu2 %1734 }
 0x2e2   : > { %1808 = vst.msk [vmem:[#allocation3 + $0xb8] sm:$0xff] %vm1784_vm8, %v1735_v16  ;;  %1943 = vrot.lane.b32.xlu0 %v1848_v28, %s4592_s14 }
 0x2e3   : > { %1933 = vrot.lane.b32.xlu1 %v1843_v45, %s4592_s14 }
 0x2e4   : > { %v1731_v14 = vpop.permute.xlu0 %1730 }
 0x2e5   : > { %1806 = vst.msk [vmem:[#allocation3 + $0xa8] sm:$0xff] %vm1784_vm8, %v1731_v14  ;;  %v1721_v36 = vpop.permute.xlu1 %1720 }
 0x2e6   : > { %1801 = vst.msk [vmem:[#allocation3 + $0x80] sm:$0xff] %vm1784_vm8, %v1721_v36 }
 0x2e7   : > { %1935 = vrot.lane.b32.xlu2 %v1844_v40, %s4592_s14 }
 0x2e9   : > { %v1741_v2 = vpop.permute.xlu2 %1740 }
 0x2ea   : > { %1811 = vst.msk [vmem:[#allocation3 + $0xd0] sm:$0xff] %vm1784_vm8, %v1741_v2 }
 0x2eb   : > { %1939 = vrot.lane.b32.xlu1 %v1846_v47, %s4592_s14 }
 0x2ec   : > { %v1737_v6 = vpop.permute.xlu0 %1736 }
 0x2ed   : > { %1809 = vst.msk [vmem:[#allocation3 + $0xc0] sm:$0xff] %vm1784_vm8, %v1737_v6  ;;  %v1727_v7 = vpop.permute.xlu1 %1726 }
 0x2ee   : > { %1804 = vst.msk [vmem:[#allocation3 + $0x98] sm:$0xff] %vm1784_vm8, %v1727_v7 }
 0x2f1   : > { %v1747_v48 = vpop.permute.xlu2 %1746 }
 0x2f2   : > { %1814 = vst.msk [vmem:[#allocation3 + $0xe8] sm:$0xff] %vm1784_vm8, %v1747_v48  ;;  %v2328_v48 = vsel %vm2326_vm12, %v2272_v19, 0 }
 0x2f3   : > { %2337 = vmatpush.bf16.msra.mxu1 %v2328_v48  ;;  %4552 = vmatpush.bf16.msrb.mxu3 %v2328_v48 }
 0x2f4   : > { %v1743_v17 = vpop.permute.xlu0 %1742 }
 0x2f5   : > { %1812 = vst.msk [vmem:[#allocation3 + $0xd8] sm:$0xff] %vm1784_vm8, %v1743_v17  ;;  %v1733_v10 = vpop.permute.xlu1 %1732 }
 0x2f6   : > { %1807 = vst.msk [vmem:[#allocation3 + $0xb0] sm:$0xff] %vm1784_vm8, %v1733_v10 }
 0x2f9   : > { %v1882_v0 = vpop.permute.xlu2 %1881 }
 0x2fa   : > { %1978 = vst.msk [vmem:[#allocation3] sm:$0xff] %vm1977_vm10, %v1882_v0 }
 0x2fc   : > { %v1749_v27 = vpop.permute.xlu0 %1748 }
 0x2fd   : > { %1815 = vst.msk [vmem:[#allocation3 + $0xf0] sm:$0xff] %vm1784_vm8, %v1749_v27  ;;  %v1739_v9 = vpop.permute.xlu1 %1738 }
 0x2fe   : > { %1810 = vst.msk [vmem:[#allocation3 + $0xc8] sm:$0xff] %vm1784_vm8, %v1739_v9 }
 0x301   : > { %v1888_v58 = vpop.permute.xlu2 %1887  ;;  %v2010_v20 = vld [vmem:[#allocation3] sm:$0xff] }
 0x302   : > { %1981 = vst.msk [vmem:[#allocation3 + $0x18] sm:$0xff] %vm1977_vm10, %v1888_v58 }
 0x304   : > { %v1884_v62 = vpop.permute.xlu0 %1883 }
 0x305   : > { %1979 = vst.msk [vmem:[#allocation3 + $0x8] sm:$0xff] %vm1977_vm10, %v1884_v62  ;;  %v1745_v33 = vpop.permute.xlu1 %1744 }
 0x306   : > { %1813 = vst.msk [vmem:[#allocation3 + $0xe0] sm:$0xff] %vm1784_vm8, %v1745_v33 }
 0x309   : > { %v1894_v35 = vpop.permute.xlu2 %1893  ;;  %v2013_v50 = vld [vmem:[#allocation3 + $0x18] sm:$0xff] }
 0x30a   : > { %1984 = vst.msk [vmem:[#allocation3 + $0x30] sm:$0xff] %vm1977_vm10, %v1894_v35 }
 0x30c   : > { %v2011_v39 = vld [vmem:[#allocation3 + $0x8] sm:$0xff]  ;;  %v1890_v13 = vpop.permute.xlu0 %1889 }
 0x30d   : > { %v1751_v8 = vpop.permute.xlu1 %1750  ;;  %v2042_v29 = vpack.c.bf16 %v2011_v39, %v2010_v20  ;;  %1982 = vst.msk [vmem:[#allocation3 + $0x20] sm:$0xff] %vm1977_vm10, %v1890_v13  ;;  %v5889_v39 = vld [vmem:[%s7019_s2] ss:$0 sm:$0xff] }
 0x30e   : > { %1816 = vst.msk [vmem:[#allocation3 + $0xf8] sm:$0xff] %vm1784_vm8, %v1751_v8 }
 0x30f   : > { %4485 = vmatmul.msk.bf16.vlgmr.msra.gmra.mxu0 %vm2082_vm11, %v2042_v29 }
 0x311   : > { %v1900_v57 = vpop.permute.xlu2 %1899  ;;  %v2016_v44 = vld [vmem:[#allocation3 + $0x30] sm:$0xff] }
 0x312   : > { %1987 = vst.msk [vmem:[#allocation3 + $0x48] sm:$0xff] %vm1977_vm10, %v1900_v57 }
 0x314   : > { %v1896_v53 = vpop.permute.xlu0 %1895  ;;  %v2014_v25 = vld [vmem:[#allocation3 + $0x20] sm:$0xff] }
 0x315   : > { %v1886_v15 = vpop.permute.xlu1 %1885  ;;  %1985 = vst.msk [vmem:[#allocation3 + $0x38] sm:$0xff] %vm1977_vm10, %v1896_v53 }
 0x316   : > { %1980 = vst.msk [vmem:[#allocation3 + $0x10] sm:$0xff] %vm1977_vm10, %v1886_v15 }
 0x319   : > { %v1906_v24 = vpop.permute.xlu2 %1905  ;;  %v2019_v59 = vld [vmem:[#allocation3 + $0x48] sm:$0xff] }
 0x31a   : > { %1990 = vst.msk [vmem:[#allocation3 + $0x60] sm:$0xff] %vm1977_vm10, %v1906_v24 }
 0x31c   : > { %v1902_v56 = vpop.permute.xlu0 %1901  ;;  %v2017_v51 = vld [vmem:[#allocation3 + $0x38] sm:$0xff] }
 0x31d   : > { %v2012_v41 = vld [vmem:[#allocation3 + $0x10] sm:$0xff]  ;;  %v1892_v34 = vpop.permute.xlu1 %1891  ;;  %1988 = vst.msk [vmem:[#allocation3 + $0x50] sm:$0xff] %vm1977_vm10, %v1902_v56  ;;  %v2045_v5 = vpack.c.bf16 %v2017_v51, %v2016_v44 }
 0x31e   : > { %v2043_v54 = vpack.c.bf16 %v2013_v50, %v2012_v41  ;;  %1983 = vst.msk [vmem:[#allocation3 + $0x28] sm:$0xff] %vm1977_vm10, %v1892_v34 }
 0x320   : > { %4486 = vmatmul.msk.bf16.gmra.mxu0 %vm2082_vm11, %v2043_v54 }
 0x321   : > { %v1912_v18 = vpop.permute.xlu2 %1911  ;;  %v2022_v42 = vld [vmem:[#allocation3 + $0x60] sm:$0xff] }
 0x322   : > { %1993 = vst.msk [vmem:[#allocation3 + $0x78] sm:$0xff] %vm1977_vm10, %v1912_v18 }
 0x324   : > { %v1908_v60 = vpop.permute.xlu0 %1907  ;;  %v2020_v16 = vld [vmem:[#allocation3 + $0x50] sm:$0xff] }
 0x325   : > { %v1898_v52 = vpop.permute.xlu1 %1897  ;;  %v2015_v31 = vld [vmem:[#allocation3 + $0x28] sm:$0xff]  ;;  %1991 = vst.msk [vmem:[#allocation3 + $0x68] sm:$0xff] %vm1977_vm10, %v1908_v60 }
 0x326   : > { %1986 = vst.msk [vmem:[#allocation3 + $0x40] sm:$0xff] %vm1977_vm10, %v1898_v52  ;;  %v2044_v46 = vpack.c.bf16 %v2015_v31, %v2014_v25 }
 0x329   : > { %v1918_v14 = vpop.permute.xlu2 %1917  ;;  %v2025_v10 = vld [vmem:[#allocation3 + $0x78] sm:$0xff] }
 0x32a   : > { %1996 = vst.msk [vmem:[#allocation3 + $0x90] sm:$0xff] %vm1977_vm10, %v1918_v14 }
 0x32c   : > { %v1914_v36 = vpop.permute.xlu0 %1913  ;;  %v2023_v30 = vld [vmem:[#allocation3 + $0x68] sm:$0xff] }
 0x32d   : > { %v1904_v38 = vpop.permute.xlu1 %1903  ;;  %v2018_v32 = vld [vmem:[#allocation3 + $0x40] sm:$0xff]  ;;  %1994 = vst.msk [vmem:[#allocation3 + $0x80] sm:$0xff] %vm1977_vm10, %v1914_v36  ;;  %v2048_v6 = vpack.c.bf16 %v2023_v30, %v2022_v42 }
 0x32e   : > { %1989 = vst.msk [vmem:[#allocation3 + $0x58] sm:$0xff] %vm1977_vm10, %v1904_v38  ;;  %v2046_v61 = vpack.c.bf16 %v2019_v59, %v2018_v32 }
 0x330   : > { %4487 = vmatmul.msk.bf16.gmra.mxu0 %vm2082_vm11, %v2044_v46 }
 0x331   : > { %v1924_v7 = vpop.permute.xlu2 %1923  ;;  %v2028_v41 = vld [vmem:[#allocation3 + $0x90] sm:$0xff] }
 0x332   : > { %1999 = vst.msk [vmem:[#allocation3 + $0xa8] sm:$0xff] %vm1977_vm10, %v1924_v7 }
 0x334   : > { %v1920_v2 = vpop.permute.xlu0 %1919  ;;  %v2026_v23 = vld [vmem:[#allocation3 + $0x80] sm:$0xff] }
 0x335   : > { %v1910_v55 = vpop.permute.xlu1 %1909  ;;  %v2021_v49 = vld [vmem:[#allocation3 + $0x58] sm:$0xff]  ;;  %1997 = vst.msk [vmem:[#allocation3 + $0x98] sm:$0xff] %vm1977_vm10, %v1920_v2 }
 0x336   : > { %1992 = vst.msk [vmem:[#allocation3 + $0x70] sm:$0xff] %vm1977_vm10, %v1910_v55  ;;  %v2047_v63 = vpack.c.bf16 %v2021_v49, %v2020_v16 }
 0x339   : > { %v1930_v43 = vpop.permute.xlu2 %1929  ;;  %v2031_v24 = vld [vmem:[#allocation3 + $0xa8] sm:$0xff] }
 0x33a   : > { %2002 = vst.msk [vmem:[#allocation3 + $0xc0] sm:$0xff] %vm1977_vm10, %v1930_v43 }
 0x33c   : > { %v1926_v21 = vpop.permute.xlu0 %1925  ;;  %v2029_v34 = vld [vmem:[#allocation3 + $0x98] sm:$0xff] }
 0x33d   : > { %v1916_v11 = vpop.permute.xlu1 %1915  ;;  %2000 = vst.msk [vmem:[#allocation3 + $0xb0] sm:$0xff] %vm1977_vm10, %v1926_v21  ;;  %v2024_v17 = vld [vmem:[#allocation3 + $0x70] sm:$0xff]  ;;  %v2051_v40 = vpack.c.bf16 %v2029_v34, %v2028_v41 }
 0x33e   : > { %1995 = vst.msk [vmem:[#allocation3 + $0x88] sm:$0xff] %vm1977_vm10, %v1916_v11  ;;  %v2049_v37 = vpack.c.bf16 %v2025_v10, %v2024_v17 }
 0x340   : > { %4488 = vmatmul.msk.bf16.gmra.mxu0 %vm2082_vm11, %v2045_v5 }
 0x341   : > { %v2034_v26 = vld [vmem:[#allocation3 + $0xc0] sm:$0xff]  ;;  %v1936_v62 = vpop.permute.xlu2 %1935 }
 0x342   : > { %2005 = vst.msk [vmem:[#allocation3 + $0xd8] sm:$0xff] %vm1977_vm10, %v1936_v62 }
 0x344   : > { %v1932_v12 = vpop.permute.xlu0 %1931  ;;  %v2032_v36 = vld [vmem:[#allocation3 + $0xb0] sm:$0xff] }
 0x345   : > { %2003 = vst.msk [vmem:[#allocation3 + $0xc8] sm:$0xff] %vm1977_vm10, %v1932_v12  ;;  %v1922_v0 = vpop.permute.xlu1 %1921  ;;  %v2027_v58 = vld [vmem:[#allocation3 + $0x88] sm:$0xff] }
 0x346   : > { %1998 = vst.msk [vmem:[#allocation3 + $0xa0] sm:$0xff] %vm1977_vm10, %v1922_v0  ;;  %v2050_v20 = vpack.c.bf16 %v2027_v58, %v2026_v23 }
 0x349   : > { %v2037_v13 = vld [vmem:[#allocation3 + $0xd8] sm:$0xff] }
 0x34c   : > { %v2035_v27 = vld [vmem:[#allocation3 + $0xc8] sm:$0xff]  ;;  %v1938_v54 = vpop.permute.xlu0 %1937 }
 0x34d   : > { %v1928_v9 = vpop.permute.xlu1 %1927  ;;  %v2054_v4 = vpack.c.bf16 %v2035_v27, %v2034_v26  ;;  %2006 = vst.msk [vmem:[#allocation3 + $0xe0] sm:$0xff] %vm1977_vm10, %v1938_v54  ;;  %v2030_v60 = vld [vmem:[#allocation3 + $0xa0] sm:$0xff] }
 0x34e   : > { %2001 = vst.msk [vmem:[#allocation3 + $0xb8] sm:$0xff] %vm1977_vm10, %v1928_v9  ;;  %v2052_v59 = vpack.c.bf16 %v2031_v24, %v2030_v60  ;;  %v5941_v24 = vld [vmem:[%s7021_s4] ss:$0 sm:$0xff] }
 0x34f   : > { %4497 = vmatmul.msk.bf16.vlgmr.msra.gmra.mxu3 %vm2082_vm11, %v2054_v4 }
 0x350   : > { %4489 = vmatmul.msk.bf16.gmra.mxu0 %vm2082_vm11, %v2046_v61  ;;  %v1847_v61 = vld [vmem:[#allocation2 + $0x19a] sm:$0xff] }
 0x351   : > { %2502 = vst.msk [vmem:[#allocation2 + $0x198] sm:$0xff] %vm312_vm0, %v7138_v3  ;;  %1941 = vrot.lane.b32.xlu2 %v1847_v61, %s4592_s14 }
 0x352   : > { %2503 = vst.msk [vmem:[#allocation2 + $0x1a0] sm:$0xff] %vm312_vm0, %v7138_v3 }
 0x354   : > { %v2038_v52 = vld [vmem:[#allocation3 + $0xe0] sm:$0xff] }
 0x355   : > { %v1934_v33 = vpop.permute.xlu1 %1933  ;;  %v2033_v11 = vld [vmem:[#allocation3 + $0xb8] sm:$0xff] }
 0x356   : > { %2004 = vst.msk [vmem:[#allocation3 + $0xd0] sm:$0xff] %vm1977_vm10, %v1934_v33  ;;  %v2053_v30 = vpack.c.bf16 %v2033_v11, %v2032_v36 }
 0x35d   : > { %v2036_v8 = vld [vmem:[#allocation3 + $0xd0] sm:$0xff]  ;;  %v1940_v47 = vpop.permute.xlu1 %1939 }
 0x35e   : > { %v2055_v22 = vpack.c.bf16 %v2037_v13, %v2036_v8  ;;  %2007 = vst.msk [vmem:[#allocation3 + $0xe8] sm:$0xff] %vm1977_vm10, %v1940_v47  ;;  %v1944_v47 = vpop.permute.xlu0 %1943 }
 0x35f   : > { %2009 = vst.msk [vmem:[#allocation3 + $0xf8] sm:$0xff] %vm1977_vm10, %v1944_v47 }
 0x360   : > { %4490 = vmatmul.msk.bf16.gmra.mxu0 %vm2082_vm11, %v2047_v63  ;;  %4498 = vmatmul.msk.bf16.gmra.mxu3 %vm2082_vm11, %v2055_v22 }
 0x365   : > { %v2039_v25 = vld [vmem:[#allocation3 + $0xe8] sm:$0xff] }
 0x366   : > { %v2056_v31 = vpack.c.bf16 %v2039_v25, %v2038_v52  ;;  %v2602_v25 = vld [vmem:[#allocation2 + $0x9] sm:$0xff] }
 0x367   : > { %2667 = vrot.lane.b32.xlu2 %v2602_v25, %s4585_s26 }
 0x370   : > { %4491 = vmatmul.msk.bf16.gmra.mxu0 %vm2082_vm11, %v2048_v6  ;;  %4499 = vmatmul.msk.bf16.gmra.mxu3 %vm2082_vm11, %v2056_v31 }
 0x380   : > { %4492 = vmatmul.msk.bf16.gmra.mxu0 %vm2082_vm11, %v2049_v37 }
 0x38c   : > { %v2144_v1 = vpop.f32.mrf.mxu0 }
 0x38d   : > { %v2145_v29 = vadd.f32 %v5889_v39, %v2144_v1 }
 0x38f   : > { %v2224_v53 = vmax.f32 %v2145_v29, 0.0 }
 0x390   : > { %4493 = vmatmul.msk.bf16.gmra.mxu0 %vm2082_vm11, %v2050_v20 }
 0x394   : > { %v2146_v45 = vpop.f32.mrf.mxu0 }
 0x395   : > { %v2147_v35 = vadd.f32 %v5889_v39, %v2146_v45 }
 0x397   : > { %v2225_v15 = vmax.f32 %v2147_v35, 0.0 }
 0x399   : > { %v2256_v50 = vpack.c.bf16 %v2225_v15, %v2224_v53  ;;  %v2601_v15 = vld [vmem:[#allocation2 + $0x1] sm:$0xff] }
 0x39a   : > { %2665 = vrot.lane.b32.xlu1 %v2601_v15, %s4585_s26 }
 0x39b   : > { %4501 = vmatmul.msk.bf16.vlgmr.msra.gmra.mxu1 %vm2277_vm13, %v2256_v50 }
 0x39d   : > { %v2149_v57 = vpop.f32.mrf.mxu0 }
 0x39e   : > { %v2150_v46 = vadd.f32 %v5889_v39, %v2149_v57 }
 0x3a0   : > { %4494 = vmatmul.msk.bf16.gmra.mxu0 %vm2082_vm11, %v2051_v40  ;;  %v2226_v44 = vmax.f32 %v2150_v46, 0.0 }
 0x3a5   : > { %v2151_v56 = vpop.f32.mrf.mxu0 }
 0x3a6   : > { %v2152_v38 = vadd.f32 %v5889_v39, %v2151_v56 }
 0x3a8   : > { %v2227_v51 = vmax.f32 %v2152_v38, 0.0 }
 0x3aa   : > { %v2257_v5 = vpack.c.bf16 %v2227_v51, %v2226_v44  ;;  %v2041_v44 = vld [vmem:[#allocation3 + $0xf8] sm:$0xff] }
 0x3ab   : > { %v1942_v40 = vpop.permute.xlu2 %1941 }
 0x3ac   : > { %4502 = vmatmul.msk.bf16.gmra.mxu1 %vm2277_vm13, %v2257_v5  ;;  %2008 = vst.msk [vmem:[#allocation3 + $0xf0] sm:$0xff] %vm1977_vm10, %v1942_v40 }
 0x3ad   : > { %v2154_v32 = vpop.f32.mrf.mxu0 }
 0x3ae   : > { %v2155_v18 = vadd.f32 %v5889_v39, %v2154_v32 }
 0x3b0   : > { %4495 = vmatmul.msk.bf16.gmra.mxu0 %vm2082_vm11, %v2052_v59  ;;  %v2228_v49 = vmax.f32 %v2155_v18, 0.0 }
 0x3b3   : > { %v2040_v5 = vld [vmem:[#allocation3 + $0xf0] sm:$0xff] }
 0x3b4   : > { %v2057_v59 = vpack.c.bf16 %v2041_v44, %v2040_v5 }
 0x3b5   : > { %v2156_v55 = vpop.f32.mrf.mxu0 }
 0x3b6   : > { %v2157_v16 = vadd.f32 %v5889_v39, %v2156_v55  ;;  %4500 = vmatmul.msk.bf16.gmra.mxu3 %vm2082_vm11, %v2057_v59 }
 0x3b8   : > { %v2229_v63 = vmax.f32 %v2157_v16, 0.0 }
 0x3ba   : > { %v2258_v14 = vpack.c.bf16 %v2229_v63, %v2228_v49 }
 0x3bc   : > { %4503 = vmatmul.msk.bf16.gmra.mxu1 %vm2277_vm13, %v2258_v14 }
 0x3bd   : > { %v2159_v42 = vpop.f32.mrf.mxu0 }
 0x3be   : > { %v2160_v2 = vadd.f32 %v5889_v39, %v2159_v42 }
 0x3c0   : > { %4496 = vmatmul.msk.bf16.gmra.mxu0 %vm2082_vm11, %v2053_v30  ;;  %v2230_v7 = vmax.f32 %v2160_v2, 0.0 }
 0x3c5   : > { %v2161_v6 = vpop.f32.mrf.mxu0 }
 0x3c6   : > { %v2162_v3 = vadd.f32 %v5889_v39, %v2161_v6 }
 0x3c8   : > { %v2231_v21 = vmax.f32 %v2162_v3, 0.0 }
 0x3ca   : > { %v2259_v19 = vpack.c.bf16 %v2231_v21, %v2230_v7 }
 0x3cc   : > { %4504 = vmatmul.msk.bf16.gmra.mxu1 %vm2277_vm13, %v2259_v19 }
 0x3cd   : > { %v2164_v48 = vpop.f32.mrf.mxu0 }
 0x3ce   : > { %v2165_v17 = vadd.f32 %v5889_v39, %v2164_v48 }
 0x3d0   : > { %v2232_v43 = vmax.f32 %v2165_v17, 0.0 }
 0x3d2   : > { %v2204_v34 = vpop.f32.mrf.mxu3 }
 0x3d3   : > { %v2205_v52 = vadd.f32 %v5889_v39, %v2204_v34 }
 0x3d5   : > { %v2166_v10 = vpop.f32.mrf.mxu0  ;;  %v2248_v46 = vmax.f32 %v2205_v52, 0.0 }
 0x3d6   : > { %v2167_v12 = vadd.f32 %v5889_v39, %v2166_v10 }
 0x3d8   : > { %v2233_v0 = vmax.f32 %v2167_v12, 0.0 }
 0x3da   : > { %v2260_v37 = vpack.c.bf16 %v2233_v0, %v2232_v43  ;;  %v2206_v31 = vpop.f32.mrf.mxu3 }
 0x3db   : > { %v2207_v56 = vadd.f32 %v5889_v39, %v2206_v31 }
 0x3dc   : > { %4505 = vmatmul.msk.bf16.gmra.mxu1 %vm2277_vm13, %v2260_v37 }
 0x3dd   : > { %v2169_v27 = vpop.f32.mrf.mxu0  ;;  %v2249_v38 = vmax.f32 %v2207_v56, 0.0 }
 0x3de   : > { %v2170_v9 = vadd.f32 %v5889_v39, %v2169_v27 }
 0x3df   : > { %v5943_v32 = vpack.c.bf16 %v2249_v38, %v2248_v46 }
 0x3e0   : > { %v2234_v23 = vmax.f32 %v2170_v9, 0.0 }
 0x3e3   : > { %v2209_v49 = vpop.f32.mrf.mxu3 }
 0x3e4   : > { %v2210_v42 = vadd.f32 %v5889_v39, %v2209_v49 }
 0x3e5   : > { %v2171_v26 = vpop.f32.mrf.mxu0 }
 0x3e6   : > { %v2172_v4 = vadd.f32 %v5889_v39, %v2171_v26  ;;  %v2250_v3 = vmax.f32 %v2210_v42, 0.0 }
 0x3e8   : > { %v2235_v58 = vmax.f32 %v2172_v4, 0.0 }
 0x3ea   : > { %v2261_v62 = vpack.c.bf16 %v2235_v58, %v2234_v23 }
 0x3eb   : > { %v2211_v2 = vpop.f32.mrf.mxu3 }
 0x3ec   : > { %4506 = vmatmul.msk.bf16.gmra.mxu1 %vm2277_vm13, %v2261_v62  ;;  %v2212_v7 = vadd.f32 %v5889_v39, %v2211_v2 }
 0x3ed   : > { %v2174_v33 = vpop.f32.mrf.mxu0 }
 0x3ee   : > { %v2175_v1 = vadd.f32 %v5889_v39, %v2174_v33  ;;  %v2251_v19 = vmax.f32 %v2212_v7, 0.0 }
 0x3f0   : > { %v2236_v8 = vmax.f32 %v2175_v1, 0.0  ;;  %v2269_v43 = vpack.c.bf16 %v2251_v19, %v2250_v3 }
 0x3f2   : > { %4514 = vmatmul.msk.bf16.vlgmr.msrb.gmra.mxu3 %vm2277_vm13, %v2269_v43 }
 0x3f3   : > { %v2214_v9 = vpop.f32.mrf.mxu3 }
 0x3f5   : > { %v2176_v20 = vpop.f32.mrf.mxu0 }
 0x3f6   : > { %v2177_v13 = vadd.f32 %v5889_v39, %v2176_v20  ;;  %v2215_v20 = vadd.f32 %v5889_v39, %v2214_v9 }
 0x3f8   : > { %v2237_v29 = vmax.f32 %v2177_v13, 0.0 }
 0x3fa   : > { %v2262_v22 = vpack.c.bf16 %v2237_v29, %v2236_v8  ;;  %v2252_v29 = vmax.f32 %v2215_v20, 0.0 }
 0x3fb   : > { %v2216_v13 = vpop.f32.mrf.mxu3 }
 0x3fc   : > { %4507 = vmatmul.msk.bf16.gmra.mxu1 %vm2277_vm13, %v2262_v22  ;;  %v2217_v22 = vadd.f32 %v5889_v39, %v2216_v13 }
 0x3fd   : > { %v2179_v45 = vpop.f32.mrf.mxu0 }
 0x3fe   : > { %v2180_v35 = vadd.f32 %v5889_v39, %v2179_v45 }
 0x400   : > { %v2238_v50 = vmax.f32 %v2180_v35, 0.0  ;;  %v2253_v35 = vmax.f32 %v2217_v22, 0.0 }
 0x405   : > { %v2181_v53 = vpop.f32.mrf.mxu0 }
 0x406   : > { %v2182_v28 = vadd.f32 %v5889_v39, %v2181_v53 }
 0x408   : > { %v2239_v41 = vmax.f32 %v2182_v28, 0.0 }
 0x40a   : > { %v2263_v54 = vpack.c.bf16 %v2239_v41, %v2238_v50  ;;  %v2270_v41 = vpack.c.bf16 %v2253_v35, %v2252_v29  ;;  %v2537_v35 = vld [vmem:[#allocation2] sm:$0xff] }
 0x40b   : > { %2569 = vst.msk [vmem:[#allocation3] sm:$0xff] %vm312_vm0, %v2537_v35 }
 0x40c   : > { %4508 = vmatmul.msk.bf16.gmra.mxu1 %vm2277_vm13, %v2263_v54  ;;  %4515 = vmatmul.msk.bf16.gmra.mxu3 %vm2277_vm13, %v2270_v41 }
 0x40d   : > { %v2184_v57 = vpop.f32.mrf.mxu0 }
 0x40e   : > { %v2185_v51 = vadd.f32 %v5889_v39, %v2184_v57 }
 0x410   : > { %v2240_v18 = vmax.f32 %v2185_v51, 0.0 }
 0x415   : > { %v2186_v60 = vpop.f32.mrf.mxu0 }
 0x416   : > { %v2187_v61 = vadd.f32 %v5889_v39, %v2186_v60 }
 0x418   : > { %v2241_v55 = vmax.f32 %v2187_v61, 0.0  ;;  %v2339_v16 = vpop.f32.mrf.mxu1 }
 0x419   : > { %v2340_v63 = vadd.f32 %v5941_v24, %v2339_v16 }
 0x41a   : > { %v2264_v14 = vpack.c.bf16 %v2241_v55, %v2240_v18 }
 0x41b   : > { %v2419_v36 = vmax.f32 %v2340_v63, 0.0 }
 0x41c   : > { %4509 = vmatmul.msk.bf16.gmra.mxu1 %vm2277_vm13, %v2264_v14 }
 0x41d   : > { %2505 = vst.msk [vmem:[#allocation2 + $0x19] sm:$0xff] %vm312_vm0, %v2419_v36  ;;  %v2189_v11 = vpop.f32.mrf.mxu0 }
 0x41e   : > { %v2190_v48 = vadd.f32 %v5889_v39, %v2189_v11 }
 0x420   : > { %v2341_v30 = vpop.f32.mrf.mxu1  ;;  %v2242_v37 = vmax.f32 %v2190_v48, 0.0 }
 0x421   : > { %v2342_v6 = vadd.f32 %v5941_v24, %v2341_v30 }
 0x423   : > { %v2420_v21 = vmax.f32 %v2342_v6, 0.0 }
 0x424   : > { %v2603_v17 = vld [vmem:[#allocation2 + $0x19] sm:$0xff] }
 0x425   : > { %v5954_v10 = vld [vmem:[#allocation2 + $0x18] sm:$0xff]  ;;  %2506 = vst.msk [vmem:[#allocation2 + $0x21] sm:$0xff] %vm312_vm0, %v2420_v21  ;;  %v2191_v12 = vpop.f32.mrf.mxu0  ;;  %2669 = vrot.lane.b32.xlu0 %v2603_v17, %s4585_s26 }
 0x426   : > { %v2192_v0 = vadd.f32 %v5889_v39, %v2191_v12  ;;  %2571 = vst.msk [vmem:[#allocation3 + $0x10] sm:$0xff] %vm312_vm0, %v5954_v10 }
 0x428   : > { %v2243_v27 = vmax.f32 %v2192_v0, 0.0 }
 0x429   : > { %v2344_v26 = vpop.f32.mrf.mxu1 }
 0x42a   : > { %v2265_v4 = vpack.c.bf16 %v2243_v27, %v2242_v37  ;;  %v2345_v23 = vadd.f32 %v5941_v24, %v2344_v26 }
 0x42c   : > { %v2421_v58 = vmax.f32 %v2345_v23, 0.0  ;;  %4510 = vmatmul.msk.bf16.gmra.mxu1 %vm2277_vm13, %v2265_v4  ;;  %v2604_v62 = vld [vmem:[#allocation2 + $0x21] sm:$0xff]  ;;  %v2668_v4 = vpop.permute.xlu2 %2667 }
 0x42d   : > { %v5964_v33 = vld [vmem:[#allocation2 + $0x20] sm:$0xff]  ;;  %v2194_v1 = vpop.f32.mrf.mxu0  ;;  %2671 = vrot.lane.b32.xlu1 %v2604_v62, %s4585_s26 }
 0x42e   : > { %2572 = vst.msk [vmem:[#allocation3 + $0x18] sm:$0xff] %vm312_vm0, %v5964_v33  ;;  %v2195_v53 = vadd.f32 %v5889_v39, %v2194_v1 }
 0x42f   : > { %2507 = vst.msk [vmem:[#allocation2 + $0x31] sm:$0xff] %vm312_vm0, %v2421_v58 }
 0x430   : > { %v2244_v47 = vmax.f32 %v2195_v53, 0.0  ;;  %v2666_v53 = vpop.permute.xlu1 %2665 }
 0x431   : > { %v2346_v8 = vpop.f32.mrf.mxu1  ;;  %2761 = vst.msk [vmem:[#allocation3] sm:$0xff] %vm625_vm2, %v2666_v53 }
 0x432   : > { %v2347_v45 = vadd.f32 %v5941_v24, %v2346_v8 }
 0x434   : > { %v2422_v15 = vmax.f32 %v2347_v45, 0.0 }
 0x435   : > { %v2196_v28 = vpop.f32.mrf.mxu0 }
 0x436   : > { %v5974_v50 = vld [vmem:[#allocation2 + $0x31] sm:$0xff]  ;;  %2508 = vst.msk [vmem:[#allocation2 + $0x39] sm:$0xff] %vm312_vm0, %v2422_v15  ;;  %v2197_v54 = vadd.f32 %v5889_v39, %v2196_v28 }
 0x437   : > { %v5976_v34 = vld [vmem:[#allocation2 + $0x30] sm:$0xff]  ;;  %2673 = vrot.lane.b32.xlu2 %v5974_v50, %s4585_s26 }
 0x438   : > { %2573 = vst.msk [vmem:[#allocation3 + $0x20] sm:$0xff] %vm312_vm0, %v5976_v34  ;;  %v2245_v40 = vmax.f32 %v2197_v54, 0.0 }
 0x439   : > { %v2349_v57 = vpop.f32.mrf.mxu1 }
 0x43a   : > { %v2266_v52 = vpack.c.bf16 %v2245_v40, %v2244_v47  ;;  %v2350_v25 = vadd.f32 %v5941_v24, %v2349_v57 }
 0x43c   : > { %v2423_v31 = vmax.f32 %v2350_v25, 0.0  ;;  %4511 = vmatmul.msk.bf16.gmra.mxu1 %vm2277_vm13, %v2266_v52 }
 0x43d   : > { %v2199_v46 = vpop.f32.mrf.mxu0  ;;  %v2606_v56 = vld [vmem:[#allocation2 + $0x39] sm:$0xff] }
 0x43e   : > { %v5987_v38 = vld [vmem:[#allocation2 + $0x38] sm:$0xff]  ;;  %2509 = vst.msk [vmem:[#allocation2 + $0x49] sm:$0xff] %vm312_vm0, %v2423_v31  ;;  %2675 = vrot.lane.b32.xlu0 %v2606_v56, %s4585_s26  ;;  %v2200_v5 = vadd.f32 %v5889_v39, %v2199_v46 }
 0x43f   : > { %2574 = vst.msk [vmem:[#allocation3 + $0x28] sm:$0xff] %vm312_vm0, %v5987_v38 }
 0x440   : > { %v2246_v16 = vmax.f32 %v2200_v5, 0.0 }
 0x441   : > { %v2351_v44 = vpop.f32.mrf.mxu1 }
 0x442   : > { %v2352_v51 = vadd.f32 %v5941_v24, %v2351_v44 }
 0x444   : > { %v2424_v60 = vmax.f32 %v2352_v51, 0.0 }
 0x445   : > { %v2201_v59 = vpop.f32.mrf.mxu0  ;;  %v5995_v61 = vld [vmem:[#allocation2 + $0x49] sm:$0xff] }
 0x446   : > { %v5997_v18 = vld [vmem:[#allocation2 + $0x48] sm:$0xff]  ;;  %2510 = vst.msk [vmem:[#allocation2 + $0x51] sm:$0xff] %vm312_vm0, %v2424_v60  ;;  %v2202_v55 = vadd.f32 %v5889_v39, %v2201_v59  ;;  %2677 = vrot.lane.b32.xlu1 %v5995_v61, %s4585_s26 }
 0x447   : > { %2575 = vst.msk [vmem:[#allocation3 + $0x30] sm:$0xff] %vm312_vm0, %v5997_v18 }
 0x448   : > { %v2247_v49 = vmax.f32 %v2202_v55, 0.0 }
 0x449   : > { %v2354_v63 = vpop.f32.mrf.mxu1 }
 0x44a   : > { %v2267_v14 = vpack.c.bf16 %v2247_v49, %v2246_v16  ;;  %v2355_v36 = vadd.f32 %v5941_v24, %v2354_v63 }
 0x44c   : > { %v2425_v11 = vmax.f32 %v2355_v36, 0.0  ;;  %4512 = vmatmul.msk.bf16.gmra.mxu1 %vm2277_vm13, %v2267_v14 }
 0x44d   : > { %v6007_v42 = vld [vmem:[#allocation2 + $0x51] sm:$0xff] }
 0x44e   : > { %v6009_v30 = vld [vmem:[#allocation2 + $0x50] sm:$0xff]  ;;  %2511 = vst.msk [vmem:[#allocation2 + $0x61] sm:$0xff] %vm312_vm0, %v2425_v11  ;;  %2679 = vrot.lane.b32.xlu2 %v6007_v42, %s4585_s26 }
 0x44f   : > { %2576 = vst.msk [vmem:[#allocation3 + $0x38] sm:$0xff] %vm312_vm0, %v6009_v30 }
 0x451   : > { %v2356_v2 = vpop.f32.mrf.mxu1 }
 0x452   : > { %v2357_v6 = vadd.f32 %v5941_v24, %v2356_v2  ;;  %v2219_v2 = vpop.f32.mrf.mxu3 }
 0x454   : > { %v2426_v3 = vmax.f32 %v2357_v6, 0.0 }
 0x455   : > { %v6017_v7 = vld [vmem:[#allocation2 + $0x61] sm:$0xff] }
 0x456   : > { %v6019_v21 = vld [vmem:[#allocation2 + $0x60] sm:$0xff]  ;;  %2512 = vst.msk [vmem:[#allocation2 + $0x69] sm:$0xff] %vm312_vm0, %v2426_v3  ;;  %2681 = vrot.lane.b32.xlu0 %v6017_v7, %s4585_s26 }
 0x457   : > { %2577 = vst.msk [vmem:[#allocation3 + $0x40] sm:$0xff] %vm312_vm0, %v6019_v21 }
 0x459   : > { %v2359_v19 = vpop.f32.mrf.mxu1 }
 0x45a   : > { %v2360_v48 = vadd.f32 %v5941_v24, %v2359_v19 }
 0x45c   : > { %v2427_v17 = vmax.f32 %v2360_v48, 0.0  ;;  %4513 = vmatmul.msk.bf16.gmra.mxu1 %vm2277_vm13, %v5943_v32  ;;  %v2538_v32 = vld [vmem:[#allocation2 + $0x8] sm:$0xff] }
 0x45d   : > { %v6029_v12 = vld [vmem:[#allocation2 + $0x69] sm:$0xff]  ;;  %2570 = vst.msk [vmem:[#allocation3 + $0x8] sm:$0xff] %vm312_vm0, %v2538_v32 }
 0x45e   : > { %v6031_v43 = vld [vmem:[#allocation2 + $0x68] sm:$0xff]  ;;  %2513 = vst.msk [vmem:[#allocation2 + $0x79] sm:$0xff] %vm312_vm0, %v2427_v17  ;;  %2683 = vrot.lane.b32.xlu1 %v6029_v12, %s4585_s26  ;;  %v2220_v17 = vadd.f32 %v5889_v39, %v2219_v2 }
 0x45f   : > { %2578 = vst.msk [vmem:[#allocation3 + $0x48] sm:$0xff] %vm312_vm0, %v6031_v43 }
 0x460   : > { %2762 = vst.msk [vmem:[#allocation3 + $0x8] sm:$0xff] %vm625_vm2, %v2668_v4  ;;  %v2254_v32 = vmax.f32 %v2220_v17, 0.0 }
 0x461   : > { %v2361_v0 = vpop.f32.mrf.mxu1 }
 0x462   : > { %v2362_v37 = vadd.f32 %v5941_v24, %v2361_v0 }
 0x464   : > { %v2428_v27 = vmax.f32 %v2362_v37, 0.0 }
 0x465   : > { %v6039_v9 = vld [vmem:[#allocation2 + $0x79] sm:$0xff] }
 0x466   : > { %v6041_v26 = vld [vmem:[#allocation2 + $0x78] sm:$0xff]  ;;  %2514 = vst.msk [vmem:[#allocation2 + $0x81] sm:$0xff] %vm312_vm0, %v2428_v27  ;;  %2685 = vrot.lane.b32.xlu2 %v6039_v9, %s4585_s26  ;;  %v2221_v27 = vpop.f32.mrf.mxu3 }
 0x467   : > { %2579 = vst.msk [vmem:[#allocation3 + $0x50] sm:$0xff] %vm312_vm0, %v6041_v26  ;;  %v2222_v4 = vadd.f32 %v5889_v39, %v2221_v27 }
 0x469   : > { %v2364_v23 = vpop.f32.mrf.mxu1 }
 0x46a   : > { %v2365_v58 = vadd.f32 %v5941_v24, %v2364_v23 }
 0x46c   : > { %v2429_v62 = vmax.f32 %v2365_v58, 0.0 }
 0x46d   : > { %v6051_v1 = vld [vmem:[#allocation2 + $0x81] sm:$0xff] }
 0x46e   : > { %v6053_v20 = vld [vmem:[#allocation2 + $0x80] sm:$0xff]  ;;  %2515 = vst.msk [vmem:[#allocation2 + $0x91] sm:$0xff] %vm312_vm0, %v2429_v62  ;;  %2687 = vrot.lane.b32.xlu0 %v6051_v1, %s4585_s26  ;;  %v2255_v62 = vmax.f32 %v2222_v4, 0.0 }
 0x46f   : > { %2580 = vst.msk [vmem:[#allocation3 + $0x58] sm:$0xff] %vm312_vm0, %v6053_v20 }
 0x471   : > { %v2366_v13 = vpop.f32.mrf.mxu1 }
 0x472   : > { %v2367_v8 = vadd.f32 %v5941_v24, %v2366_v13 }
 0x474   : > { %v2430_v29 = vmax.f32 %v2367_v8, 0.0  ;;  %v2271_v8 = vpack.c.bf16 %v2255_v62, %v2254_v32 }
 0x475   : > { %v6061_v22 = vld [vmem:[#allocation2 + $0x91] sm:$0xff]  ;;  %v2404_v53 = vpop.f32.mrf.mxu3 }
 0x476   : > { %v6063_v45 = vld [vmem:[#allocation2 + $0x90] sm:$0xff]  ;;  %2516 = vst.msk [vmem:[#allocation2 + $0x99] sm:$0xff] %vm312_vm0, %v2430_v29  ;;  %2689 = vrot.lane.b32.xlu1 %v6061_v22, %s4585_s26  ;;  %4516 = vmatmul.msk.bf16.gmra.mxu3 %vm2277_vm13, %v2271_v8 }
 0x477   : > { %2581 = vst.msk [vmem:[#allocation3 + $0x60] sm:$0xff] %vm312_vm0, %v6063_v45 }
 0x479   : > { %v2369_v15 = vpop.f32.mrf.mxu1 }
 0x47a   : > { %v2370_v28 = vadd.f32 %v5941_v24, %v2369_v15 }
 0x47c   : > { %v2431_v41 = vmax.f32 %v2370_v28, 0.0 }
 0x47d   : > { %v6073_v54 = vld [vmem:[#allocation2 + $0x99] sm:$0xff] }
 0x47e   : > { %v6075_v47 = vld [vmem:[#allocation2 + $0x98] sm:$0xff]  ;;  %2517 = vst.msk [vmem:[#allocation2 + $0xa9] sm:$0xff] %vm312_vm0, %v2431_v41  ;;  %2691 = vrot.lane.b32.xlu2 %v6073_v54, %s4585_s26 }
 0x47f   : > { %2582 = vst.msk [vmem:[#allocation3 + $0x68] sm:$0xff] %vm312_vm0, %v6075_v47 }
 0x481   : > { %v2371_v40 = vpop.f32.mrf.mxu1 }
 0x482   : > { %v2372_v57 = vadd.f32 %v5941_v24, %v2371_v40  ;;  %v2405_v40 = vadd.f32 %v5941_v24, %v2404_v53 }
 0x484   : > { %v2432_v52 = vmax.f32 %v2372_v57, 0.0 }
 0x485   : > { %v6083_v25 = vld [vmem:[#allocation2 + $0xa9] sm:$0xff] }
 0x486   : > { %v6085_v31 = vld [vmem:[#allocation2 + $0xa8] sm:$0xff]  ;;  %2518 = vst.msk [vmem:[#allocation2 + $0xb1] sm:$0xff] %vm312_vm0, %v2432_v52  ;;  %2693 = vrot.lane.b32.xlu0 %v6083_v25, %s4585_s26  ;;  %v2445_v52 = vmax.f32 %v2405_v40, 0.0 }
 0x487   : > { %2583 = vst.msk [vmem:[#allocation3 + $0x70] sm:$0xff] %vm312_vm0, %v6085_v31 }
 0x488   : > { %2531 = vst.msk [vmem:[#allocation2 + $0x151] sm:$0xff] %vm312_vm0, %v2445_v52 }
 0x489   : > { %v2374_v46 = vpop.f32.mrf.mxu1 }
 0x48a   : > { %v2375_v56 = vadd.f32 %v5941_v24, %v2374_v46 }
 0x48c   : > { %v2433_v44 = vmax.f32 %v2375_v56, 0.0 }
 0x48d   : > { %v6093_v51 = vld [vmem:[#allocation2 + $0xb1] sm:$0xff] }
 0x48e   : > { %v6095_v5 = vld [vmem:[#allocation2 + $0xb0] sm:$0xff]  ;;  %2519 = vst.msk [vmem:[#allocation2 + $0xc1] sm:$0xff] %vm312_vm0, %v2433_v44  ;;  %2695 = vrot.lane.b32.xlu1 %v6093_v51, %s4585_s26  ;;  %v2406_v44 = vpop.f32.mrf.mxu3 }
 0x48f   : > { %2584 = vst.msk [vmem:[#allocation3 + $0x78] sm:$0xff] %vm312_vm0, %v6095_v5  ;;  %v6176_v4 = vld [vmem:[#allocation2 + $0x150] sm:$0xff] }
 0x490   : > { %2597 = vst.msk [vmem:[#allocation3 + $0xe0] sm:$0xff] %vm312_vm0, %v6176_v4 }
 0x491   : > { %v2674_v60 = vpop.permute.xlu2 %2673  ;;  %v2376_v59 = vpop.f32.mrf.mxu1 }
 0x492   : > { %2765 = vst.msk [vmem:[#allocation3 + $0x20] sm:$0xff] %vm625_vm2, %v2674_v60  ;;  %v2377_v55 = vadd.f32 %v5941_v24, %v2376_v59  ;;  %v2407_v59 = vadd.f32 %v5941_v24, %v2406_v44 }
 0x494   : > { %v2434_v16 = vmax.f32 %v2377_v55, 0.0 }
 0x495   : > { %v6104_v49 = vld [vmem:[#allocation2 + $0xc1] sm:$0xff] }
 0x496   : > { %v6106_v63 = vld [vmem:[#allocation2 + $0xc0] sm:$0xff]  ;;  %2520 = vst.msk [vmem:[#allocation2 + $0xc9] sm:$0xff] %vm312_vm0, %v2434_v16  ;;  %2697 = vrot.lane.b32.xlu2 %v6104_v49, %s4585_s26 }
 0x497   : > { %v2670_v14 = vpop.permute.xlu0 %2669  ;;  %2585 = vst.msk [vmem:[#allocation3 + $0x80] sm:$0xff] %vm312_vm0, %v6106_v63 }
 0x498   : > { %2763 = vst.msk [vmem:[#allocation3 + $0x10] sm:$0xff] %vm625_vm2, %v2670_v14  ;;  %v2446_v14 = vmax.f32 %v2407_v59, 0.0 }
 0x499   : > { %v2379_v36 = vpop.f32.mrf.mxu1 }
 0x49a   : > { %v2380_v11 = vadd.f32 %v5941_v24, %v2379_v36  ;;  %2532 = vst.msk [vmem:[#allocation2 + $0x159] sm:$0xff] %vm312_vm0, %v2446_v14 }
 0x49c   : > { %v2435_v6 = vmax.f32 %v2380_v11, 0.0 }
 0x49d   : > { %v6115_v3 = vld [vmem:[#allocation2 + $0xc9] sm:$0xff] }
 0x49e   : > { %v6117_v19 = vld [vmem:[#allocation2 + $0xc8] sm:$0xff]  ;;  %2521 = vst.msk [vmem:[#allocation2 + $0xd9] sm:$0xff] %vm312_vm0, %v2435_v6  ;;  %2699 = vrot.lane.b32.xlu0 %v6115_v3, %s4585_s26  ;;  %v2409_v6 = vpop.f32.mrf.mxu3 }
 0x49f   : > { %v2672_v48 = vpop.permute.xlu1 %2671  ;;  %2586 = vst.msk [vmem:[#allocation3 + $0x88] sm:$0xff] %vm312_vm0, %v6117_v19 }
 0x4a0   : > { %2764 = vst.msk [vmem:[#allocation3 + $0x18] sm:$0xff] %vm625_vm2, %v2672_v48 }
 0x4a1   : > { %v2381_v0 = vpop.f32.mrf.mxu1  ;;  %v6179_v62 = vld [vmem:[#allocation2 + $0x158] sm:$0xff] }
 0x4a2   : > { %v2382_v37 = vadd.f32 %v5941_v24, %v2381_v0  ;;  %v2410_v0 = vadd.f32 %v5941_v24, %v2409_v6  ;;  %2598 = vst.msk [vmem:[#allocation3 + $0xe8] sm:$0xff] %vm312_vm0, %v6179_v62 }
 0x4a4   : > { %v2436_v23 = vmax.f32 %v2382_v37, 0.0  ;;  %v2447_v32 = vmax.f32 %v2410_v0, 0.0 }
 0x4a5   : > { %v6128_v58 = vld [vmem:[#allocation2 + $0xd9] sm:$0xff] }
 0x4a6   : > { %v6130_v13 = vld [vmem:[#allocation2 + $0xd8] sm:$0xff]  ;;  %2522 = vst.msk [vmem:[#allocation2 + $0xe1] sm:$0xff] %vm312_vm0, %v2436_v23  ;;  %2701 = vrot.lane.b32.xlu1 %v6128_v58, %s4585_s26 }
 0x4a7   : > { %2587 = vst.msk [vmem:[#allocation3 + $0x90] sm:$0xff] %vm312_vm0, %v6130_v13 }
 0x4a8   : > { %v2680_v29 = vpop.permute.xlu2 %2679  ;;  %2533 = vst.msk [vmem:[#allocation2 + $0x169] sm:$0xff] %vm312_vm0, %v2447_v32 }
 0x4a9   : > { %2768 = vst.msk [vmem:[#allocation3 + $0x38] sm:$0xff] %vm625_vm2, %v2680_v29  ;;  %v2384_v35 = vpop.f32.mrf.mxu1  ;;  %v2411_v29 = vpop.f32.mrf.mxu3 }
 0x4aa   : > { %v2385_v39 = vadd.f32 %v5941_v24, %v2384_v35 }
 0x4ac   : > { %v2437_v15 = vmax.f32 %v2385_v39, 0.0  ;;  %v2412_v39 = vadd.f32 %v5941_v24, %v2411_v29 }
 0x4ad   : > { %v6140_v28 = vld [vmem:[#allocation2 + $0xe1] sm:$0xff] }
 0x4ae   : > { %v6142_v41 = vld [vmem:[#allocation2 + $0xe0] sm:$0xff]  ;;  %2523 = vst.msk [vmem:[#allocation2 + $0xf1] sm:$0xff] %vm312_vm0, %v2437_v15  ;;  %2703 = vrot.lane.b32.xlu2 %v6140_v28, %s4585_s26  ;;  %v2448_v40 = vmax.f32 %v2412_v39, 0.0 }
 0x4af   : > { %2588 = vst.msk [vmem:[#allocation3 + $0x98] sm:$0xff] %vm312_vm0, %v6142_v41 }
 0x4b0   : > { %v2676_v57 = vpop.permute.xlu0 %2675  ;;  %2534 = vst.msk [vmem:[#allocation2 + $0x171] sm:$0xff] %vm312_vm0, %v2448_v40 }
 0x4b1   : > { %2766 = vst.msk [vmem:[#allocation3 + $0x28] sm:$0xff] %vm625_vm2, %v2676_v57  ;;  %v2386_v46 = vpop.f32.mrf.mxu1 }
 0x4b2   : > { %v2387_v56 = vadd.f32 %v5941_v24, %v2386_v46 }
 0x4b4   : > { %v2438_v60 = vmax.f32 %v2387_v56, 0.0 }
 0x4b5   : > { %v6154_v55 = vld [vmem:[#allocation2 + $0xf1] sm:$0xff] }
 0x4b6   : > { %v6156_v16 = vld [vmem:[#allocation2 + $0xf0] sm:$0xff]  ;;  %2524 = vst.msk [vmem:[#allocation2 + $0xf9] sm:$0xff] %vm312_vm0, %v2438_v60  ;;  %2705 = vrot.lane.b32.xlu0 %v6154_v55, %s4585_s26 }
 0x4b7   : > { %2589 = vst.msk [vmem:[#allocation3 + $0xa0] sm:$0xff] %vm312_vm0, %v6156_v16  ;;  %v6209_v14 = vld [vmem:[#allocation2 + $0x170] sm:$0xff] }
 0x4b8   : > { %v2678_v36 = vpop.permute.xlu1 %2677  ;;  %2600 = vst.msk [vmem:[#allocation3 + $0xf8] sm:$0xff] %vm312_vm0, %v6209_v14 }
 0x4b9   : > { %2767 = vst.msk [vmem:[#allocation3 + $0x30] sm:$0xff] %vm625_vm2, %v2678_v36  ;;  %v2389_v11 = vpop.f32.mrf.mxu1  ;;  %v6211_v36 = vld [vmem:[#allocation2 + $0x168] sm:$0xff] }
 0x4ba   : > { %v2390_v2 = vadd.f32 %v5941_v24, %v2389_v11  ;;  %2599 = vst.msk [vmem:[#allocation3 + $0xf0] sm:$0xff] %vm312_vm0, %v6211_v36 }
 0x4bc   : > { %v2439_v48 = vmax.f32 %v2390_v2, 0.0 }
 0x4bd   : > { %v6166_v17 = vld [vmem:[#allocation2 + $0xf9] sm:$0xff] }
 0x4be   : > { %2525 = vst.msk [vmem:[#allocation2 + $0x109] sm:$0xff] %vm312_vm0, %v2439_v48  ;;  %2707 = vrot.lane.b32.xlu1 %v6166_v17, %s4585_s26  ;;  %v6172_v37 = vld [vmem:[#allocation2 + $0xf8] sm:$0xff] }
 0x4bf   : > { %2590 = vst.msk [vmem:[#allocation3 + $0xa8] sm:$0xff] %vm312_vm0, %v6172_v37 }
 0x4c0   : > { %v2686_v27 = vpop.permute.xlu2 %2685 }
 0x4c1   : > { %2771 = vst.msk [vmem:[#allocation3 + $0x50] sm:$0xff] %vm625_vm2, %v2686_v27  ;;  %v2391_v23 = vpop.f32.mrf.mxu1 }
 0x4c2   : > { %v2392_v8 = vadd.f32 %v5941_v24, %v2391_v23 }
 0x4c4   : > { %v2440_v35 = vmax.f32 %v2392_v8, 0.0 }
 0x4c5   : > { %v6188_v53 = vld [vmem:[#allocation2 + $0x109] sm:$0xff] }
 0x4c6   : > { %v6190_v15 = vld [vmem:[#allocation2 + $0x108] sm:$0xff]  ;;  %2526 = vst.msk [vmem:[#allocation2 + $0x111] sm:$0xff] %vm312_vm0, %v2440_v35  ;;  %2709 = vrot.lane.b32.xlu2 %v6188_v53, %s4585_s26 }
 0x4c7   : > { %2591 = vst.msk [vmem:[#allocation3 + $0xb0] sm:$0xff] %vm312_vm0, %v6190_v15 }
 0x4c8   : > { %v2682_v57 = vpop.permute.xlu0 %2681 }
 0x4c9   : > { %2769 = vst.msk [vmem:[#allocation3 + $0x40] sm:$0xff] %vm625_vm2, %v2682_v57  ;;  %v2394_v52 = vpop.f32.mrf.mxu1 }
 0x4ca   : > { %v2395_v46 = vadd.f32 %v5941_v24, %v2394_v52 }
 0x4cc   : > { %v2441_v56 = vmax.f32 %v2395_v46, 0.0 }
 0x4cd   : > { %v6200_v44 = vld [vmem:[#allocation2 + $0x111] sm:$0xff] }
 0x4ce   : > { %2527 = vst.msk [vmem:[#allocation2 + $0x121] sm:$0xff] %vm312_vm0, %v2441_v56  ;;  %2711 = vrot.lane.b32.xlu0 %v6200_v44, %s4585_s26  ;;  %v6205_v60 = vld [vmem:[#allocation2 + $0x110] sm:$0xff] }
 0x4cf   : > { %2592 = vst.msk [vmem:[#allocation3 + $0xb8] sm:$0xff] %vm312_vm0, %v6205_v60  ;;  %v6243_v56 = vld [vmem:[#allocation2 + $0x151] sm:$0xff] }
 0x4d0   : > { %v2684_v59 = vpop.permute.xlu1 %2683  ;;  %7143 = vst [vmem:[#allocation6_spill] sm:$0xff] %v6243_v56 }
 0x4d1   : > { %2770 = vst.msk [vmem:[#allocation3 + $0x48] sm:$0xff] %vm625_vm2, %v2684_v59  ;;  %v2396_v11 = vpop.f32.mrf.mxu1 }
 0x4d2   : > { %v2397_v2 = vadd.f32 %v5941_v24, %v2396_v11 }
 0x4d4   : > { %v2442_v6 = vmax.f32 %v2397_v2, 0.0  ;;  %v6255_v2 = vld [vmem:[#allocation2 + $0x171] sm:$0xff] }
 0x4d5   : > { %v6219_v48 = vld [vmem:[#allocation2 + $0x121] sm:$0xff]  ;;  %7144 = vst [vmem:[#allocation11_spill] sm:$0xff] %v6255_v2 }
 0x4d6   : > { %v6221_v0 = vld [vmem:[#allocation2 + $0x120] sm:$0xff]  ;;  %2528 = vst.msk [vmem:[#allocation2 + $0x129] sm:$0xff] %vm312_vm0, %v2442_v6  ;;  %2713 = vrot.lane.b32.xlu1 %v6219_v48, %s4585_s26 }
 0x4d7   : > { %2593 = vst.msk [vmem:[#allocation3 + $0xc0] sm:$0xff] %vm312_vm0, %v6221_v0 }
 0x4d8   : > { %v2692_v27 = vpop.permute.xlu2 %2691 }
 0x4d9   : > { %2774 = vst.msk [vmem:[#allocation3 + $0x68] sm:$0xff] %vm625_vm2, %v2692_v27  ;;  %v2399_v32 = vpop.f32.mrf.mxu1  ;;  %v6259_v27 = vld [vmem:[#allocation2 + $0x159] sm:$0xff] }
 0x4da   : > { %v2400_v23 = vadd.f32 %v5941_v24, %v2399_v32  ;;  %7145 = vst [vmem:[#allocation8_spill] sm:$0xff] %v6259_v27 }
 0x4dc   : > { %v2443_v8 = vmax.f32 %v2400_v23, 0.0 }
 0x4dd   : > { %v6230_v29 = vld [vmem:[#allocation2 + $0x129] sm:$0xff] }
 0x4de   : > { %v6232_v35 = vld [vmem:[#allocation2 + $0x128] sm:$0xff]  ;;  %2529 = vst.msk [vmem:[#allocation2 + $0x139] sm:$0xff] %vm312_vm0, %v2443_v8  ;;  %2715 = vrot.lane.b32.xlu2 %v6230_v29, %s4585_s26 }
 0x4df   : > { %2594 = vst.msk [vmem:[#allocation3 + $0xc8] sm:$0xff] %vm312_vm0, %v6232_v35  ;;  %v2793_v8 = vld [vmem:[#allocation2 + $0x2] sm:$0xff] }
 0x4e0   : > { %v2688_v39 = vpop.permute.xlu0 %2687 }
 0x4e1   : > { %2772 = vst.msk [vmem:[#allocation3 + $0x58] sm:$0xff] %vm625_vm2, %v2688_v39  ;;  %v2401_v40 = vpop.f32.mrf.mxu1  ;;  %v6272_v39 = vld [vmem:[#allocation2 + $0x169] sm:$0xff] }
 0x4e2   : > { %v2402_v57 = vadd.f32 %v5941_v24, %v2401_v40  ;;  %7146 = vst [vmem:[#allocation14_spill] sm:$0xff] %v6272_v39  ;;  %v6277_v40 = vld [vmem:[#allocation2 + $0x1a] sm:$0xff] }
 0x4e3   : > { %7147 = vst [vmem:[#allocation5_spill] sm:$0xff] %v6277_v40 }
 0x4e4   : > { %v2444_v52 = vmax.f32 %v2402_v57, 0.0 }
 0x4e5   : > { %v6241_v46 = vld [vmem:[#allocation2 + $0x139] sm:$0xff] }
 0x4e6   : > { %7142 = vst [vmem:[#allocation4_spill] sm:$0xff] %v6241_v46  ;;  %v6245_v59 = vld [vmem:[#allocation2 + $0x138] sm:$0xff]  ;;  %2717 = vrot.lane.b32.xlu0 %v6241_v46, %s4585_s26  ;;  %2721 = vrot.lane.b32.xlu2 %v6243_v56, %s4585_s26  ;;  %v2815_v46 = vld [vmem:[#allocation2 + $0x10a] sm:$0xff] }
 0x4e7   : > { %2530 = vst.msk [vmem:[#allocation2 + $0x141] sm:$0xff] %vm312_vm0, %v2444_v52  ;;  %v2794_v52 = vld [vmem:[#allocation2 + $0xa] sm:$0xff] }
 0x4e8   : > { %2595 = vst.msk [vmem:[#allocation3 + $0xd0] sm:$0xff] %vm312_vm0, %v6245_v59  ;;  %v2690_v11 = vpop.permute.xlu1 %2689 }
 0x4e9   : > { %2773 = vst.msk [vmem:[#allocation3 + $0x60] sm:$0xff] %vm625_vm2, %v2690_v11  ;;  %v6282_v11 = vld [vmem:[#allocation2 + $0x22] sm:$0xff] }
 0x4ea   : > { %7148 = vst [vmem:[#allocation10_spill] sm:$0xff] %v6282_v11 }
 0x4ee   : > { %v6257_v6 = vld [vmem:[#allocation2 + $0x141] sm:$0xff]  ;;  %2723 = vrot.lane.b32.xlu0 %v6259_v27, %s4585_s26  ;;  %2727 = vrot.lane.b32.xlu2 %v6255_v2, %s4585_s26  ;;  %v6294_v27 = vld [vmem:[#allocation2 + $0x32] sm:$0xff] }
 0x4ef   : > { %2719 = vrot.lane.b32.xlu1 %v6257_v6, %s4585_s26  ;;  %v6265_v32 = vld [vmem:[#allocation2 + $0x140] sm:$0xff]  ;;  %7151 = vst [vmem:[#allocation13_spill] sm:$0xff] %v6294_v27 }
 0x4f0   : > { %2596 = vst.msk [vmem:[#allocation3 + $0xd8] sm:$0xff] %vm312_vm0, %v6265_v32  ;;  %v2698_v23 = vpop.permute.xlu2 %2697  ;;  %v2809_v2 = vld [vmem:[#allocation2 + $0xc2] sm:$0xff] }
 0x4f1   : > { %2777 = vst.msk [vmem:[#allocation3 + $0x80] sm:$0xff] %vm625_vm2, %v2698_v23  ;;  %v6287_v23 = vld [vmem:[#allocation2 + $0x3a] sm:$0xff] }
 0x4f2   : > { %7149 = vst [vmem:[#allocation17_spill] sm:$0xff] %v6287_v23 }
 0x4f6   : > { %2857 = vrot.lane.b32.xlu0 %v2793_v8, %s4586_s8  ;;  %2861 = vrot.lane.b32.xlu2 %v6277_v40, %s4586_s8  ;;  %v6292_v40 = vld [vmem:[#allocation2 + $0x4a] sm:$0xff] }
 0x4f7   : > { %2725 = vrot.lane.b32.xlu1 %v6272_v39, %s4585_s26  ;;  %7150 = vst [vmem:[#allocation7_spill] sm:$0xff] %v6292_v40  ;;  %v2812_v39 = vld [vmem:[#allocation2 + $0xe2] sm:$0xff] }
 0x4f8   : > { %v2694_v57 = vpop.permute.xlu0 %2693 }
 0x4f9   : > { %2775 = vst.msk [vmem:[#allocation3 + $0x70] sm:$0xff] %vm625_vm2, %v2694_v57  ;;  %v6300_v57 = vld [vmem:[#allocation2 + $0x62] sm:$0xff] }
 0x4fa   : > { %7152 = vst [vmem:[#allocation20_spill] sm:$0xff] %v6300_v57 }
 0x4fe   : > { %2863 = vrot.lane.b32.xlu0 %v6282_v11, %s4586_s8  ;;  %2867 = vrot.lane.b32.xlu2 %v6287_v23, %s4586_s8  ;;  %v6305_v11 = vld [vmem:[#allocation2 + $0x6a] sm:$0xff] }
 0x4ff   : > { %2859 = vrot.lane.b32.xlu1 %v2794_v52, %s4586_s8  ;;  %7153 = vst [vmem:[#allocation9_spill] sm:$0xff] %v6305_v11 }
 0x500   : > { %v2696_v8 = vpop.permute.xlu1 %2695 }
 0x501   : > { %2776 = vst.msk [vmem:[#allocation3 + $0x78] sm:$0xff] %vm625_vm2, %v2696_v8  ;;  %v6307_v8 = vld [vmem:[#allocation2 + $0x52] sm:$0xff] }
 0x502   : > { %7154 = vst [vmem:[#allocation16_spill] sm:$0xff] %v6307_v8 }
 0x506   : > { %2869 = vrot.lane.b32.xlu0 %v6292_v40, %s4586_s8  ;;  %2873 = vrot.lane.b32.xlu2 %v6300_v57, %s4586_s8  ;;  %v6313_v40 = vld [vmem:[#allocation2 + $0x82] sm:$0xff]  ;;  %v6318_v57 = vld [vmem:[#allocation2 + $0x92] sm:$0xff] }
 0x507   : > { %2865 = vrot.lane.b32.xlu1 %v6294_v27, %s4586_s8  ;;  %7155 = vst [vmem:[#allocation23_spill] sm:$0xff] %v6313_v40  ;;  %v6328_v27 = vld [vmem:[#allocation2 + $0x9a] sm:$0xff] }
 0x508   : > { %v2704_v52 = vpop.permute.xlu2 %2703  ;;  %7156 = vst [vmem:[#allocation12_spill] sm:$0xff] %v6318_v57 }
 0x509   : > { %2780 = vst.msk [vmem:[#allocation3 + $0x98] sm:$0xff] %vm625_vm2, %v2704_v52  ;;  %v6320_v52 = vld [vmem:[#allocation2 + $0x7a] sm:$0xff] }
 0x50a   : > { %7157 = vst [vmem:[#allocation19_spill] sm:$0xff] %v6320_v52 }
 0x50b   : > { %7158 = vst [vmem:[#allocation26_spill] sm:$0xff] %v6328_v27 }
 0x50e   : > { %2875 = vrot.lane.b32.xlu0 %v6305_v11, %s4586_s8  ;;  %2879 = vrot.lane.b32.xlu2 %v6313_v40, %s4586_s8  ;;  %v2807_v11 = vld [vmem:[#allocation2 + $0xaa] sm:$0xff]  ;;  %v2808_v40 = vld [vmem:[#allocation2 + $0xb2] sm:$0xff] }
 0x50f   : > { %2871 = vrot.lane.b32.xlu1 %v6307_v8, %s4586_s8 }
 0x510   : > { %v2700_v23 = vpop.permute.xlu0 %2699 }
 0x511   : > { %2778 = vst.msk [vmem:[#allocation3 + $0x88] sm:$0xff] %vm625_vm2, %v2700_v23  ;;  %v2810_v23 = vld [vmem:[#allocation2 + $0xca] sm:$0xff] }
 0x516   : > { %2881 = vrot.lane.b32.xlu0 %v6318_v57, %s4586_s8  ;;  %2885 = vrot.lane.b32.xlu2 %v2807_v11, %s4586_s8  ;;  %v2813_v11 = vld [vmem:[#allocation2 + $0xf2] sm:$0xff] }
 0x517   : > { %2877 = vrot.lane.b32.xlu1 %v6320_v52, %s4586_s8  ;;  %v2811_v52 = vld [vmem:[#allocation2 + $0xda] sm:$0xff] }
 0x518   : > { %v2702_v8 = vpop.permute.xlu1 %2701 }
 0x519   : > { %2779 = vst.msk [vmem:[#allocation3 + $0x90] sm:$0xff] %vm625_vm2, %v2702_v8 }
 0x51e   : > { %2887 = vrot.lane.b32.xlu0 %v2808_v40, %s4586_s8  ;;  %2891 = vrot.lane.b32.xlu2 %v2810_v23, %s4586_s8  ;;  %v2414_v40 = vpop.f32.mrf.mxu3 }
 0x51f   : > { %2883 = vrot.lane.b32.xlu1 %v6328_v27, %s4586_s8  ;;  %v2814_v27 = vld [vmem:[#allocation2 + $0xfa] sm:$0xff]  ;;  %v2415_v23 = vadd.f32 %v5941_v24, %v2414_v40 }
 0x520   : > { %v2710_v57 = vpop.permute.xlu2 %2709 }
 0x521   : > { %2783 = vst.msk [vmem:[#allocation3 + $0xb0] sm:$0xff] %vm625_vm2, %v2710_v57  ;;  %v2816_v57 = vld [vmem:[#allocation2 + $0x112] sm:$0xff] }
 0x526   : > { %2893 = vrot.lane.b32.xlu0 %v2811_v52, %s4586_s8  ;;  %2897 = vrot.lane.b32.xlu2 %v2813_v11, %s4586_s8  ;;  %v2449_v52 = vmax.f32 %v2415_v23, 0.0  ;;  %v2416_v11 = vpop.f32.mrf.mxu3  ;;  %v2820_v23 = vld [vmem:[#allocation2 + $0x142] sm:$0xff] }
 0x527   : > { %2889 = vrot.lane.b32.xlu1 %v2809_v2, %s4586_s8  ;;  %v2417_v56 = vadd.f32 %v5941_v24, %v2416_v11  ;;  %v2822_v24 = vld [vmem:[#allocation2 + $0x15a] sm:$0xff] }
 0x528   : > { %v2706_v8 = vpop.permute.xlu0 %2705  ;;  %2535 = vst.msk [vmem:[#allocation2 + $0x181] sm:$0xff] %vm312_vm0, %v2449_v52 }
 0x529   : > { %2781 = vst.msk [vmem:[#allocation3 + $0xa0] sm:$0xff] %vm625_vm2, %v2706_v8  ;;  %v2817_v8 = vld [vmem:[#allocation2 + $0x122] sm:$0xff] }
 0x52e   : > { %2899 = vrot.lane.b32.xlu0 %v2814_v27, %s4586_s8  ;;  %2903 = vrot.lane.b32.xlu2 %v2816_v57, %s4586_s8  ;;  %v2819_v27 = vld [vmem:[#allocation2 + $0x13a] sm:$0xff]  ;;  %v2818_v57 = vld [vmem:[#allocation2 + $0x12a] sm:$0xff] }
 0x52f   : > { %2895 = vrot.lane.b32.xlu1 %v2812_v39, %s4586_s8  ;;  %v2450_v39 = vmax.f32 %v2417_v56, 0.0  ;;  %v2823_v56 = vld [vmem:[#allocation2 + $0x16a] sm:$0xff] }
 0x530   : > { %v2708_v2 = vpop.permute.xlu1 %2707 }
 0x531   : > { %2782 = vst.msk [vmem:[#allocation3 + $0xa8] sm:$0xff] %vm625_vm2, %v2708_v2  ;;  %v2821_v2 = vld [vmem:[#allocation2 + $0x152] sm:$0xff] }
 0x532   : > { %2536 = vst.msk [vmem:[#allocation2 + $0x189] sm:$0xff] %vm312_vm0, %v2450_v39 }
 0x536   : > { %2905 = vrot.lane.b32.xlu0 %v2817_v8, %s4586_s8  ;;  %2909 = vrot.lane.b32.xlu2 %v2819_v27, %s4586_s8  ;;  %v2824_v27 = vld [vmem:[#allocation2 + $0x172] sm:$0xff] }
 0x537   : > { %2901 = vrot.lane.b32.xlu1 %v2815_v46, %s4586_s8 }
 0x538   : > { %v2716_v40 = vpop.permute.xlu2 %2715 }
 0x539   : > { %2786 = vst.msk [vmem:[#allocation3 + $0xc8] sm:$0xff] %vm625_vm2, %v2716_v40  ;;  %v3016_v40 = vld [vmem:[#allocation2 + $0x188] sm:$0xff] }
 0x53e   : > { %2911 = vrot.lane.b32.xlu0 %v2820_v23, %s4586_s8  ;;  %2915 = vrot.lane.b32.xlu2 %v2822_v24, %s4586_s8  ;;  %v3177_v24 = vld [vmem:[#allocation2 + $0x19] sm:$0xff] }
 0x53f   : > { %2907 = vrot.lane.b32.xlu1 %v2818_v57, %s4586_s8 }
 0x540   : > { %v2712_v52 = vpop.permute.xlu0 %2711  ;;  %v2722_v46 = vpop.permute.xlu2 %2721 }
 0x541   : > { %2784 = vst.msk [vmem:[#allocation3 + $0xb8] sm:$0xff] %vm625_vm2, %v2712_v52 }
 0x542   : > { %2789 = vst.msk [vmem:[#allocation3 + $0xe0] sm:$0xff] %vm625_vm2, %v2722_v46 }
 0x546   : > { %2917 = vrot.lane.b32.xlu0 %v2823_v56, %s4586_s8  ;;  %3049 = vrot.lane.b32.xlu2 %v5954_v10, %s4587_s9  ;;  %v6462_v56 = vld [vmem:[#allocation2 + $0x39] sm:$0xff] }
 0x547   : > { %2913 = vrot.lane.b32.xlu1 %v2821_v2, %s4586_s8 }
 0x548   : > { %v2714_v11 = vpop.permute.xlu1 %2713  ;;  %v2728_v8 = vpop.permute.xlu2 %2727 }
 0x549   : > { %2785 = vst.msk [vmem:[#allocation3 + $0xc0] sm:$0xff] %vm625_vm2, %v2714_v11 }
 0x54a   : > { %2792 = vst.msk [vmem:[#allocation3 + $0xf8] sm:$0xff] %vm625_vm2, %v2728_v8  ;;  %v7159_v8 = vld [vmem:[#allocation6_spill] sm:$0xff] }
 0x54e   : > { %3051 = vrot.lane.b32.xlu0 %v5964_v33, %s4587_s9  ;;  %3055 = vrot.lane.b32.xlu2 %v5987_v38, %s4587_s9 }
 0x54f   : > { %2919 = vrot.lane.b32.xlu1 %v2824_v27, %s4586_s8 }
 0x550   : > { %v2862_v39 = vpop.permute.xlu2 %2861 }
 0x551   : > { %2955 = vst.msk [vmem:[#allocation3 + $0x10] sm:$0xff] %vm818_vm3, %v2862_v39 }
 0x556   : > { %3057 = vrot.lane.b32.xlu0 %v5997_v18, %s4587_s9  ;;  %3061 = vrot.lane.b32.xlu2 %v6019_v21, %s4587_s9 }
 0x557   : > { %3053 = vrot.lane.b32.xlu1 %v5976_v34, %s4587_s9 }
 0x558   : > { %v2718_v10 = vpop.permute.xlu0 %2717  ;;  %v2868_v33 = vpop.permute.xlu2 %2867 }
 0x559   : > { %2787 = vst.msk [vmem:[#allocation3 + $0xd0] sm:$0xff] %vm625_vm2, %v2718_v10  ;;  %v7162_v10 = vld [vmem:[#allocation11_spill] sm:$0xff] }
 0x55a   : > { %2958 = vst.msk [vmem:[#allocation3 + $0x28] sm:$0xff] %vm818_vm3, %v2868_v33  ;;  %v7163_v33 = vld [vmem:[#allocation8_spill] sm:$0xff] }
 0x55e   : > { %3063 = vrot.lane.b32.xlu0 %v6031_v43, %s4587_s9  ;;  %3067 = vrot.lane.b32.xlu2 %v6053_v20, %s4587_s9 }
 0x55f   : > { %3059 = vrot.lane.b32.xlu1 %v6009_v30, %s4587_s9 }
 0x560   : > { %v2724_v34 = vpop.permute.xlu0 %2723  ;;  %v2874_v18 = vpop.permute.xlu2 %2873 }
 0x561   : > { %v2720_v38 = vpop.permute.xlu1 %2719  ;;  %2790 = vst.msk [vmem:[#allocation3 + $0xe8] sm:$0xff] %vm625_vm2, %v2724_v34 }
 0x562   : > { %2788 = vst.msk [vmem:[#allocation3 + $0xd8] sm:$0xff] %vm625_vm2, %v2720_v38  ;;  %v6540_v38 = vld [vmem:[#allocation2 + $0x189] sm:$0xff] }
 0x563   : > { %2961 = vst.msk [vmem:[#allocation3 + $0x40] sm:$0xff] %vm818_vm3, %v2874_v18 }
 0x566   : > { %3069 = vrot.lane.b32.xlu0 %v6063_v45, %s4587_s9  ;;  %3073 = vrot.lane.b32.xlu2 %v6085_v31, %s4587_s9 }
 0x567   : > { %3065 = vrot.lane.b32.xlu1 %v6041_v26, %s4587_s9 }
 0x568   : > { %v2858_v21 = vpop.permute.xlu0 %2857  ;;  %v2880_v43 = vpop.permute.xlu2 %2879 }
 0x569   : > { %v2726_v30 = vpop.permute.xlu1 %2725  ;;  %2953 = vst.msk [vmem:[#allocation3] sm:$0xff] %vm818_vm3, %v2858_v21  ;;  %v6547_v21 = vld [vmem:[#allocation2 + $0x181] sm:$0xff] }
 0x56a   : > { %2791 = vst.msk [vmem:[#allocation3 + $0xf0] sm:$0xff] %vm625_vm2, %v2726_v30 }
 0x56b   : > { %2964 = vst.msk [vmem:[#allocation3 + $0x58] sm:$0xff] %vm818_vm3, %v2880_v43  ;;  %v7164_v43 = vld [vmem:[#allocation5_spill] sm:$0xff] }
 0x56e   : > { %3075 = vrot.lane.b32.xlu0 %v6095_v5, %s4587_s9  ;;  %3079 = vrot.lane.b32.xlu2 %v6117_v19, %s4587_s9 }
 0x56f   : > { %3071 = vrot.lane.b32.xlu1 %v6075_v47, %s4587_s9 }
 0x570   : > { %v2864_v20 = vpop.permute.xlu0 %2863  ;;  %v2886_v45 = vpop.permute.xlu2 %2885 }
 0x571   : > { %v2860_v26 = vpop.permute.xlu1 %2859  ;;  %2956 = vst.msk [vmem:[#allocation3 + $0x18] sm:$0xff] %vm818_vm3, %v2864_v20 }
 0x572   : > { %2954 = vst.msk [vmem:[#allocation3 + $0x8] sm:$0xff] %vm818_vm3, %v2860_v26  ;;  %v7165_v26 = vld [vmem:[#allocation13_spill] sm:$0xff] }
 0x573   : > { %2967 = vst.msk [vmem:[#allocation3 + $0x70] sm:$0xff] %vm818_vm3, %v2886_v45 }
 0x576   : > { %3081 = vrot.lane.b32.xlu0 %v6130_v13, %s4587_s9  ;;  %3085 = vrot.lane.b32.xlu2 %v6156_v16, %s4587_s9 }
 0x577   : > { %3077 = vrot.lane.b32.xlu1 %v6106_v63, %s4587_s9 }
 0x578   : > { %v2870_v47 = vpop.permute.xlu0 %2869  ;;  %v2892_v5 = vpop.permute.xlu2 %2891 }
 0x579   : > { %v2866_v31 = vpop.permute.xlu1 %2865  ;;  %2959 = vst.msk [vmem:[#allocation3 + $0x30] sm:$0xff] %vm818_vm3, %v2870_v47 }
 0x57a   : > { %2957 = vst.msk [vmem:[#allocation3 + $0x20] sm:$0xff] %vm818_vm3, %v2866_v31  ;;  %v7166_v31 = vld [vmem:[#allocation17_spill] sm:$0xff] }
 0x57b   : > { %2970 = vst.msk [vmem:[#allocation3 + $0x88] sm:$0xff] %vm818_vm3, %v2892_v5  ;;  %v7167_v5 = vld [vmem:[#allocation10_spill] sm:$0xff] }
 0x57e   : > { %3087 = vrot.lane.b32.xlu0 %v6172_v37, %s4587_s9  ;;  %3091 = vrot.lane.b32.xlu2 %v6205_v60, %s4587_s9 }
 0x57f   : > { %3083 = vrot.lane.b32.xlu1 %v6142_v41, %s4587_s9 }
 0x580   : > { %v2876_v63 = vpop.permute.xlu0 %2875  ;;  %v2898_v13 = vpop.permute.xlu2 %2897 }
 0x581   : > { %v2872_v19 = vpop.permute.xlu1 %2871  ;;  %2962 = vst.msk [vmem:[#allocation3 + $0x48] sm:$0xff] %vm818_vm3, %v2876_v63  ;;  %v3561_v63 = vld [vmem:[#allocation2 + $0x30] sm:$0xff] }
 0x582   : > { %2960 = vst.msk [vmem:[#allocation3 + $0x38] sm:$0xff] %vm818_vm3, %v2872_v19 }
 0x583   : > { %2973 = vst.msk [vmem:[#allocation3 + $0xa0] sm:$0xff] %vm818_vm3, %v2898_v13 }
 0x586   : > { %3093 = vrot.lane.b32.xlu0 %v6221_v0, %s4587_s9  ;;  %3097 = vrot.lane.b32.xlu2 %v6245_v59, %s4587_s9  ;;  %v3015_v59 = vld [vmem:[#allocation2 + $0x180] sm:$0xff] }
 0x587   : > { %3089 = vrot.lane.b32.xlu1 %v6190_v15, %s4587_s9 }
 0x588   : > { %v2882_v41 = vpop.permute.xlu0 %2881  ;;  %v2904_v37 = vpop.permute.xlu2 %2903 }
 0x589   : > { %v2878_v16 = vpop.permute.xlu1 %2877  ;;  %2965 = vst.msk [vmem:[#allocation3 + $0x60] sm:$0xff] %vm818_vm3, %v2882_v41 }
 0x58a   : > { %2963 = vst.msk [vmem:[#allocation3 + $0x50] sm:$0xff] %vm818_vm3, %v2878_v16  ;;  %v3562_v16 = vld [vmem:[#allocation2 + $0x38] sm:$0xff] }
 0x58b   : > { %2976 = vst.msk [vmem:[#allocation3 + $0xb8] sm:$0xff] %vm818_vm3, %v2904_v37  ;;  %v7168_v37 = vld [vmem:[#allocation7_spill] sm:$0xff] }
 0x58e   : > { %3099 = vrot.lane.b32.xlu0 %v6265_v32, %s4587_s9  ;;  %3103 = vrot.lane.b32.xlu2 %v6179_v62, %s4587_s9 }
 0x58f   : > { %3095 = vrot.lane.b32.xlu1 %v6232_v35, %s4587_s9 }
 0x590   : > { %v2888_v15 = vpop.permute.xlu0 %2887  ;;  %v2910_v0 = vpop.permute.xlu2 %2909 }
 0x591   : > { %v2884_v60 = vpop.permute.xlu1 %2883  ;;  %2968 = vst.msk [vmem:[#allocation3 + $0x78] sm:$0xff] %vm818_vm3, %v2888_v15 }
 0x592   : > { %2966 = vst.msk [vmem:[#allocation3 + $0x68] sm:$0xff] %vm818_vm3, %v2884_v60 }
 0x593   : > { %2979 = vst.msk [vmem:[#allocation3 + $0xd0] sm:$0xff] %vm818_vm3, %v2910_v0 }
 0x596   : > { %3105 = vrot.lane.b32.xlu0 %v6211_v36, %s4587_s9  ;;  %3109 = vrot.lane.b32.xlu2 %v3015_v59, %s4587_s9  ;;  %v3178_v36 = vld [vmem:[#allocation2 + $0x21] sm:$0xff]  ;;  %v3753_v59 = vld [vmem:[#allocation2 + $0x31] sm:$0xff] }
 0x597   : > { %3101 = vrot.lane.b32.xlu1 %v6176_v4, %s4587_s9 }
 0x598   : > { %v2894_v35 = vpop.permute.xlu0 %2893  ;;  %v2916_v32 = vpop.permute.xlu2 %2915 }
 0x599   : > { %v2890_v62 = vpop.permute.xlu1 %2889  ;;  %2971 = vst.msk [vmem:[#allocation3 + $0x90] sm:$0xff] %vm818_vm3, %v2894_v35  ;;  %v3563_v35 = vld [vmem:[#allocation2 + $0x48] sm:$0xff] }
 0x59a   : > { %2969 = vst.msk [vmem:[#allocation3 + $0x80] sm:$0xff] %vm818_vm3, %v2890_v62 }
 0x59b   : > { %2982 = vst.msk [vmem:[#allocation3 + $0xe8] sm:$0xff] %vm818_vm3, %v2916_v32 }
 0x59e   : > { %3111 = vrot.lane.b32.xlu0 %v3016_v40, %s4587_s9  ;;  %3243 = vrot.lane.b32.xlu2 %v3178_v36, %s4588_s10  ;;  %v3564_v36 = vld [vmem:[#allocation2 + $0x50] sm:$0xff] }
 0x59f   : > { %3107 = vrot.lane.b32.xlu1 %v6209_v14, %s4587_s9 }
 0x5a0   : > { %v2900_v4 = vpop.permute.xlu0 %2899  ;;  %v3050_v57 = vpop.permute.xlu2 %3049 }
 0x5a1   : > { %v2896_v23 = vpop.permute.xlu1 %2895  ;;  %2974 = vst.msk [vmem:[#allocation3 + $0xa8] sm:$0xff] %vm818_vm3, %v2900_v4  ;;  %v3756_v4 = vld [vmem:[#allocation2 + $0x51] sm:$0xff] }
 0x5a2   : > { %2972 = vst.msk [vmem:[#allocation3 + $0x98] sm:$0xff] %vm818_vm3, %v2896_v23 }
 0x5a3   : > { %3145 = vst.msk [vmem:[#allocation3] sm:$0xff] %vm1011_vm4, %v3050_v57 }
 0x5a6   : > { %3245 = vrot.lane.b32.xlu0 %v5974_v50, %s4588_s10  ;;  %3249 = vrot.lane.b32.xlu2 %v5995_v61, %s4588_s10 }
 0x5a7   : > { %3241 = vrot.lane.b32.xlu1 %v3177_v24, %s4588_s10 }
 0x5a8   : > { %v2906_v14 = vpop.permute.xlu0 %2905  ;;  %v3056_v46 = vpop.permute.xlu2 %3055 }
 0x5a9   : > { %v2902_v52 = vpop.permute.xlu1 %2901  ;;  %2977 = vst.msk [vmem:[#allocation3 + $0xc0] sm:$0xff] %vm818_vm3, %v2906_v14  ;;  %v3755_v14 = vld [vmem:[#allocation2 + $0x49] sm:$0xff] }
 0x5aa   : > { %2975 = vst.msk [vmem:[#allocation3 + $0xb0] sm:$0xff] %vm818_vm3, %v2902_v52  ;;  %v7169_v52 = vld [vmem:[#allocation16_spill] sm:$0xff] }
 0x5ab   : > { %3148 = vst.msk [vmem:[#allocation3 + $0x18] sm:$0xff] %vm1011_vm4, %v3056_v46 }
 0x5ae   : > { %3251 = vrot.lane.b32.xlu0 %v6007_v42, %s4588_s10  ;;  %3255 = vrot.lane.b32.xlu2 %v6029_v12, %s4588_s10 }
 0x5af   : > { %3247 = vrot.lane.b32.xlu1 %v6462_v56, %s4588_s10 }
 0x5b0   : > { %v2912_v50 = vpop.permute.xlu0 %2911  ;;  %v3062_v2 = vpop.permute.xlu2 %3061 }
 0x5b1   : > { %v2908_v61 = vpop.permute.xlu1 %2907  ;;  %2980 = vst.msk [vmem:[#allocation3 + $0xd8] sm:$0xff] %vm818_vm3, %v2912_v50 }
 0x5b2   : > { %2978 = vst.msk [vmem:[#allocation3 + $0xc8] sm:$0xff] %vm818_vm3, %v2908_v61  ;;  %v3565_v61 = vld [vmem:[#allocation2 + $0x60] sm:$0xff] }
 0x5b3   : > { %3151 = vst.msk [vmem:[#allocation3 + $0x30] sm:$0xff] %vm1011_vm4, %v3062_v2  ;;  %v3757_v2 = vld [vmem:[#allocation2 + $0x61] sm:$0xff] }
 0x5b6   : > { %3257 = vrot.lane.b32.xlu0 %v6039_v9, %s4588_s10  ;;  %3261 = vrot.lane.b32.xlu2 %v6061_v22, %s4588_s10 }
 0x5b7   : > { %3253 = vrot.lane.b32.xlu1 %v6017_v7, %s4588_s10 }
 0x5b8   : > { %v2918_v42 = vpop.permute.xlu0 %2917  ;;  %v3068_v11 = vpop.permute.xlu2 %3067 }
 0x5b9   : > { %v2914_v12 = vpop.permute.xlu1 %2913  ;;  %2983 = vst.msk [vmem:[#allocation3 + $0xf0] sm:$0xff] %vm818_vm3, %v2918_v42 }
 0x5ba   : > { %2981 = vst.msk [vmem:[#allocation3 + $0xe0] sm:$0xff] %vm818_vm3, %v2914_v12 }
 0x5bb   : > { %3154 = vst.msk [vmem:[#allocation3 + $0x48] sm:$0xff] %vm1011_vm4, %v3068_v11 }
 0x5be   : > { %3263 = vrot.lane.b32.xlu0 %v6073_v54, %s4588_s10  ;;  %3267 = vrot.lane.b32.xlu2 %v6093_v51, %s4588_s10 }
 0x5bf   : > { %3259 = vrot.lane.b32.xlu1 %v6051_v1, %s4588_s10 }
 0x5c0   : > { %v3052_v7 = vpop.permute.xlu0 %3051  ;;  %v3074_v22 = vpop.permute.xlu2 %3073 }
 0x5c1   : > { %v2920_v9 = vpop.permute.xlu1 %2919  ;;  %3146 = vst.msk [vmem:[#allocation3 + $0x8] sm:$0xff] %vm1011_vm4, %v3052_v7  ;;  %v3758_v7 = vld [vmem:[#allocation2 + $0x69] sm:$0xff] }
 0x5c2   : > { %2984 = vst.msk [vmem:[#allocation3 + $0xf8] sm:$0xff] %vm818_vm3, %v2920_v9  ;;  %v3566_v9 = vld [vmem:[#allocation2 + $0x68] sm:$0xff] }
 0x5c3   : > { %3157 = vst.msk [vmem:[#allocation3 + $0x60] sm:$0xff] %vm1011_vm4, %v3074_v22  ;;  %v7170_v22 = vld [vmem:[#allocation9_spill] sm:$0xff] }
 0x5c6   : > { %3269 = vrot.lane.b32.xlu0 %v6104_v49, %s4588_s10  ;;  %3273 = vrot.lane.b32.xlu2 %v6128_v58, %s4588_s10 }
 0x5c7   : > { %3265 = vrot.lane.b32.xlu1 %v6083_v25, %s4588_s10 }
 0x5c8   : > { %v3058_v1 = vpop.permute.xlu0 %3057  ;;  %v3080_v51 = vpop.permute.xlu2 %3079 }
 0x5c9   : > { %v3054_v54 = vpop.permute.xlu1 %3053  ;;  %3149 = vst.msk [vmem:[#allocation3 + $0x20] sm:$0xff] %vm1011_vm4, %v3058_v1 }
 0x5ca   : > { %3147 = vst.msk [vmem:[#allocation3 + $0x10] sm:$0xff] %vm1011_vm4, %v3054_v54 }
 0x5cb   : > { %3160 = vst.msk [vmem:[#allocation3 + $0x78] sm:$0xff] %vm1011_vm4, %v3080_v51 }
 0x5ce   : > { %3275 = vrot.lane.b32.xlu0 %v6140_v28, %s4588_s10  ;;  %3279 = vrot.lane.b32.xlu2 %v6166_v17, %s4588_s10 }
 0x5cf   : > { %3271 = vrot.lane.b32.xlu1 %v6115_v3, %s4588_s10 }
 0x5d0   : > { %v3064_v25 = vpop.permute.xlu0 %3063  ;;  %v3086_v58 = vpop.permute.xlu2 %3085 }
 0x5d1   : > { %v3060_v49 = vpop.permute.xlu1 %3059  ;;  %3152 = vst.msk [vmem:[#allocation3 + $0x38] sm:$0xff] %vm1011_vm4, %v3064_v25  ;;  %v7171_v25 = vld [vmem:[#allocation20_spill] sm:$0xff] }
 0x5d2   : > { %3150 = vst.msk [vmem:[#allocation3 + $0x28] sm:$0xff] %vm1011_vm4, %v3060_v49  ;;  %v3567_v49 = vld [vmem:[#allocation2 + $0x78] sm:$0xff] }
 0x5d3   : > { %3163 = vst.msk [vmem:[#allocation3 + $0x90] sm:$0xff] %vm1011_vm4, %v3086_v58 }
 0x5d6   : > { %3281 = vrot.lane.b32.xlu0 %v6188_v53, %s4588_s10  ;;  %3285 = vrot.lane.b32.xlu2 %v6219_v48, %s4588_s10 }
 0x5d7   : > { %3277 = vrot.lane.b32.xlu1 %v6154_v55, %s4588_s10 }
 0x5d8   : > { %v3070_v3 = vpop.permute.xlu0 %3069  ;;  %v3092_v17 = vpop.permute.xlu2 %3091 }
 0x5d9   : > { %v3066_v28 = vpop.permute.xlu1 %3065  ;;  %3155 = vst.msk [vmem:[#allocation3 + $0x50] sm:$0xff] %vm1011_vm4, %v3070_v3 }
 0x5da   : > { %3153 = vst.msk [vmem:[#allocation3 + $0x40] sm:$0xff] %vm1011_vm4, %v3066_v28 }
 0x5db   : > { %3166 = vst.msk [vmem:[#allocation3 + $0xa8] sm:$0xff] %vm1011_vm4, %v3092_v17  ;;  %v3568_v17 = vld [vmem:[#allocation2 + $0x80] sm:$0xff] }
 0x5de   : > { %3287 = vrot.lane.b32.xlu0 %v6230_v29, %s4588_s10  ;;  %3291 = vrot.lane.b32.xlu2 %v6257_v6, %s4588_s10  ;;  %v7160_v29 = vld [vmem:[#allocation4_spill] sm:$0xff] }
 0x5df   : > { %3283 = vrot.lane.b32.xlu1 %v6200_v44, %s4588_s10  ;;  %v7161_v44 = vld [vmem:[#allocation14_spill] sm:$0xff] }
 0x5e0   : > { %v3076_v55 = vpop.permute.xlu0 %3075  ;;  %v3098_v48 = vpop.permute.xlu2 %3097 }
 0x5e1   : > { %v3072_v53 = vpop.permute.xlu1 %3071  ;;  %3158 = vst.msk [vmem:[#allocation3 + $0x68] sm:$0xff] %vm1011_vm4, %v3076_v55  ;;  %v3760_v55 = vld [vmem:[#allocation2 + $0x81] sm:$0xff] }
 0x5e2   : > { %3156 = vst.msk [vmem:[#allocation3 + $0x58] sm:$0xff] %vm1011_vm4, %v3072_v53 }
 0x5e3   : > { %3169 = vst.msk [vmem:[#allocation3 + $0xc0] sm:$0xff] %vm1011_vm4, %v3098_v48 }
 0x5e6   : > { %3293 = vrot.lane.b32.xlu0 %v7159_v8, %s4588_s10  ;;  %3297 = vrot.lane.b32.xlu2 %v7161_v44, %s4588_s10  ;;  %v7172_v44 = vld [vmem:[#allocation19_spill] sm:$0xff] }
 0x5e7   : > { %3289 = vrot.lane.b32.xlu1 %v7160_v29, %s4588_s10  ;;  %v3759_v29 = vld [vmem:[#allocation2 + $0x79] sm:$0xff] }
 0x5e8   : > { %v3082_v27 = vpop.permute.xlu0 %3081  ;;  %v3104_v39 = vpop.permute.xlu2 %3103 }
 0x5e9   : > { %v3078_v6 = vpop.permute.xlu1 %3077  ;;  %3161 = vst.msk [vmem:[#allocation3 + $0x80] sm:$0xff] %vm1011_vm4, %v3082_v27 }
 0x5ea   : > { %3159 = vst.msk [vmem:[#allocation3 + $0x70] sm:$0xff] %vm1011_vm4, %v3078_v6 }
 0x5eb   : > { %3172 = vst.msk [vmem:[#allocation3 + $0xd8] sm:$0xff] %vm1011_vm4, %v3104_v39 }
 0x5ee   : > { %3299 = vrot.lane.b32.xlu0 %v7162_v10, %s4588_s10  ;;  %3303 = vrot.lane.b32.xlu2 %v6540_v38, %s4588_s10  ;;  %v7173_v10 = vld [vmem:[#allocation23_spill] sm:$0xff] }
 0x5ef   : > { %3295 = vrot.lane.b32.xlu1 %v7163_v33, %s4588_s10  ;;  %v3570_v33 = vld [vmem:[#allocation2 + $0x98] sm:$0xff] }
 0x5f0   : > { %v3088_v34 = vpop.permute.xlu0 %3087  ;;  %v3110_v30 = vpop.permute.xlu2 %3109 }
 0x5f1   : > { %v3084_v18 = vpop.permute.xlu1 %3083  ;;  %3164 = vst.msk [vmem:[#allocation3 + $0x98] sm:$0xff] %vm1011_vm4, %v3088_v34 }
 0x5f2   : > { %3162 = vst.msk [vmem:[#allocation3 + $0x88] sm:$0xff] %vm1011_vm4, %v3084_v18 }
 0x5f3   : > { %3175 = vst.msk [vmem:[#allocation3 + $0xf0] sm:$0xff] %vm1011_vm4, %v3110_v30 }
 0x5f6   : > { %3433 = vrot.lane.b32.xlu0 %v7164_v43, %s4589_s11  ;;  %3437 = vrot.lane.b32.xlu2 %v7165_v26, %s4589_s11  ;;  %v3761_v43 = vld [vmem:[#allocation2 + $0x91] sm:$0xff] }
 0x5f7   : > { %3301 = vrot.lane.b32.xlu1 %v6547_v21, %s4588_s10 }
 0x5f8   : > { %v3094_v20 = vpop.permute.xlu0 %3093  ;;  %v3244_v47 = vpop.permute.xlu2 %3243 }
 0x5f9   : > { %v3090_v45 = vpop.permute.xlu1 %3089  ;;  %3167 = vst.msk [vmem:[#allocation3 + $0xb0] sm:$0xff] %vm1011_vm4, %v3094_v20  ;;  %v7174_v20 = vld [vmem:[#allocation12_spill] sm:$0xff] }
 0x5fa   : > { %3165 = vst.msk [vmem:[#allocation3 + $0xa0] sm:$0xff] %vm1011_vm4, %v3090_v45 }
 0x5fb   : > { %3338 = vst.msk [vmem:[#allocation3 + $0x8] sm:$0xff] %vm1204_vm5, %v3244_v47 }
 0x5fe   : > { %3439 = vrot.lane.b32.xlu0 %v7166_v31, %s4589_s11  ;;  %3625 = vrot.lane.b32.xlu2 %v3561_v63, %s4590_s12  ;;  %v7175_v63 = vld [vmem:[#allocation26_spill] sm:$0xff] }
 0x5ff   : > { %3435 = vrot.lane.b32.xlu1 %v7167_v5, %s4589_s11  ;;  %v3762_v5 = vld [vmem:[#allocation2 + $0x99] sm:$0xff] }
 0x600   : > { %v3100_v19 = vpop.permute.xlu0 %3099  ;;  %v3250_v41 = vpop.permute.xlu2 %3249 }
 0x601   : > { %v3096_v13 = vpop.permute.xlu1 %3095  ;;  %3170 = vst.msk [vmem:[#allocation3 + $0xc8] sm:$0xff] %vm1011_vm4, %v3100_v19 }
 0x602   : > { %3168 = vst.msk [vmem:[#allocation3 + $0xb8] sm:$0xff] %vm1011_vm4, %v3096_v13 }
 0x603   : > { %3341 = vst.msk [vmem:[#allocation3 + $0x20] sm:$0xff] %vm1204_vm5, %v3250_v41 }
 0x606   : > { %3627 = vrot.lane.b32.xlu0 %v3562_v16, %s4590_s12  ;;  %3819 = vrot.lane.b32.xlu2 %v6462_v56, %s4591_s13  ;;  %v3571_v16 = vld [vmem:[#allocation2 + $0xa8] sm:$0xff] }
 0x607   : > { %3441 = vrot.lane.b32.xlu1 %v7168_v37, %s4589_s11 }
 0x608   : > { %v3106_v15 = vpop.permute.xlu0 %3105  ;;  %v3256_v0 = vpop.permute.xlu2 %3255 }
 0x609   : > { %v3102_v60 = vpop.permute.xlu1 %3101  ;;  %3173 = vst.msk [vmem:[#allocation3 + $0xe0] sm:$0xff] %vm1011_vm4, %v3106_v15  ;;  %v3763_v15 = vld [vmem:[#allocation2 + $0xa9] sm:$0xff] }
 0x60a   : > { %3171 = vst.msk [vmem:[#allocation3 + $0xd0] sm:$0xff] %vm1011_vm4, %v3102_v60 }
 0x60b   : > { %3344 = vst.msk [vmem:[#allocation3 + $0x38] sm:$0xff] %vm1204_vm5, %v3256_v0 }
 0x60e   : > { %4009 = vrot.lane.b32.xlu0 %v7165_v26, %s4592_s14  ;;  %3629 = vrot.lane.b32.xlu2 %v3563_v35, %s4590_s12  ;;  %v3569_v26 = vld [vmem:[#allocation2 + $0x90] sm:$0xff] }
 0x60f   : > { %3817 = vrot.lane.b32.xlu1 %v3753_v59, %s4591_s13 }
 0x610   : > { %v3112_v62 = vpop.permute.xlu0 %3111  ;;  %v3262_v40 = vpop.permute.xlu2 %3261 }
 0x611   : > { %v3108_v32 = vpop.permute.xlu1 %3107  ;;  %3176 = vst.msk [vmem:[#allocation3 + $0xf8] sm:$0xff] %vm1011_vm4, %v3112_v62 }
 0x612   : > { %3174 = vst.msk [vmem:[#allocation3 + $0xe8] sm:$0xff] %vm1011_vm4, %v3108_v32 }
 0x613   : > { %3347 = vst.msk [vmem:[#allocation3 + $0x50] sm:$0xff] %vm1204_vm5, %v3262_v40  ;;  %v4548_v40 = vld [vmem:[%s7022_s5 + $0x8] sm:$0xff] }
 0x616   : > { %3631 = vrot.lane.b32.xlu0 %v3564_v36, %s4590_s12  ;;  %3823 = vrot.lane.b32.xlu2 %v3756_v4, %s4591_s13  ;;  %v3764_v36 = vld [vmem:[#allocation2 + $0xb1] sm:$0xff] }
 0x617   : > { %4011 = vrot.lane.b32.xlu1 %v7166_v31, %s4592_s14  ;;  %v3572_v4 = vld [vmem:[#allocation2 + $0xb0] sm:$0xff] }
 0x618   : > { %v3246_v23 = vpop.permute.xlu0 %3245  ;;  %v3268_v24 = vpop.permute.xlu2 %3267 }
 0x619   : > { %v3242_v57 = vpop.permute.xlu1 %3241  ;;  %3339 = vst.msk [vmem:[#allocation3 + $0x10] sm:$0xff] %vm1204_vm5, %v3246_v23  ;;  %v3956_v23 = vld [vmem:[#allocation2 + $0xb2] sm:$0xff] }
 0x61a   : > { %3337 = vst.msk [vmem:[#allocation3] sm:$0xff] %vm1204_vm5, %v3242_v57  ;;  %v4547_v57 = vld [vmem:[%s7022_s5] sm:$0xff] }
 0x61b   : > { %3350 = vst.msk [vmem:[#allocation3 + $0x68] sm:$0xff] %vm1204_vm5, %v3268_v24 }
 0x61e   : > { %4013 = vrot.lane.b32.xlu0 %v7168_v37, %s4592_s14  ;;  %3443 = vrot.lane.b32.xlu2 %v7169_v52, %s4589_s11  ;;  %v4189_v37 = vld [vmem:[%s7022_s5 + $0x10] sm:$0x3] }
 0x61f   : > { %3821 = vrot.lane.b32.xlu1 %v3755_v14, %s4591_s13  ;;  %v4203_v60 = vunpack.c.l.b16 %v4189_v37 }
 0x620   : > { %v3252_v46 = vpop.permute.xlu0 %3251  ;;  %v3274_v50 = vpop.permute.xlu2 %3273 }
 0x621   : > { %v3248_v56 = vpop.permute.xlu1 %3247  ;;  %3342 = vst.msk [vmem:[#allocation3 + $0x28] sm:$0xff] %vm1204_vm5, %v3252_v46  ;;  %v4206_v35 = vpack.c.b16 %v4203_v60, %v4203_v60  ;;  %v3381_v46 = vld [vmem:[#allocation2 + $0xaa] sm:$0xff] }
 0x622   : > { %3340 = vst.msk [vmem:[#allocation3 + $0x18] sm:$0xff] %vm1204_vm5, %v3248_v56  ;;  %v3573_v56 = vld [vmem:[#allocation2 + $0xc0] sm:$0xff] }
 0x623   : > { %3353 = vst.msk [vmem:[#allocation3 + $0x80] sm:$0xff] %vm1204_vm5, %v3274_v50  ;;  %v4258_v32 = vsel %vm2131_vm9, %v4206_v35, 0  ;;  %v3769_v35 = vld [vmem:[#allocation2 + $0xf1] sm:$0xff] }
 0x624   : > { %4265 = vmatpush.bf16.msra.mxu2 %v4258_v32  ;;  %4553 = vmatpush.bf16.msra.mxu3 %v4258_v32  ;;  %v3777_v32 = vld [vmem:[#allocation2 + $0x151] sm:$0xff] }
 0x626   : > { %3633 = vrot.lane.b32.xlu0 %v3565_v61, %s4590_s12  ;;  %3825 = vrot.lane.b32.xlu2 %v3757_v2, %s4591_s13 }
 0x627   : > { %4015 = vrot.lane.b32.xlu1 %v7169_v52, %s4592_s14 }
 0x628   : > { %v3258_v42 = vpop.permute.xlu0 %3257  ;;  %v3280_v11 = vpop.permute.xlu2 %3279  ;;  %4266 = vmatpush.bf16.msra.mxu2 %v4548_v40  ;;  %4554 = vmatpush.bf16.msra.mxu3 %v4548_v40 }
 0x629   : > { %v3254_v12 = vpop.permute.xlu1 %3253  ;;  %3345 = vst.msk [vmem:[#allocation3 + $0x40] sm:$0xff] %vm1204_vm5, %v3258_v42  ;;  %v3574_v42 = vld [vmem:[#allocation2 + $0xc8] sm:$0xff] }
 0x62a   : > { %3343 = vst.msk [vmem:[#allocation3 + $0x30] sm:$0xff] %vm1204_vm5, %v3254_v12  ;;  %v3766_v12 = vld [vmem:[#allocation2 + $0xc9] sm:$0xff] }
 0x62b   : > { %3356 = vst.msk [vmem:[#allocation3 + $0x98] sm:$0xff] %vm1204_vm5, %v3280_v11 }
 0x62c   : > { %4267 = vmatpush.bf16.msra.mxu2 %v4547_v57  ;;  %4555 = vmatpush.bf16.msra.mxu3 %v4547_v57  ;;  %v3770_v57 = vld [vmem:[#allocation2 + $0xf9] sm:$0xff] }
 0x62e   : > { %3827 = vrot.lane.b32.xlu0 %v3758_v7, %s4591_s13  ;;  %4019 = vrot.lane.b32.xlu2 %v7170_v22, %s4592_s14 }
 0x62f   : > { %3635 = vrot.lane.b32.xlu1 %v3566_v9, %s4590_s12 }
 0x630   : > { %v3264_v1 = vpop.permute.xlu0 %3263  ;;  %v3286_v51 = vpop.permute.xlu2 %3285 }
 0x631   : > { %v3260_v54 = vpop.permute.xlu1 %3259  ;;  %3348 = vst.msk [vmem:[#allocation3 + $0x58] sm:$0xff] %vm1204_vm5, %v3264_v1  ;;  %v3765_v1 = vld [vmem:[#allocation2 + $0xc1] sm:$0xff] }
 0x632   : > { %3346 = vst.msk [vmem:[#allocation3 + $0x48] sm:$0xff] %vm1204_vm5, %v3260_v54 }
 0x633   : > { %3359 = vst.msk [vmem:[#allocation3 + $0xb0] sm:$0xff] %vm1204_vm5, %v3286_v51 }
 0x636   : > { %3445 = vrot.lane.b32.xlu0 %v7171_v25, %s4589_s11  ;;  %3637 = vrot.lane.b32.xlu2 %v3567_v49, %s4590_s12  ;;  %v3384_v49 = vld [vmem:[#allocation2 + $0xca] sm:$0xff] }
 0x637   : > { %4017 = vrot.lane.b32.xlu1 %v7171_v25, %s4592_s14 }
 0x638   : > { %v3270_v58 = vpop.permute.xlu0 %3269  ;;  %v3292_v28 = vpop.permute.xlu2 %3291 }
 0x639   : > { %v3266_v3 = vpop.permute.xlu1 %3265  ;;  %3351 = vst.msk [vmem:[#allocation3 + $0x70] sm:$0xff] %vm1204_vm5, %v3270_v58  ;;  %v3576_v58 = vld [vmem:[#allocation2 + $0xe0] sm:$0xff] }
 0x63a   : > { %3349 = vst.msk [vmem:[#allocation3 + $0x60] sm:$0xff] %vm1204_vm5, %v3266_v3 }
 0x63b   : > { %3362 = vst.msk [vmem:[#allocation3 + $0xc8] sm:$0xff] %vm1204_vm5, %v3292_v28 }
 0x63e   : > { %3639 = vrot.lane.b32.xlu0 %v3568_v17, %s4590_s12  ;;  %3831 = vrot.lane.b32.xlu2 %v3760_v55, %s4591_s13 }
 0x63f   : > { %3447 = vrot.lane.b32.xlu1 %v7170_v22, %s4589_s11  ;;  %v3957_v22 = vld [vmem:[#allocation2 + $0xc2] sm:$0xff] }
 0x640   : > { %v3276_v53 = vpop.permute.xlu0 %3275  ;;  %v3298_v8 = vpop.permute.xlu2 %3297 }
 0x641   : > { %v3272_v48 = vpop.permute.xlu1 %3271  ;;  %3354 = vst.msk [vmem:[#allocation3 + $0x88] sm:$0xff] %vm1204_vm5, %v3276_v53 }
 0x642   : > { %3352 = vst.msk [vmem:[#allocation3 + $0x78] sm:$0xff] %vm1204_vm5, %v3272_v48 }
 0x643   : > { %3365 = vst.msk [vmem:[#allocation3 + $0xe0] sm:$0xff] %vm1204_vm5, %v3298_v8  ;;  %v3767_v8 = vld [vmem:[#allocation2 + $0xd9] sm:$0xff] }
 0x646   : > { %4021 = vrot.lane.b32.xlu0 %v7172_v44, %s4592_s14  ;;  %3449 = vrot.lane.b32.xlu2 %v7172_v44, %s4589_s11  ;;  %v3959_v44 = vld [vmem:[#allocation2 + $0xda] sm:$0xff] }
 0x647   : > { %3829 = vrot.lane.b32.xlu1 %v3759_v29, %s4591_s13  ;;  %v3575_v29 = vld [vmem:[#allocation2 + $0xd8] sm:$0xff] }
 0x648   : > { %v3282_v27 = vpop.permute.xlu0 %3281  ;;  %v3304_v39 = vpop.permute.xlu2 %3303 }
 0x649   : > { %v3278_v6 = vpop.permute.xlu1 %3277  ;;  %3357 = vst.msk [vmem:[#allocation3 + $0xa0] sm:$0xff] %vm1204_vm5, %v3282_v27 }
 0x64a   : > { %3355 = vst.msk [vmem:[#allocation3 + $0x90] sm:$0xff] %vm1204_vm5, %v3278_v6 }
 0x64b   : > { %3368 = vst.msk [vmem:[#allocation3 + $0xf8] sm:$0xff] %vm1204_vm5, %v3304_v39 }
 0x64e   : > { %3451 = vrot.lane.b32.xlu0 %v7173_v10, %s4589_s11  ;;  %3643 = vrot.lane.b32.xlu2 %v3570_v33, %s4590_s12  ;;  %v3768_v33 = vld [vmem:[#allocation2 + $0xe1] sm:$0xff] }
 0x64f   : > { %4023 = vrot.lane.b32.xlu1 %v7173_v10, %s4592_s14  ;;  %v3960_v10 = vld [vmem:[#allocation2 + $0xe2] sm:$0xff] }
 0x650   : > { %v3288_v34 = vpop.permute.xlu0 %3287  ;;  %v3438_v30 = vpop.permute.xlu2 %3437 }
 0x651   : > { %v3284_v18 = vpop.permute.xlu1 %3283  ;;  %3360 = vst.msk [vmem:[#allocation3 + $0xb8] sm:$0xff] %vm1204_vm5, %v3288_v34 }
 0x652   : > { %3358 = vst.msk [vmem:[#allocation3 + $0xa8] sm:$0xff] %vm1204_vm5, %v3284_v18 }
 0x653   : > { %3531 = vst.msk [vmem:[#allocation3 + $0x10] sm:$0xff] %vm1397_vm6, %v3438_v30 }
 0x656   : > { %3833 = vrot.lane.b32.xlu0 %v3761_v43, %s4591_s13  ;;  %4025 = vrot.lane.b32.xlu2 %v7174_v20, %s4592_s14 }
 0x657   : > { %3641 = vrot.lane.b32.xlu1 %v3569_v26, %s4590_s12 }
 0x658   : > { %v3294_v45 = vpop.permute.xlu0 %3293  ;;  %v3626_v31 = vpop.permute.xlu2 %3625 }
 0x659   : > { %v3290_v47 = vpop.permute.xlu1 %3289  ;;  %3363 = vst.msk [vmem:[#allocation3 + $0xd0] sm:$0xff] %vm1204_vm5, %v3294_v45  ;;  %v6715_v45 = vld [vmem:[#allocation2 + $0x13a] sm:$0xff] }
 0x65a   : > { %3361 = vst.msk [vmem:[#allocation3 + $0xc0] sm:$0xff] %vm1204_vm5, %v3290_v47  ;;  %v3577_v47 = vld [vmem:[#allocation2 + $0xf0] sm:$0xff] }
 0x65e   : > { %4027 = vrot.lane.b32.xlu0 %v7175_v63, %s4592_s14  ;;  %3455 = vrot.lane.b32.xlu2 %v7175_v63, %s4589_s11 }
 0x65f   : > { %3835 = vrot.lane.b32.xlu1 %v3762_v5, %s4591_s13 }
 0x660   : > { %v3300_v19 = vpop.permute.xlu0 %3299  ;;  %v3820_v41 = vpop.permute.xlu2 %3819 }
 0x661   : > { %v3296_v13 = vpop.permute.xlu1 %3295  ;;  %3366 = vst.msk [vmem:[#allocation3 + $0xe8] sm:$0xff] %vm1204_vm5, %v3300_v19  ;;  %v3578_v19 = vld [vmem:[#allocation2 + $0xf8] sm:$0xff] }
 0x662   : > { %3364 = vst.msk [vmem:[#allocation3 + $0xd8] sm:$0xff] %vm1204_vm5, %v3296_v13  ;;  %v6724_v13 = vld [vmem:[#allocation2 + $0x142] sm:$0xff] }
 0x666   : > { %3645 = vrot.lane.b32.xlu0 %v3571_v16, %s4590_s12  ;;  %3837 = vrot.lane.b32.xlu2 %v3763_v15, %s4591_s13 }
 0x667   : > { %3453 = vrot.lane.b32.xlu1 %v7174_v20, %s4589_s11 }
 0x668   : > { %v3434_v0 = vpop.permute.xlu0 %3433  ;;  %v3630_v62 = vpop.permute.xlu2 %3629 }
 0x669   : > { %v3302_v59 = vpop.permute.xlu1 %3301  ;;  %3529 = vst.msk [vmem:[#allocation3] sm:$0xff] %vm1397_vm6, %v3434_v0 }
 0x66a   : > { %3721 = vst.msk [vmem:[#allocation3] sm:$0xff] %vm1591_vm7, %v3626_v31 }
 0x66b   : > { %3367 = vst.msk [vmem:[#allocation3 + $0xf0] sm:$0xff] %vm1204_vm5, %v3302_v59 }
 0x66c   : > { %3723 = vst.msk [vmem:[#allocation3 + $0x10] sm:$0xff] %vm1591_vm7, %v3630_v62  ;;  %v3585_v62 = vld [vmem:[#allocation2 + $0x150] sm:$0xff] }
 0x66e   : > { %3839 = vrot.lane.b32.xlu0 %v3764_v36, %s4591_s13  ;;  %4031 = vrot.lane.b32.xlu2 %v3956_v23, %s4592_s14 }
 0x66f   : > { %3647 = vrot.lane.b32.xlu1 %v3572_v4, %s4590_s12 }
 0x670   : > { %v3440_v24 = vpop.permute.xlu0 %3439  ;;  %v3824_v52 = vpop.permute.xlu2 %3823 }
 0x671   : > { %v3436_v14 = vpop.permute.xlu1 %3435  ;;  %3532 = vst.msk [vmem:[#allocation3 + $0x18] sm:$0xff] %vm1397_vm6, %v3440_v24  ;;  %v3962_v24 = vld [vmem:[#allocation2 + $0xfa] sm:$0xff] }
 0x672   : > { %3530 = vst.msk [vmem:[#allocation3 + $0x8] sm:$0xff] %vm1397_vm6, %v3436_v14 }
 0x676   : > { %3457 = vrot.lane.b32.xlu0 %v3381_v46, %s4589_s11  ;;  %3649 = vrot.lane.b32.xlu2 %v3573_v56, %s4590_s12  ;;  %v3969_v56 = vld [vmem:[#allocation2 + $0x152] sm:$0xff] }
 0x677   : > { %4029 = vrot.lane.b32.xlu1 %v3381_v46, %s4592_s14 }
 0x678   : > { %v3628_v50 = vpop.permute.xlu0 %3627  ;;  %v3444_v2 = vpop.permute.xlu2 %3443 }
 0x679   : > { %v3442_v61 = vpop.permute.xlu1 %3441  ;;  %3722 = vst.msk [vmem:[#allocation3 + $0x8] sm:$0xff] %vm1591_vm7, %v3628_v50  ;;  %v3961_v50 = vld [vmem:[#allocation2 + $0xf2] sm:$0xff] }
 0x67a   : > { %3914 = vst.msk [vmem:[#allocation3 + $0x8] sm:$0xff] %vm1784_vm8, %v3820_v41  ;;  %v3586_v41 = vld [vmem:[#allocation2 + $0x158] sm:$0xff] }
 0x67b   : > { %3533 = vst.msk [vmem:[#allocation3 + $0x20] sm:$0xff] %vm1397_vm6, %v3442_v61 }
 0x67c   : > { %3534 = vst.msk [vmem:[#allocation3 + $0x28] sm:$0xff] %vm1397_vm6, %v3444_v2 }
 0x67e   : > { %3651 = vrot.lane.b32.xlu0 %v3574_v42, %s4590_s12  ;;  %3843 = vrot.lane.b32.xlu2 %v3766_v12, %s4591_s13 }
 0x67f   : > { %3459 = vrot.lane.b32.xlu1 %v3956_v23, %s4589_s11  ;;  %v3778_v23 = vld [vmem:[#allocation2 + $0x159] sm:$0xff] }
 0x680   : > { %v4010_v11 = vpop.permute.xlu0 %4009  ;;  %v3826_v9 = vpop.permute.xlu2 %3825 }
 0x681   : > { %v3818_v7 = vpop.permute.xlu1 %3817 }
 0x682   : > { %3913 = vst.msk [vmem:[#allocation3] sm:$0xff] %vm1784_vm8, %v3818_v7 }
 0x683   : > { %4105 = vst.msk [vmem:[#allocation3] sm:$0xff] %vm1977_vm10, %v4010_v11 }
 0x686   : > { %4033 = vrot.lane.b32.xlu0 %v3957_v22, %s4592_s14  ;;  %3461 = vrot.lane.b32.xlu2 %v3957_v22, %s4589_s11 }
 0x687   : > { %3841 = vrot.lane.b32.xlu1 %v3765_v1, %s4591_s13 }
 0x688   : > { %v3632_v54 = vpop.permute.xlu0 %3631  ;;  %v4020_v25 = vpop.permute.xlu2 %4019 }
 0x689   : > { %v4012_v51 = vpop.permute.xlu1 %4011  ;;  %3724 = vst.msk [vmem:[#allocation3 + $0x18] sm:$0xff] %vm1591_vm7, %v3632_v54 }
 0x68a   : > { %3916 = vst.msk [vmem:[#allocation3 + $0x18] sm:$0xff] %vm1784_vm8, %v3824_v52  ;;  %v4137_v55 = vld [vmem:[#allocation3] sm:$0xff] }
 0x68b   : > { %4106 = vst.msk [vmem:[#allocation3 + $0x8] sm:$0xff] %vm1977_vm10, %v4012_v51  ;;  %v3579_v51 = vld [vmem:[#allocation2 + $0x108] sm:$0xff] }
 0x68e   : > { %3463 = vrot.lane.b32.xlu0 %v3384_v49, %s4589_s11  ;;  %3655 = vrot.lane.b32.xlu2 %v3576_v58, %s4590_s12 }
 0x68f   : > { %4035 = vrot.lane.b32.xlu1 %v3384_v49, %s4592_s14 }
 0x690   : > { %v4014_v3 = vpop.permute.xlu0 %4013  ;;  %v3638_v17 = vpop.permute.xlu2 %3637 }
 0x691   : > { %v3822_v28 = vpop.permute.xlu1 %3821 }
 0x692   : > { %3915 = vst.msk [vmem:[#allocation3 + $0x10] sm:$0xff] %vm1784_vm8, %v3822_v28  ;;  %v4138_v53 = vld [vmem:[#allocation3 + $0x8] sm:$0xff] }
 0x693   : > { %4107 = vst.msk [vmem:[#allocation3 + $0x10] sm:$0xff] %vm1977_vm10, %v4014_v3  ;;  %v4169_v48 = vpack.c.bf16 %v4138_v53, %v4137_v55  ;;  %v3588_v53 = vld [vmem:[#allocation2 + $0x170] sm:$0xff] }
 0x695   : > { %4525 = vmatmul.msk.bf16.vlgmr.msra.gmra.mxu2 %vm2082_vm11, %v4169_v48  ;;  %v3580_v48 = vld [vmem:[#allocation2 + $0x110] sm:$0xff] }
 0x696   : > { %3845 = vrot.lane.b32.xlu0 %v3767_v8, %s4591_s13  ;;  %4037 = vrot.lane.b32.xlu2 %v3959_v44, %s4592_s14  ;;  %v3772_v8 = vld [vmem:[#allocation2 + $0x111] sm:$0xff] }
 0x697   : > { %3653 = vrot.lane.b32.xlu1 %v3575_v29, %s4590_s12 }
 0x698   : > { %v3634_v27 = vpop.permute.xlu0 %3633  ;;  %v3832_v39 = vpop.permute.xlu2 %3831 }
 0x699   : > { %v4016_v6 = vpop.permute.xlu1 %4015  ;;  %3725 = vst.msk [vmem:[#allocation3 + $0x20] sm:$0xff] %vm1591_vm7, %v3634_v27 }
 0x69a   : > { %3917 = vst.msk [vmem:[#allocation3 + $0x20] sm:$0xff] %vm1784_vm8, %v3826_v9  ;;  %v4139_v43 = vld [vmem:[#allocation3 + $0x10] sm:$0xff] }
 0x69b   : > { %4108 = vst.msk [vmem:[#allocation3 + $0x18] sm:$0xff] %vm1977_vm10, %v4016_v6  ;;  %v3970_v9 = vld [vmem:[#allocation2 + $0x15a] sm:$0xff]  ;;  %v3779_v6 = vld [vmem:[#allocation2 + $0x169] sm:$0xff] }
 0x69e   : > { %4039 = vrot.lane.b32.xlu0 %v3960_v10, %s4592_s14  ;;  %3467 = vrot.lane.b32.xlu2 %v3960_v10, %s4589_s11  ;;  %v3963_v10 = vld [vmem:[#allocation2 + $0x10a] sm:$0xff] }
 0x69f   : > { %3847 = vrot.lane.b32.xlu1 %v3768_v33, %s4591_s13 }
 0x6a0   : > { %v3828_v34 = vpop.permute.xlu0 %3827  ;;  %v3450_v30 = vpop.permute.xlu2 %3449 }
 0x6a1   : > { %v3636_v18 = vpop.permute.xlu1 %3635  ;;  %3537 = vst.msk [vmem:[#allocation3 + $0x40] sm:$0xff] %vm1397_vm6, %v3450_v30  ;;  %v3964_v30 = vld [vmem:[#allocation2 + $0x112] sm:$0xff] }
 0x6a2   : > { %3726 = vst.msk [vmem:[#allocation3 + $0x28] sm:$0xff] %vm1591_vm7, %v3636_v18  ;;  %v4140_v26 = vld [vmem:[#allocation3 + $0x18] sm:$0xff] }
 0x6a3   : > { %3918 = vst.msk [vmem:[#allocation3 + $0x28] sm:$0xff] %vm1784_vm8, %v3828_v34  ;;  %v4170_v20 = vpack.c.bf16 %v4140_v26, %v4139_v43  ;;  %v3780_v43 = vld [vmem:[#allocation2 + $0x171] sm:$0xff] }
 0x6a4   : > { %4110 = vst.msk [vmem:[#allocation3 + $0x28] sm:$0xff] %vm1977_vm10, %v4020_v25  ;;  %v3587_v25 = vld [vmem:[#allocation2 + $0x168] sm:$0xff]  ;;  %v3972_v26 = vld [vmem:[#allocation2 + $0x172] sm:$0xff] }
 0x6a5   : > { %4526 = vmatmul.msk.bf16.gmra.mxu2 %vm2082_vm11, %v4170_v20 }
 0x6a6   : > { %3481 = vrot.lane.b32.xlu0 %v6715_v45, %s4589_s11  ;;  %3657 = vrot.lane.b32.xlu2 %v3577_v47, %s4590_s12 }
 0x6a7   : > { %3465 = vrot.lane.b32.xlu1 %v3959_v44, %s4589_s11 }
 0x6a8   : > { %v3446_v31 = vpop.permute.xlu0 %3445  ;;  %v3644_v63 = vpop.permute.xlu2 %3643 }
 0x6a9   : > { %v4018_v5 = vpop.permute.xlu1 %4017  ;;  %3535 = vst.msk [vmem:[#allocation3 + $0x30] sm:$0xff] %vm1397_vm6, %v3446_v31 }
 0x6aa   : > { %3727 = vst.msk [vmem:[#allocation3 + $0x30] sm:$0xff] %vm1591_vm7, %v3638_v17 }
 0x6ab   : > { %4109 = vst.msk [vmem:[#allocation3 + $0x20] sm:$0xff] %vm1977_vm10, %v4018_v5  ;;  %v4142_v0 = vld [vmem:[#allocation3 + $0x28] sm:$0xff] }
 0x6ae   : > { %3659 = vrot.lane.b32.xlu0 %v3578_v19, %s4590_s12  ;;  %3675 = vrot.lane.b32.xlu2 %v3586_v41, %s4590_s12  ;;  %v3971_v41 = vld [vmem:[#allocation2 + $0x16a] sm:$0xff] }
 0x6af   : > { %3483 = vrot.lane.b32.xlu1 %v6724_v13, %s4589_s11 }
 0x6b0   : > { %v3640_v16 = vpop.permute.xlu0 %3639  ;;  %v4026_v15 = vpop.permute.xlu2 %4025 }
 0x6b1   : > { %v3448_v37 = vpop.permute.xlu1 %3447 }
 0x6b2   : > { %3536 = vst.msk [vmem:[#allocation3 + $0x38] sm:$0xff] %vm1397_vm6, %v3448_v37  ;;  %v4141_v60 = vld [vmem:[#allocation3 + $0x20] sm:$0xff] }
 0x6b3   : > { %3728 = vst.msk [vmem:[#allocation3 + $0x38] sm:$0xff] %vm1591_vm7, %v3640_v16  ;;  %v4171_v59 = vpack.c.bf16 %v4142_v0, %v4141_v60  ;;  %v3582_v60 = vld [vmem:[#allocation2 + $0x128] sm:$0xff] }
 0x6b4   : > { %3920 = vst.msk [vmem:[#allocation3 + $0x38] sm:$0xff] %vm1784_vm8, %v3832_v39  ;;  %v3771_v39 = vld [vmem:[#allocation2 + $0x109] sm:$0xff] }
 0x6b5   : > { %4527 = vmatmul.msk.bf16.gmra.mxu2 %vm2082_vm11, %v4171_v59 }
 0x6b6   : > { %3849 = vrot.lane.b32.xlu0 %v3769_v35, %s4591_s13  ;;  %3865 = vrot.lane.b32.xlu2 %v3777_v32, %s4591_s13  ;;  %v3581_v32 = vld [vmem:[#allocation2 + $0x120] sm:$0xff] }
 0x6b7   : > { %3673 = vrot.lane.b32.xlu1 %v3585_v62, %s4590_s12  ;;  %v3589_v62 = vld [vmem:[#allocation2 + $0x180] sm:$0xff] }
 0x6b8   : > { %v4022_v40 = vpop.permute.xlu0 %4021  ;;  %v3456_v4 = vpop.permute.xlu2 %3455 }
 0x6b9   : > { %v3830_v36 = vpop.permute.xlu1 %3829  ;;  %3540 = vst.msk [vmem:[#allocation3 + $0x58] sm:$0xff] %vm1397_vm6, %v3456_v4 }
 0x6ba   : > { %3919 = vst.msk [vmem:[#allocation3 + $0x30] sm:$0xff] %vm1784_vm8, %v3830_v36 }
 0x6bb   : > { %4111 = vst.msk [vmem:[#allocation3 + $0x30] sm:$0xff] %vm1977_vm10, %v4022_v40  ;;  %v3773_v40 = vld [vmem:[#allocation2 + $0x121] sm:$0xff] }
 0x6be   : > { %3867 = vrot.lane.b32.xlu0 %v3778_v23, %s4591_s13  ;;  %4043 = vrot.lane.b32.xlu2 %v3962_v24, %s4592_s14 }
 0x6bf   : > { %3851 = vrot.lane.b32.xlu1 %v3770_v57, %s4591_s13 }
 0x6c0   : > { %v3452_v14 = vpop.permute.xlu0 %3451  ;;  %v3838_v46 = vpop.permute.xlu2 %3837 }
 0x6c1   : > { %v4024_v52 = vpop.permute.xlu1 %4023  ;;  %3538 = vst.msk [vmem:[#allocation3 + $0x48] sm:$0xff] %vm1397_vm6, %v3452_v14 }
 0x6c2   : > { %3730 = vst.msk [vmem:[#allocation3 + $0x48] sm:$0xff] %vm1591_vm7, %v3644_v63  ;;  %v4143_v12 = vld [vmem:[#allocation3 + $0x30] sm:$0xff] }
 0x6c3   : > { %4112 = vst.msk [vmem:[#allocation3 + $0x38] sm:$0xff] %vm1977_vm10, %v4024_v52  ;;  %v3774_v52 = vld [vmem:[#allocation2 + $0x129] sm:$0xff] }
 0x6c6   : > { %4057 = vrot.lane.b32.xlu0 %v3969_v56, %s4592_s14  ;;  %3469 = vrot.lane.b32.xlu2 %v3961_v50, %s4589_s11 }
 0x6c7   : > { %4041 = vrot.lane.b32.xlu1 %v3961_v50, %s4592_s14 }
 0x6c8   : > { %v3834_v61 = vpop.permute.xlu0 %3833  ;;  %v4032_v42 = vpop.permute.xlu2 %4031 }
 0x6c9   : > { %v3642_v2 = vpop.permute.xlu1 %3641 }
 0x6ca   : > { %3729 = vst.msk [vmem:[#allocation3 + $0x40] sm:$0xff] %vm1591_vm7, %v3642_v2  ;;  %v4144_v11 = vld [vmem:[#allocation3 + $0x38] sm:$0xff] }
 0x6cb   : > { %3921 = vst.msk [vmem:[#allocation3 + $0x40] sm:$0xff] %vm1784_vm8, %v3834_v61  ;;  %v4172_v7 = vpack.c.bf16 %v4144_v11, %v4143_v12  ;;  %v3965_v2 = vld [vmem:[#allocation2 + $0x122] sm:$0xff] }
 0x6cc   : > { %4113 = vst.msk [vmem:[#allocation3 + $0x40] sm:$0xff] %vm1977_vm10, %v4026_v15 }
 0x6cd   : > { %4528 = vmatmul.msk.bf16.gmra.mxu2 %vm2082_vm11, %v4172_v7 }
 0x6ce   : > { %3471 = vrot.lane.b32.xlu0 %v3962_v24, %s4589_s11  ;;  %3487 = vrot.lane.b32.xlu2 %v3970_v9, %s4589_s11 }
 0x6cf   : > { %4059 = vrot.lane.b32.xlu1 %v3970_v9, %s4592_s14 }
 0x6d0   : > { %v4028_v22 = vpop.permute.xlu0 %4027  ;;  %v3650_v54 = vpop.permute.xlu2 %3649 }
 0x6d1   : > { %v3836_v1 = vpop.permute.xlu1 %3835 }
 0x6d2   : > { %3922 = vst.msk [vmem:[#allocation3 + $0x48] sm:$0xff] %vm1784_vm8, %v3836_v1 }
 0x6d3   : > { %4114 = vst.msk [vmem:[#allocation3 + $0x48] sm:$0xff] %vm1977_vm10, %v4028_v22  ;;  %v4145_v28 = vld [vmem:[#allocation3 + $0x40] sm:$0xff] }
 0x6d6   : > { %3661 = vrot.lane.b32.xlu0 %v3579_v51, %s4590_s12  ;;  %3677 = vrot.lane.b32.xlu2 %v3587_v25, %s4590_s12  ;;  %v3974_v25 = vld [vmem:[#allocation2 + $0x18a] sm:$0xff] }
 0x6d7   : > { %3485 = vrot.lane.b32.xlu1 %v3969_v56, %s4589_s11 }
 0x6d8   : > { %v3646_v49 = vpop.permute.xlu0 %3645  ;;  %v3844_v3 = vpop.permute.xlu2 %3843 }
 0x6d9   : > { %v3454_v58 = vpop.permute.xlu1 %3453 }
 0x6da   : > { %3539 = vst.msk [vmem:[#allocation3 + $0x50] sm:$0xff] %vm1397_vm6, %v3454_v58  ;;  %v4146_v17 = vld [vmem:[#allocation3 + $0x48] sm:$0xff] }
 0x6db   : > { %3731 = vst.msk [vmem:[#allocation3 + $0x50] sm:$0xff] %vm1591_vm7, %v3646_v49  ;;  %v4173_v55 = vpack.c.bf16 %v4146_v17, %v4145_v28  ;;  %v3966_v49 = vld [vmem:[#allocation2 + $0x12a] sm:$0xff] }
 0x6dc   : > { %3923 = vst.msk [vmem:[#allocation3 + $0x50] sm:$0xff] %vm1784_vm8, %v3838_v46  ;;  %v3590_v46 = vld [vmem:[#allocation2 + $0x188] sm:$0xff] }
 0x6dd   : > { %4529 = vmatmul.msk.bf16.gmra.mxu2 %vm2082_vm11, %v4173_v55 }
 0x6de   : > { %3679 = vrot.lane.b32.xlu0 %v3588_v53, %s4590_s12  ;;  %3855 = vrot.lane.b32.xlu2 %v3772_v8, %s4591_s13 }
 0x6df   : > { %3663 = vrot.lane.b32.xlu1 %v3580_v48, %s4590_s12  ;;  %v3583_v48 = vld [vmem:[#allocation2 + $0x138] sm:$0xff] }
 0x6e0   : > { %v3840_v29 = vpop.permute.xlu0 %3839  ;;  %v3462_v27 = vpop.permute.xlu2 %3461 }
 0x6e1   : > { %v3648_v44 = vpop.permute.xlu1 %3647  ;;  %3543 = vst.msk [vmem:[#allocation3 + $0x70] sm:$0xff] %vm1397_vm6, %v3462_v27 }
 0x6e2   : > { %3732 = vst.msk [vmem:[#allocation3 + $0x58] sm:$0xff] %vm1591_vm7, %v3648_v44 }
 0x6e3   : > { %3924 = vst.msk [vmem:[#allocation3 + $0x58] sm:$0xff] %vm1784_vm8, %v3840_v29 }
 0x6e4   : > { %4116 = vst.msk [vmem:[#allocation3 + $0x58] sm:$0xff] %vm1977_vm10, %v4032_v42  ;;  %v6813_v42 = vld [vmem:[%s7023_s6] ss:$0 sm:$0xff] }
 0x6e6   : > { %3869 = vrot.lane.b32.xlu0 %v3779_v6, %s4591_s13  ;;  %4045 = vrot.lane.b32.xlu2 %v3963_v10, %s4592_s14 }
 0x6e7   : > { %3853 = vrot.lane.b32.xlu1 %v3771_v39, %s4591_s13 }
 0x6e8   : > { %v3458_v33 = vpop.permute.xlu0 %3457  ;;  %v3656_v18 = vpop.permute.xlu2 %3655 }
 0x6e9   : > { %v4030_v34 = vpop.permute.xlu1 %4029  ;;  %3541 = vst.msk [vmem:[#allocation3 + $0x60] sm:$0xff] %vm1397_vm6, %v3458_v33  ;;  %v3584_v33 = vld [vmem:[#allocation2 + $0x140] sm:$0xff] }
 0x6ea   : > { %3733 = vst.msk [vmem:[#allocation3 + $0x60] sm:$0xff] %vm1591_vm7, %v3650_v54 }
 0x6eb   : > { %4115 = vst.msk [vmem:[#allocation3 + $0x50] sm:$0xff] %vm1977_vm10, %v4030_v34  ;;  %v4148_v63 = vld [vmem:[#allocation3 + $0x58] sm:$0xff] }
 0x6ee   : > { %4047 = vrot.lane.b32.xlu0 %v3964_v30, %s4592_s14  ;;  %4063 = vrot.lane.b32.xlu2 %v3972_v26, %s4592_s14 }
 0x6ef   : > { %3871 = vrot.lane.b32.xlu1 %v3780_v43, %s4591_s13 }
 0x6f0   : > { %v3652_v20 = vpop.permute.xlu0 %3651  ;;  %v4038_v31 = vpop.permute.xlu2 %4037 }
 0x6f1   : > { %v3460_v47 = vpop.permute.xlu1 %3459 }
 0x6f2   : > { %3542 = vst.msk [vmem:[#allocation3 + $0x68] sm:$0xff] %vm1397_vm6, %v3460_v47  ;;  %v4147_v5 = vld [vmem:[#allocation3 + $0x50] sm:$0xff]  ;;  %v3591_v47 = vld [vmem:[#allocation2 + $0x198] sm:$0xff] }
 0x6f3   : > { %3734 = vst.msk [vmem:[#allocation3 + $0x68] sm:$0xff] %vm1591_vm7, %v3652_v20  ;;  %v4174_v19 = vpack.c.bf16 %v4148_v63, %v4147_v5  ;;  %v3775_v5 = vld [vmem:[#allocation2 + $0x139] sm:$0xff] }
 0x6f4   : > { %3926 = vst.msk [vmem:[#allocation3 + $0x68] sm:$0xff] %vm1784_vm8, %v3844_v3 }
 0x6f5   : > { %4530 = vmatmul.msk.bf16.gmra.mxu2 %vm2082_vm11, %v4174_v19 }
 0x6f6   : > { %3473 = vrot.lane.b32.xlu0 %v3963_v10, %s4589_s11  ;;  %3489 = vrot.lane.b32.xlu2 %v3971_v41, %s4589_s11  ;;  %v3592_v10 = vld [vmem:[#allocation2 + $0x1a0] sm:$0xff] }
 0x6f7   : > { %4061 = vrot.lane.b32.xlu1 %v3971_v41, %s4592_s14 }
 0x6f8   : > { %v4034_v16 = vpop.permute.xlu0 %4033  ;;  %v3468_v15 = vpop.permute.xlu2 %3467 }
 0x6f9   : > { %v3842_v37 = vpop.permute.xlu1 %3841  ;;  %3546 = vst.msk [vmem:[#allocation3 + $0x88] sm:$0xff] %vm1397_vm6, %v3468_v15 }
 0x6fa   : > { %3925 = vst.msk [vmem:[#allocation3 + $0x60] sm:$0xff] %vm1784_vm8, %v3842_v37 }
 0x6fb   : > { %4117 = vst.msk [vmem:[#allocation3 + $0x60] sm:$0xff] %vm1977_vm10, %v4034_v16 }
 0x6fe   : > { %3491 = vrot.lane.b32.xlu0 %v3972_v26, %s4589_s11  ;;  %3667 = vrot.lane.b32.xlu2 %v3582_v60, %s4590_s12  ;;  %v3784_v60 = vld [vmem:[#allocation2 + $0x1a1] sm:$0xff] }
 0x6ff   : > { %3475 = vrot.lane.b32.xlu1 %v3964_v30, %s4589_s11 }
 0x700   : > { %v3464_v0 = vpop.permute.xlu0 %3463  ;;  %v3658_v35 = vpop.permute.xlu2 %3657 }
 0x701   : > { %v4036_v59 = vpop.permute.xlu1 %4035  ;;  %3544 = vst.msk [vmem:[#allocation3 + $0x78] sm:$0xff] %vm1397_vm6, %v3464_v0  ;;  %v3776_v0 = vld [vmem:[#allocation2 + $0x141] sm:$0xff] }
 0x702   : > { %3736 = vst.msk [vmem:[#allocation3 + $0x78] sm:$0xff] %vm1591_vm7, %v3656_v18  ;;  %v4149_v57 = vld [vmem:[#allocation3 + $0x60] sm:$0xff] }
 0x703   : > { %4118 = vst.msk [vmem:[#allocation3 + $0x68] sm:$0xff] %vm1977_vm10, %v4036_v59 }
 0x706   : > { %3681 = vrot.lane.b32.xlu0 %v3589_v62, %s4590_s12  ;;  %3857 = vrot.lane.b32.xlu2 %v3773_v40, %s4591_s13 }
 0x707   : > { %3665 = vrot.lane.b32.xlu1 %v3581_v32, %s4590_s12 }
 0x708   : > { %v3846_v36 = vpop.permute.xlu0 %3845  ;;  %v3676_v23 = vpop.permute.xlu2 %3675 }
 0x709   : > { %v3654_v4 = vpop.permute.xlu1 %3653 }
 0x70a   : > { %3735 = vst.msk [vmem:[#allocation3 + $0x70] sm:$0xff] %vm1591_vm7, %v3654_v4  ;;  %v4150_v24 = vld [vmem:[#allocation3 + $0x68] sm:$0xff] }
 0x70b   : > { %3927 = vst.msk [vmem:[#allocation3 + $0x70] sm:$0xff] %vm1784_vm8, %v3846_v36  ;;  %v4175_v14 = vpack.c.bf16 %v4150_v24, %v4149_v57  ;;  %v3975_v24 = vld [vmem:[#allocation2 + $0x19a] sm:$0xff] }
 0x70c   : > { %4119 = vst.msk [vmem:[#allocation3 + $0x70] sm:$0xff] %vm1977_vm10, %v4038_v31  ;;  %v3783_v31 = vld [vmem:[#allocation2 + $0x199] sm:$0xff] }
 0x70d   : > { %4531 = vmatmul.msk.bf16.gmra.mxu2 %vm2082_vm11, %v4175_v14 }
 0x70e   : > { %3859 = vrot.lane.b32.xlu0 %v3774_v52, %s4591_s13  ;;  %3875 = vrot.lane.b32.xlu2 %v6540_v38, %s4591_s13  ;;  %v3973_v38 = vld [vmem:[#allocation2 + $0x182] sm:$0xff] }
 0x70f   : > { %3683 = vrot.lane.b32.xlu1 %v3590_v46, %s4590_s12 }
 0x710   : > { %v4040_v56 = vpop.permute.xlu0 %4039  ;;  %v3866_v61 = vpop.permute.xlu2 %3865 }
 0x711   : > { %v3848_v50 = vpop.permute.xlu1 %3847 }
 0x712   : > { %3928 = vst.msk [vmem:[#allocation3 + $0x78] sm:$0xff] %vm1784_vm8, %v3848_v50 }
 0x713   : > { %4120 = vst.msk [vmem:[#allocation3 + $0x78] sm:$0xff] %vm1977_vm10, %v4040_v56  ;;  %v4151_v1 = vld [vmem:[#allocation3 + $0x70] sm:$0xff] }
 0x716   : > { %4049 = vrot.lane.b32.xlu0 %v3965_v2, %s4592_s14  ;;  %4065 = vrot.lane.b32.xlu2 %v3973_v38, %s4592_s14 }
 0x717   : > { %3873 = vrot.lane.b32.xlu1 %v6547_v21, %s4591_s13 }
 0x718   : > { %v4269_v12 = vpop.f32.mrf.mxu2  ;;  %v3482_v11 = vpop.permute.xlu0 %3481 }
 0x719   : > { %v4270_v7 = vadd.f32 %v6813_v42, %v4269_v12  ;;  %3553 = vst.msk [vmem:[#allocation3 + $0xc0] sm:$0xff] %vm1397_vm6, %v3482_v11  ;;  %v3466_v9 = vpop.permute.xlu1 %3465  ;;  %v4044_v22 = vpop.permute.xlu2 %4043 }
 0x71a   : > { %v4152_v54 = vld [vmem:[#allocation3 + $0x78] sm:$0xff]  ;;  %3545 = vst.msk [vmem:[#allocation3 + $0x80] sm:$0xff] %vm1397_vm6, %v3466_v9 }
 0x71b   : > { %v4176_v21 = vpack.c.bf16 %v4152_v54, %v4151_v1  ;;  %v4349_v51 = vmax.f32 %v4270_v7, 0.0  ;;  %3737 = vst.msk [vmem:[#allocation3 + $0x80] sm:$0xff] %vm1591_vm7, %v3658_v35 }
 0x71d   : > { %4381 = vst.msk [vmem:[%s6826_s21] sm:$0xff] %vm2277_vm13, %v4349_v51  ;;  %4532 = vmatmul.msk.bf16.gmra.mxu2 %vm2082_vm11, %v4176_v21 }
 0x71e   : > { %4067 = vrot.lane.b32.xlu0 %v3974_v25, %s4592_s14  ;;  %3479 = vrot.lane.b32.xlu2 %v3966_v49, %s4589_s11 }
 0x71f   : > { %4051 = vrot.lane.b32.xlu1 %v3966_v49, %s4592_s14 }
 0x720   : > { %v4271_v58 = vpop.f32.mrf.mxu2  ;;  %v3660_v3 = vpop.permute.xlu0 %3659 }
 0x721   : > { %v4272_v28 = vadd.f32 %v6813_v42, %v4271_v58  ;;  %3738 = vst.msk [vmem:[#allocation3 + $0x88] sm:$0xff] %vm1591_vm7, %v3660_v3  ;;  %v3484_v17 = vpop.permute.xlu1 %3483  ;;  %v3470_v55 = vpop.permute.xlu2 %3469 }
 0x722   : > { %3554 = vst.msk [vmem:[#allocation3 + $0xc8] sm:$0xff] %vm1397_vm6, %v3484_v17 }
 0x723   : > { %v4350_v53 = vmax.f32 %v4272_v28, 0.0  ;;  %3746 = vst.msk [vmem:[#allocation3 + $0xc8] sm:$0xff] %vm1591_vm7, %v3676_v23 }
 0x724   : > { %3547 = vst.msk [vmem:[#allocation3 + $0x90] sm:$0xff] %vm1397_vm6, %v3470_v55 }
 0x725   : > { %4382 = vst.msk [vmem:[%s6826_s21 + $0x8] sm:$0xff] %vm2277_vm13, %v4350_v53 }
 0x726   : > { %3493 = vrot.lane.b32.xlu0 %v3973_v38, %s4589_s11  ;;  %3669 = vrot.lane.b32.xlu2 %v3583_v48, %s4590_s12 }
 0x727   : > { %3477 = vrot.lane.b32.xlu1 %v3965_v2, %s4589_s11 }
 0x728   : > { %v4274_v8 = vpop.f32.mrf.mxu2  ;;  %v3850_v29 = vpop.permute.xlu0 %3849 }
 0x729   : > { %v4275_v44 = vadd.f32 %v6813_v42, %v4274_v8  ;;  %3929 = vst.msk [vmem:[#allocation3 + $0x80] sm:$0xff] %vm1784_vm8, %v3850_v29  ;;  %v3674_v27 = vpop.permute.xlu1 %3673  ;;  %v3488_v6 = vpop.permute.xlu2 %3487 }
 0x72a   : > { %3745 = vst.msk [vmem:[#allocation3 + $0xc0] sm:$0xff] %vm1591_vm7, %v3674_v27 }
 0x72b   : > { %v4351_v39 = vmax.f32 %v4275_v44, 0.0  ;;  %3937 = vst.msk [vmem:[#allocation3 + $0xc0] sm:$0xff] %vm1784_vm8, %v3866_v61  ;;  %v3976_v61 = vld [vmem:[#allocation2 + $0x1a2] sm:$0xff] }
 0x72c   : > { %3556 = vst.msk [vmem:[#allocation3 + $0xd8] sm:$0xff] %vm1397_vm6, %v3488_v6 }
 0x72d   : > { %4383 = vst.msk [vmem:[%s6826_s21 + $0x10] sm:$0xff] %vm2277_vm13, %v4351_v39 }
 0x72e   : > { %3671 = vrot.lane.b32.xlu0 %v3584_v33, %s4590_s12  ;;  %3687 = vrot.lane.b32.xlu2 %v3592_v10, %s4590_s12 }
 0x72f   : > { %3495 = vrot.lane.b32.xlu1 %v3974_v25, %s4589_s11 }
 0x730   : > { %v4276_v34 = vpop.f32.mrf.mxu2  ;;  %v3868_v18 = vpop.permute.xlu0 %3867 }
 0x731   : > { %v4277_v30 = vadd.f32 %v6813_v42, %v4276_v34  ;;  %3938 = vst.msk [vmem:[#allocation3 + $0xc8] sm:$0xff] %vm1784_vm8, %v3868_v18  ;;  %v3852_v43 = vpop.permute.xlu1 %3851  ;;  %v3678_v26 = vpop.permute.xlu2 %3677 }
 0x732   : > { %3930 = vst.msk [vmem:[#allocation3 + $0x88] sm:$0xff] %vm1784_vm8, %v3852_v43 }
 0x733   : > { %v4352_v20 = vmax.f32 %v4277_v30, 0.0  ;;  %4122 = vst.msk [vmem:[#allocation3 + $0x88] sm:$0xff] %vm1977_vm10, %v4044_v22 }
 0x735   : > { %4384 = vst.msk [vmem:[%s6826_s21 + $0x18] sm:$0xff] %vm2277_vm13, %v4352_v20 }
 0x736   : > { %3861 = vrot.lane.b32.xlu0 %v3775_v5, %s4591_s13  ;;  %3877 = vrot.lane.b32.xlu2 %v3783_v31, %s4591_s13 }
 0x737   : > { %3685 = vrot.lane.b32.xlu1 %v3591_v47, %s4590_s12 }
 0x738   : > { %v4279_v63 = vpop.f32.mrf.mxu2  ;;  %v4058_v19 = vpop.permute.xlu0 %4057 }
 0x739   : > { %v4280_v41 = vadd.f32 %v6813_v42, %v4279_v63  ;;  %4129 = vst.msk [vmem:[#allocation3 + $0xc0] sm:$0xff] %vm1977_vm10, %v4058_v19  ;;  %v4042_v16 = vpop.permute.xlu1 %4041  ;;  %v3856_v37 = vpop.permute.xlu2 %3855 }
 0x73a   : > { %4121 = vst.msk [vmem:[#allocation3 + $0x80] sm:$0xff] %vm1977_vm10, %v4042_v16  ;;  %v4154_v4 = vld [vmem:[#allocation3 + $0x88] sm:$0xff] }
 0x73b   : > { %v4353_v15 = vmax.f32 %v4280_v41, 0.0 }
 0x73d   : > { %4385 = vst.msk [vmem:[%s6826_s21 + $0x20] sm:$0xff] %vm2277_vm13, %v4353_v15 }
 0x73e   : > { %3879 = vrot.lane.b32.xlu0 %v3784_v60, %s4591_s13  ;;  %4055 = vrot.lane.b32.xlu2 %v6724_v13, %s4592_s14 }
 0x73f   : > { %3863 = vrot.lane.b32.xlu1 %v3776_v0, %s4591_s13 }
 0x740   : > { %v4281_v59 = vpop.f32.mrf.mxu2  ;;  %v3472_v35 = vpop.permute.xlu0 %3471  ;;  %v4161_v46 = vld [vmem:[#allocation3 + $0xc0] sm:$0xff] }
 0x741   : > { %v4282_v62 = vadd.f32 %v6813_v42, %v4281_v59  ;;  %3548 = vst.msk [vmem:[#allocation3 + $0x98] sm:$0xff] %vm1397_vm6, %v3472_v35  ;;  %v4060_v32 = vpop.permute.xlu1 %4059  ;;  %v4046_v40 = vpop.permute.xlu2 %4045  ;;  %v4153_v36 = vld [vmem:[#allocation3 + $0x80] sm:$0xff] }
 0x742   : > { %4130 = vst.msk [vmem:[#allocation3 + $0xc8] sm:$0xff] %vm1977_vm10, %v4060_v32  ;;  %v4177_v23 = vpack.c.bf16 %v4154_v4, %v4153_v36 }
 0x743   : > { %v4354_v57 = vmax.f32 %v4282_v62, 0.0 }
 0x744   : > { %4533 = vmatmul.msk.bf16.gmra.mxu2 %vm2082_vm11, %v4177_v23 }
 0x745   : > { %4386 = vst.msk [vmem:[%s6826_s21 + $0x28] sm:$0xff] %vm2277_vm13, %v4354_v57 }
 0x746   : > { %4069 = vrot.lane.b32.xlu0 %v3975_v24, %s4592_s14 }
 0x747   : > { %4053 = vrot.lane.b32.xlu1 %v6715_v45, %s4592_s14 }
 0x748   : > { %v3662_v13 = vpop.permute.xlu0 %3661 }
 0x749   : > { %3739 = vst.msk [vmem:[#allocation3 + $0x90] sm:$0xff] %vm1591_vm7, %v3662_v13  ;;  %v3486_v14 = vpop.permute.xlu1 %3485  ;;  %v4064_v52 = vpop.permute.xlu2 %4063  ;;  %v4162_v56 = vld [vmem:[#allocation3 + $0xc8] sm:$0xff] }
 0x74a   : > { %3555 = vst.msk [vmem:[#allocation3 + $0xd0] sm:$0xff] %vm1397_vm6, %v3486_v14  ;;  %v4181_v50 = vpack.c.bf16 %v4162_v56, %v4161_v46 }
 0x74b   : > { %3747 = vst.msk [vmem:[#allocation3 + $0xd0] sm:$0xff] %vm1591_vm7, %v3678_v26 }
 0x74c   : > { %4537 = vmatmul.msk.bf16.vlgmr.msra.gmra.mxu3 %vm2082_vm11, %v4181_v50 }
 0x74f   : > { %4071 = vrot.lane.b32.xlu1 %v3976_v61, %s4592_s14 }
 0x750   : > { %v4284_v45 = vpop.f32.mrf.mxu2  ;;  %v3680_v2 = vpop.permute.xlu0 %3679 }
 0x751   : > { %v4285_v38 = vadd.f32 %v6813_v42, %v4284_v45  ;;  %3748 = vst.msk [vmem:[#allocation3 + $0xd8] sm:$0xff] %vm1591_vm7, %v3680_v2  ;;  %v3664_v12 = vpop.permute.xlu1 %3663  ;;  %v3490_v11 = vpop.permute.xlu2 %3489 }
 0x752   : > { %3740 = vst.msk [vmem:[#allocation3 + $0x98] sm:$0xff] %vm1591_vm7, %v3664_v12 }
 0x753   : > { %v4355_v7 = vmax.f32 %v4285_v38, 0.0  ;;  %3932 = vst.msk [vmem:[#allocation3 + $0x98] sm:$0xff] %vm1784_vm8, %v3856_v37 }
 0x754   : > { %3557 = vst.msk [vmem:[#allocation3 + $0xe0] sm:$0xff] %vm1397_vm6, %v3490_v11 }
 0x755   : > { %4387 = vst.msk [vmem:[%s6826_s21 + $0x30] sm:$0xff] %vm2277_vm13, %v4355_v7 }
 0x758   : > { %v4286_v9 = vpop.f32.mrf.mxu2  ;;  %v3870_v22 = vpop.permute.xlu0 %3869 }
 0x759   : > { %v4287_v1 = vadd.f32 %v6813_v42, %v4286_v9  ;;  %3939 = vst.msk [vmem:[#allocation3 + $0xd0] sm:$0xff] %vm1784_vm8, %v3870_v22  ;;  %v3854_v54 = vpop.permute.xlu1 %3853  ;;  %v3668_v21 = vpop.permute.xlu2 %3667 }
 0x75a   : > { %3931 = vst.msk [vmem:[#allocation3 + $0x90] sm:$0xff] %vm1784_vm8, %v3854_v54 }
 0x75b   : > { %v4356_v51 = vmax.f32 %v4287_v1, 0.0  ;;  %4123 = vst.msk [vmem:[#allocation3 + $0x90] sm:$0xff] %vm1977_vm10, %v4046_v40 }
 0x75d   : > { %4388 = vst.msk [vmem:[%s6826_s21 + $0x38] sm:$0xff] %vm2277_vm13, %v4356_v51 }
 0x760   : > { %v4289_v25 = vpop.f32.mrf.mxu2  ;;  %v4048_v49 = vpop.permute.xlu0 %4047 }
 0x761   : > { %v4290_v58 = vadd.f32 %v6813_v42, %v4289_v25  ;;  %4124 = vst.msk [vmem:[#allocation3 + $0x98] sm:$0xff] %vm1977_vm10, %v4048_v49  ;;  %v3872_v3 = vpop.permute.xlu1 %3871  ;;  %v3858_v28 = vpop.permute.xlu2 %3857 }
 0x762   : > { %3940 = vst.msk [vmem:[#allocation3 + $0xd8] sm:$0xff] %vm1784_vm8, %v3872_v3  ;;  %v4155_v48 = vld [vmem:[#allocation3 + $0x90] sm:$0xff] }
 0x763   : > { %v4357_v17 = vmax.f32 %v4290_v58, 0.0  ;;  %4132 = vst.msk [vmem:[#allocation3 + $0xd8] sm:$0xff] %vm1977_vm10, %v4064_v52 }
 0x765   : > { %4389 = vst.msk [vmem:[%s6826_s21 + $0x40] sm:$0xff] %vm2277_vm13, %v4357_v17 }
 0x768   : > { %v4291_v55 = vpop.f32.mrf.mxu2  ;;  %v3474_v53 = vpop.permute.xlu0 %3473  ;;  %v4156_v8 = vld [vmem:[#allocation3 + $0x98] sm:$0xff] }
 0x769   : > { %v4292_v29 = vadd.f32 %v6813_v42, %v4291_v55  ;;  %3549 = vst.msk [vmem:[#allocation3 + $0xa0] sm:$0xff] %vm1397_vm6, %v3474_v53  ;;  %v4062_v44 = vpop.permute.xlu1 %4061  ;;  %v3876_v27 = vpop.permute.xlu2 %3875  ;;  %v4178_v6 = vpack.c.bf16 %v4156_v8, %v4155_v48 }
 0x76a   : > { %4131 = vst.msk [vmem:[#allocation3 + $0xd0] sm:$0xff] %vm1977_vm10, %v4062_v44  ;;  %v4164_v30 = vld [vmem:[#allocation3 + $0xd8] sm:$0xff] }
 0x76b   : > { %v4358_v39 = vmax.f32 %v4292_v29, 0.0  ;;  %4534 = vmatmul.msk.bf16.gmra.mxu2 %vm2082_vm11, %v4178_v6 }
 0x76d   : > { %4390 = vst.msk [vmem:[%s6826_s21 + $0x48] sm:$0xff] %vm2277_vm13, %v4358_v39 }
 0x770   : > { %v3492_v10 = vpop.permute.xlu0 %3491 }
 0x771   : > { %3558 = vst.msk [vmem:[#allocation3 + $0xe8] sm:$0xff] %vm1397_vm6, %v3492_v10  ;;  %v3476_v33 = vpop.permute.xlu1 %3475  ;;  %v4066_v34 = vpop.permute.xlu2 %4065  ;;  %v4163_v18 = vld [vmem:[#allocation3 + $0xd0] sm:$0xff] }
 0x772   : > { %3550 = vst.msk [vmem:[#allocation3 + $0xa8] sm:$0xff] %vm1397_vm6, %v3476_v33  ;;  %v4182_v43 = vpack.c.bf16 %v4164_v30, %v4163_v18 }
 0x773   : > { %3742 = vst.msk [vmem:[#allocation3 + $0xa8] sm:$0xff] %vm1591_vm7, %v3668_v21 }
 0x774   : > { %4538 = vmatmul.msk.bf16.gmra.mxu3 %vm2082_vm11, %v4182_v43 }
 0x778   : > { %v4294_v26 = vpop.f32.mrf.mxu2  ;;  %v3682_v20 = vpop.permute.xlu0 %3681 }
 0x779   : > { %v4295_v47 = vadd.f32 %v6813_v42, %v4294_v26  ;;  %3749 = vst.msk [vmem:[#allocation3 + $0xe0] sm:$0xff] %vm1591_vm7, %v3682_v20  ;;  %v3666_v31 = vpop.permute.xlu1 %3665  ;;  %v3480_v5 = vpop.permute.xlu2 %3479 }
 0x77a   : > { %3741 = vst.msk [vmem:[#allocation3 + $0xa0] sm:$0xff] %vm1591_vm7, %v3666_v31 }
 0x77b   : > { %v4359_v63 = vmax.f32 %v4295_v47, 0.0  ;;  %3933 = vst.msk [vmem:[#allocation3 + $0xa0] sm:$0xff] %vm1784_vm8, %v3858_v28 }
 0x77c   : > { %3552 = vst.msk [vmem:[#allocation3 + $0xb8] sm:$0xff] %vm1397_vm6, %v3480_v5 }
 0x77d   : > { %4391 = vst.msk [vmem:[%s6826_s21 + $0x50] sm:$0xff] %vm2277_vm13, %v4359_v63 }
 0x780   : > { %v4296_v19 = vpop.f32.mrf.mxu2  ;;  %v3860_v41 = vpop.permute.xlu0 %3859 }
 0x781   : > { %v4297_v16 = vadd.f32 %v6813_v42, %v4296_v19  ;;  %3934 = vst.msk [vmem:[#allocation3 + $0xa8] sm:$0xff] %vm1784_vm8, %v3860_v41  ;;  %v3684_v37 = vpop.permute.xlu1 %3683  ;;  %v3670_v40 = vpop.permute.xlu2 %3669 }
 0x782   : > { %3750 = vst.msk [vmem:[#allocation3 + $0xe8] sm:$0xff] %vm1591_vm7, %v3684_v37 }
 0x783   : > { %v4360_v15 = vmax.f32 %v4297_v16, 0.0  ;;  %3942 = vst.msk [vmem:[#allocation3 + $0xe8] sm:$0xff] %vm1784_vm8, %v3876_v27 }
 0x785   : > { %4392 = vst.msk [vmem:[%s6826_s21 + $0x58] sm:$0xff] %vm2277_vm13, %v4360_v15 }
 0x788   : > { %v4050_v60 = vpop.permute.xlu0 %4049 }
 0x789   : > { %4125 = vst.msk [vmem:[#allocation3 + $0xa0] sm:$0xff] %vm1977_vm10, %v4050_v60  ;;  %v3874_v0 = vpop.permute.xlu1 %3873  ;;  %v3688_v45 = vpop.permute.xlu2 %3687 }
 0x78a   : > { %3941 = vst.msk [vmem:[#allocation3 + $0xe0] sm:$0xff] %vm1784_vm8, %v3874_v0 }
 0x78b   : > { %4133 = vst.msk [vmem:[#allocation3 + $0xe0] sm:$0xff] %vm1977_vm10, %v4066_v34 }
 0x790   : > { %v4299_v59 = vpop.f32.mrf.mxu2  ;;  %v4068_v35 = vpop.permute.xlu0 %4067  ;;  %v4157_v52 = vld [vmem:[#allocation3 + $0xa0] sm:$0xff] }
 0x791   : > { %v4300_v62 = vadd.f32 %v6813_v42, %v4299_v59  ;;  %4134 = vst.msk [vmem:[#allocation3 + $0xe8] sm:$0xff] %vm1977_vm10, %v4068_v35  ;;  %v4052_v32 = vpop.permute.xlu1 %4051  ;;  %v3878_v9 = vpop.permute.xlu2 %3877 }
 0x792   : > { %4126 = vst.msk [vmem:[#allocation3 + $0xa8] sm:$0xff] %vm1977_vm10, %v4052_v32  ;;  %v4165_v57 = vld [vmem:[#allocation3 + $0xe0] sm:$0xff] }
 0x793   : > { %v4361_v36 = vmax.f32 %v4300_v62, 0.0 }
 0x795   : > { %4393 = vst.msk [vmem:[%s6826_s21 + $0x60] sm:$0xff] %vm2277_vm13, %v4361_v36 }
 0x798   : > { %v4301_v4 = vpop.f32.mrf.mxu2  ;;  %v3494_v23 = vpop.permute.xlu0 %3493  ;;  %v4166_v24 = vld [vmem:[#allocation3 + $0xe8] sm:$0xff] }
 0x799   : > { %v4302_v13 = vadd.f32 %v6813_v42, %v4301_v4  ;;  %3559 = vst.msk [vmem:[#allocation3 + $0xf0] sm:$0xff] %vm1397_vm6, %v3494_v23  ;;  %v3478_v14 = vpop.permute.xlu1 %3477  ;;  %v4158_v46 = vld [vmem:[#allocation3 + $0xa8] sm:$0xff]  ;;  %v4183_v56 = vpack.c.bf16 %v4166_v24, %v4165_v57  ;;  %v4056_v58 = vpop.permute.xlu2 %4055 }
 0x79a   : > { %3551 = vst.msk [vmem:[#allocation3 + $0xb0] sm:$0xff] %vm1397_vm6, %v3478_v14  ;;  %v4179_v50 = vpack.c.bf16 %v4158_v46, %v4157_v52 }
 0x79b   : > { %v4362_v61 = vmax.f32 %v4302_v13, 0.0  ;;  %3743 = vst.msk [vmem:[#allocation3 + $0xb0] sm:$0xff] %vm1591_vm7, %v3670_v40  ;;  %4539 = vmatmul.msk.bf16.gmra.mxu3 %vm2082_vm11, %v4183_v56 }
 0x79c   : > { %4535 = vmatmul.msk.bf16.gmra.mxu2 %vm2082_vm11, %v4179_v50 }
 0x79d   : > { %4394 = vst.msk [vmem:[%s6826_s21 + $0x68] sm:$0xff] %vm2277_vm13, %v4362_v61 }
 0x7a0   : > { %v4304_v2 = vpop.f32.mrf.mxu2  ;;  %v3672_v38 = vpop.permute.xlu0 %3671 }
 0x7a1   : > { %v4305_v12 = vadd.f32 %v6813_v42, %v4304_v2  ;;  %3744 = vst.msk [vmem:[#allocation3 + $0xb8] sm:$0xff] %vm1591_vm7, %v3672_v38  ;;  %v3496_v11 = vpop.permute.xlu1 %3495 }
 0x7a2   : > { %3560 = vst.msk [vmem:[#allocation3 + $0xf8] sm:$0xff] %vm1397_vm6, %v3496_v11 }
 0x7a3   : > { %v4363_v7 = vmax.f32 %v4305_v12, 0.0  ;;  %3752 = vst.msk [vmem:[#allocation3 + $0xf8] sm:$0xff] %vm1591_vm7, %v3688_v45 }
 0x7a5   : > { %4395 = vst.msk [vmem:[%s6826_s21 + $0x70] sm:$0xff] %vm2277_vm13, %v4363_v7 }
 0x7a8   : > { %v4306_v22 = vpop.f32.mrf.mxu2  ;;  %v3862_v1 = vpop.permute.xlu0 %3861 }
 0x7a9   : > { %v4307_v54 = vadd.f32 %v6813_v42, %v4306_v22  ;;  %3935 = vst.msk [vmem:[#allocation3 + $0xb0] sm:$0xff] %vm1784_vm8, %v3862_v1  ;;  %v3686_v21 = vpop.permute.xlu1 %3685 }
 0x7aa   : > { %3751 = vst.msk [vmem:[#allocation3 + $0xf0] sm:$0xff] %vm1591_vm7, %v3686_v21 }
 0x7ab   : > { %v4364_v51 = vmax.f32 %v4307_v54, 0.0  ;;  %3943 = vst.msk [vmem:[#allocation3 + $0xf0] sm:$0xff] %vm1784_vm8, %v3878_v9 }
 0x7ad   : > { %4396 = vst.msk [vmem:[%s6826_s21 + $0x78] sm:$0xff] %vm2277_vm13, %v4364_v51 }
 0x7b0   : > { %v3880_v25 = vpop.permute.xlu0 %3879 }
 0x7b1   : > { %v3864_v49 = vpop.permute.xlu1 %3863  ;;  %3944 = vst.msk [vmem:[#allocation3 + $0xf8] sm:$0xff] %vm1784_vm8, %v3880_v25 }
 0x7b2   : > { %3936 = vst.msk [vmem:[#allocation3 + $0xb8] sm:$0xff] %vm1784_vm8, %v3864_v49 }
 0x7b3   : > { %4128 = vst.msk [vmem:[#allocation3 + $0xb8] sm:$0xff] %vm1977_vm10, %v4056_v58 }
 0x7b8   : > { %v4070_v3 = vpop.permute.xlu0 %4069 }
 0x7b9   : > { %v4054_v28 = vpop.permute.xlu1 %4053  ;;  %4135 = vst.msk [vmem:[#allocation3 + $0xf0] sm:$0xff] %vm1977_vm10, %v4070_v3 }
 0x7ba   : > { %4127 = vst.msk [vmem:[#allocation3 + $0xb0] sm:$0xff] %vm1977_vm10, %v4054_v28  ;;  %v4160_v53 = vld [vmem:[#allocation3 + $0xb8] sm:$0xff] }
 0x7c0   : > { %v4167_v29 = vld [vmem:[#allocation3 + $0xf0] sm:$0xff] }
 0x7c1   : > { %v4072_v17 = vpop.permute.xlu1 %4071  ;;  %v4159_v55 = vld [vmem:[#allocation3 + $0xb0] sm:$0xff] }
 0x7c2   : > { %4136 = vst.msk [vmem:[#allocation3 + $0xf8] sm:$0xff] %vm1977_vm10, %v4072_v17  ;;  %v4180_v48 = vpack.c.bf16 %v4160_v53, %v4159_v55 }
 0x7c4   : > { %4536 = vmatmul.msk.bf16.gmra.mxu2 %vm2082_vm11, %v4180_v48 }
 0x7c7   : > { %v4309_v8 = vpop.f32.mrf.mxu2 }
 0x7c8   : > { %v4310_v44 = vadd.f32 %v6813_v42, %v4309_v8 }
 0x7c9   : > { %v4168_v27 = vld [vmem:[#allocation3 + $0xf8] sm:$0xff] }
 0x7ca   : > { %v4365_v6 = vmax.f32 %v4310_v44, 0.0  ;;  %v4184_v39 = vpack.c.bf16 %v4168_v27, %v4167_v29 }
 0x7cc   : > { %4397 = vst.msk [vmem:[%s6826_s21 + $0x80] sm:$0xff] %vm2277_vm13, %v4365_v6  ;;  %4540 = vmatmul.msk.bf16.gmra.mxu3 %vm2082_vm11, %v4184_v39 }
 0x7cf   : > { %v4311_v10 = vpop.f32.mrf.mxu2  ;;  %v4329_v33 = vpop.f32.mrf.mxu3 }
 0x7d0   : > { %v4312_v34 = vadd.f32 %v6813_v42, %v4311_v10  ;;  %v4330_v18 = vadd.f32 %v6813_v42, %v4329_v33 }
 0x7d2   : > { %v4366_v30 = vmax.f32 %v4312_v34, 0.0  ;;  %v4373_v43 = vmax.f32 %v4330_v18, 0.0 }
 0x7d4   : > { %4398 = vst.msk [vmem:[%s6826_s21 + $0x88] sm:$0xff] %vm2277_vm13, %v4366_v30 }
 0x7d5   : > { %4405 = vst.msk [vmem:[%s6826_s21 + $0xc0] sm:$0xff] %vm2277_vm13, %v4373_v43 }
 0x7d7   : > { %v4331_v26 = vpop.f32.mrf.mxu3 }
 0x7d8   : > { %v4332_v20 = vadd.f32 %v6813_v42, %v4331_v26 }
 0x7da   : > { %v4374_v47 = vmax.f32 %v4332_v20, 0.0 }
 0x7dc   : > { %4406 = vst.msk [vmem:[%s6826_s21 + $0xc8] sm:$0xff] %vm2277_vm13, %v4374_v47 }
 0x7ee   : > { %v4314_v31 = vpop.f32.mrf.mxu2 }
 0x7ef   : > { %v4315_v5 = vadd.f32 %v6813_v42, %v4314_v31 }
 0x7f1   : > { %v4367_v63 = vmax.f32 %v4315_v5, 0.0 }
 0x7f3   : > { %4399 = vst.msk [vmem:[%s6826_s21 + $0x90] sm:$0xff] %vm2277_vm13, %v4367_v63 }
 0x7f6   : > { %v4316_v19 = vpop.f32.mrf.mxu2 }
 0x7f7   : > { %v4317_v41 = vadd.f32 %v6813_v42, %v4316_v19  ;;  %v4334_v16 = vpop.f32.mrf.mxu3 }
 0x7f8   : > { %v4335_v37 = vadd.f32 %v6813_v42, %v4334_v16 }
 0x7f9   : > { %v4368_v15 = vmax.f32 %v4317_v41, 0.0 }
 0x7fa   : > { %v4375_v60 = vmax.f32 %v4335_v37, 0.0 }
 0x7fb   : > { %4400 = vst.msk [vmem:[%s6826_s21 + $0x98] sm:$0xff] %vm2277_vm13, %v4368_v15 }
 0x7fc   : > { %4407 = vst.msk [vmem:[%s6826_s21 + $0xd0] sm:$0xff] %vm2277_vm13, %v4375_v60 }
 0x7ff   : > { %v4336_v0 = vpop.f32.mrf.mxu3 }
 0x800   : > { %v4337_v59 = vadd.f32 %v6813_v42, %v4336_v0 }
 0x802   : > { %v4376_v35 = vmax.f32 %v4337_v59, 0.0 }
 0x804   : > { %4408 = vst.msk [vmem:[%s6826_s21 + $0xd8] sm:$0xff] %vm2277_vm13, %v4376_v35 }
 0x81e   : > { %v4339_v62 = vpop.f32.mrf.mxu3 }
 0x81f   : > { %v4319_v32 = vpop.f32.mrf.mxu2  ;;  %v4340_v40 = vadd.f32 %v6813_v42, %v4339_v62 }
 0x820   : > { %v4320_v36 = vadd.f32 %v6813_v42, %v4319_v32 }
 0x821   : > { %v4377_v4 = vmax.f32 %v4340_v40, 0.0 }
 0x822   : > { %v4369_v23 = vmax.f32 %v4320_v36, 0.0 }
 0x823   : > { %4409 = vst.msk [vmem:[%s6826_s21 + $0xe0] sm:$0xff] %vm2277_vm13, %v4377_v4 }
 0x824   : > { %4401 = vst.msk [vmem:[%s6826_s21 + $0xa0] sm:$0xff] %vm2277_vm13, %v4369_v23 }
 0x826   : > { %v4341_v57 = vpop.f32.mrf.mxu3 }
 0x827   : > { %v4321_v24 = vpop.f32.mrf.mxu2  ;;  %v4342_v13 = vadd.f32 %v6813_v42, %v4341_v57 }
 0x828   : > { %v4322_v14 = vadd.f32 %v6813_v42, %v4321_v24 }
 0x829   : > { %v4378_v52 = vmax.f32 %v4342_v13, 0.0 }
 0x82a   : > { %v4370_v46 = vmax.f32 %v4322_v14, 0.0 }
 0x82b   : > { %4410 = vst.msk [vmem:[%s6826_s21 + $0xe8] sm:$0xff] %vm2277_vm13, %v4378_v52 }
 0x82c   : > { %4402 = vst.msk [vmem:[%s6826_s21 + $0xa8] sm:$0xff] %vm2277_vm13, %v4370_v46 }
 0x847   : > { %v4324_v56 = vpop.f32.mrf.mxu2 }
 0x848   : > { %v4325_v50 = vadd.f32 %v6813_v42, %v4324_v56 }
 0x84a   : > { %v4371_v61 = vmax.f32 %v4325_v50, 0.0 }
 0x84c   : > { %4403 = vst.msk [vmem:[%s6826_s21 + $0xb0] sm:$0xff] %vm2277_vm13, %v4371_v61 }
 0x84f   : > { %v4326_v45 = vpop.f32.mrf.mxu2  ;;  %v4344_v2 = vpop.f32.mrf.mxu3 }
 0x850   : > { %v4327_v38 = vadd.f32 %v6813_v42, %v4326_v45  ;;  %v4345_v12 = vadd.f32 %v6813_v42, %v4344_v2 }
 0x852   : > { %v4372_v11 = vmax.f32 %v4327_v38, 0.0  ;;  %v4379_v7 = vmax.f32 %v4345_v12, 0.0 }
 0x854   : > { %4404 = vst.msk [vmem:[%s6826_s21 + $0xb8] sm:$0xff] %vm2277_vm13, %v4372_v11 }
 0x855   : > { %4411 = vst.msk [vmem:[%s6826_s21 + $0xf0] sm:$0xff] %vm2277_vm13, %v4379_v7 }
 0x857   : > { %v4346_v9 = vpop.f32.mrf.mxu3 }
 0x858   : > { %v4347_v22 = vadd.f32 %v6813_v42, %v4346_v9 }
 0x85a   : > { %v4380_v1 = vmax.f32 %v4347_v22, 0.0 }
 0x85c   : > { %4412 = vst.msk [vmem:[%s6826_s21 + $0xf8] sm:$0xff] %vm2277_vm13, %v4380_v1 }
 0x85d PF: > { %s17_s24 = sadd.s32 1, %s4582_s24  }
 0x85e   : > { %p14_p4 = scmp.ge.s32.totalorder %s17_s24, 4  }
 0x860   :  { %16 = sbr.rel (!%p14_p4) target bundleno = 1 (0x1), region = 80 }

</bundles_post_ra>
